<compile_context>
chip_gen: v7x
topology: tpu7x:2x2x1
jax: 0.10.0
libtpu: 0.0.40
codegen_flags: <defaults>
</compile_context>

<pallas_src>
import jax
import jax.numpy as jnp
from jax.experimental import pallas as pl
from jax.experimental.pallas import tpu as pltpu

# ----------------------------- config -------------------------------------
BATCH = 2
IMG_C, IMG_H, IMG_W = 3, 16, 16
PATCH = 8                      # -> 2x2 = 4 patches, 5 visual tokens
VIS_WIDTH = 64
TXT_WIDTH = 64                 # ctx_dim (ln_final.weight.shape[0])
N_HEADS = 4
N_LAYERS = 2
EMBED_DIM = 32                 # joint CLIP embedding dim
N_CTX = 4                      # coop_hyperparams['m_words']
CTX_LEN = 8                    # tokenized prompt length
NEG_INF = -1e30

VMEM_SPEC = pl.BlockSpec(memory_space=pltpu.MemorySpace.VMEM)
SMEM_SPEC = pl.BlockSpec(memory_space=pltpu.MemorySpace.SMEM)


# ----------------------------- in-kernel helpers ---------------------------
def _layernorm(x, g, b):
    mean = jnp.mean(x, axis=-1, keepdims=True)
    xc = x - mean
    var = jnp.mean(xc * xc, axis=-1, keepdims=True)
    return xc * jax.lax.rsqrt(var + 1e-5) * g + b


def _softmax(s):
    s = s - jnp.max(s, axis=-1, keepdims=True)
    p = jnp.exp(s)
    denom = jnp.sum(p, axis=-1, keepdims=True)
    return p * pl.reciprocal(denom, approx=True)


def _transformer(x, n_elems, T, blk, causal):
    """CLIP residual blocks on a [n_elems*T, D] activation slab (all in vregs)."""
    (ln_ref, wqkv_ref, bqkv_ref, wo_ref, bo_ref,
     w1_ref, b1_ref, w2_ref, b2_ref) = blk
    D = x.shape[-1]
    dh = D // N_HEADS
    scale = 1.0 / float(dh) ** 0.5
    for l in range(N_LAYERS):
        lnp = ln_ref[l]                                    # [4, D]: g1,b1,g2,b2
        h = _layernorm(x, lnp[0:1], lnp[1:2])
        qkv = jnp.dot(h, wqkv_ref[l],
                      preferred_element_type=jnp.float32) + bqkv_ref[l]
        elem_outs = []
        for e in range(n_elems):                           # static unroll
            r0 = e * T
            head_outs = []
            for hd in range(N_HEADS):                      # static unroll
                c0 = hd * dh
                q = qkv[r0:r0 + T, c0:c0 + dh]
                k = qkv[r0:r0 + T, D + c0:D + c0 + dh]
                v = qkv[r0:r0 + T, 2 * D + c0:2 * D + c0 + dh]
                s = jnp.dot(q, k.T, preferred_element_type=jnp.float32) * scale
                if causal:
                    ri = jax.lax.broadcasted_iota(jnp.int32, (T, T), 0)
                    ci = jax.lax.broadcasted_iota(jnp.int32, (T, T), 1)
                    s = jnp.where(ri >= ci, s, NEG_INF)
                head_outs.append(
                    jnp.dot(_softmax(s), v, preferred_element_type=jnp.float32))
            elem_outs.append(jnp.concatenate(head_outs, axis=-1))   # [T, D]
        a = jnp.concatenate(elem_outs, axis=0)                      # [n_elems*T, D]
        a = jnp.dot(a, wo_ref[l], preferred_element_type=jnp.float32) + bo_ref[l]
        x = x + a
        h2 = _layernorm(x, lnp[2:3], lnp[3:4])
        m = jnp.dot(h2, w1_ref[l], preferred_element_type=jnp.float32) + b1_ref[l]
        m = m * jax.nn.sigmoid(1.702 * m)                  # CLIP QuickGELU
        m = jnp.dot(m, w2_ref[l], preferred_element_type=jnp.float32) + b2_ref[l]
        x = x + m
    return x


# ----------------------------- fused forward kernel ------------------------
def _forward_kernel(
    eot_ref,                                   # SMEM [1] int32 (EOT position)
    patches_ref, v_conv_ref, v_cls_ref, v_pos_ref, v_lnpre_ref,
    v_ln_ref, v_wqkv_ref, v_bqkv_ref, v_wo_ref, v_bo_ref,
    v_w1_ref, v_b1_ref, v_w2_ref, v_b2_ref,
    v_lnpost_ref, v_proj_ref,
    prompts_ref, t_pos_ref,
    t_ln_ref, t_wqkv_ref, t_bqkv_ref, t_wo_ref, t_bo_ref,
    t_w1_ref, t_b1_ref, t_w2_ref, t_b2_ref,
    t_lnfinal_ref, t_proj_ref,
    out_ref,                                   # [B, 1]
):
    # ---------------- vision encoder (CLIP VisionTransformer) ------------
    P = (IMG_H // PATCH) * (IMG_W // PATCH)
    Tn = P + 1
    B = BATCH
    pf = jnp.dot(patches_ref[...], v_conv_ref[...],
                 preferred_element_type=jnp.float32)          # [B*P, D]
    cls = v_cls_ref[...]                                      # [1, D]
    pos = v_pos_ref[...]                                      # [Tn, D]
    rows = []
    for b in range(B):
        rows.append(cls + pos[0:1])
        rows.append(pf[b * P:(b + 1) * P] + pos[1:Tn])
    x = jnp.concatenate(rows, axis=0)                         # [B*Tn, D]
    lnpre = v_lnpre_ref[...]
    x = _layernorm(x, lnpre[0:1], lnpre[1:2])
    v_blks = (v_ln_ref, v_wqkv_ref, v_bqkv_ref, v_wo_ref, v_bo_ref,
              v_w1_ref, v_b1_ref, v_w2_ref, v_b2_ref)
    x = _transformer(x, B, Tn, v_blks, causal=False)          # no mask add
    cls_rows = jnp.concatenate([x[b * Tn:b * Tn + 1] for b in range(B)], axis=0)
    lnpost = v_lnpost_ref[...]
    cls_rows = _layernorm(cls_rows, lnpost[0:1], lnpost[1:2])
    img_feat = jnp.dot(cls_rows, v_proj_ref[...],
                       preferred_element_type=jnp.float32)    # [B, E]

    # ---------------- text encoder (causal transformer) -------------------
    T = CTX_LEN
    xt = prompts_ref[...] + t_pos_ref[...]                    # [T, D]
    t_blks = (t_ln_ref, t_wqkv_ref, t_bqkv_ref, t_wo_ref, t_bo_ref,
              t_w1_ref, t_b1_ref, t_w2_ref, t_b2_ref)
    xt = _transformer(xt, 1, T, t_blks, causal=True)
    lnf = t_lnfinal_ref[...]
    xt = _layernorm(xt, lnf[0:1], lnf[1:2])
    # select EOT row via one-hot matmul (EOT index prefetched to SMEM)
    eot = eot_ref[0]
    onehot = (jax.lax.broadcasted_iota(jnp.int32, (1, T), 1) == eot
              ).astype(jnp.float32)
    feat = jnp.dot(onehot, xt, preferred_element_type=jnp.float32)     # [1, D]
    txt_feat = jnp.dot(feat, t_proj_ref[...],
                       preferred_element_type=jnp.float32)             # [1, E]

    # ---------------- cosine similarity + 4.5 -----------------------------
    img_n = img_feat * jax.lax.rsqrt(
        jnp.sum(img_feat * img_feat, axis=-1, keepdims=True))
    txt_n = txt_feat * jax.lax.rsqrt(
        jnp.sum(txt_feat * txt_feat, axis=-1, keepdims=True))
    # single prompt (Nt=1): img_n @ txt_n.T == row-wise dot product
    out_ref[...] = jnp.sum(img_n * txt_n, axis=-1, keepdims=True) + 4.5


# ----------------------------- wrapper --------------------------------------
def son_clip_forward(img, params):
    """SONCLIPFewShotNet.forward == CLIPLinearProbe.forward (one pallas_call)."""
    vp, tp = params['visual'], params['text']
    B, C, H, W = img.shape
    p = PATCH
    gh, gw = H // p, W // p
    # non-overlapping patches, flattened in (C, ph, pw) order to match the
    # PyTorch conv weight [width, C, p, p] flattening
    patches = (img.reshape(B, C, gh, p, gw, p)
                  .transpose(0, 2, 4, 1, 3, 5)
                  .reshape(B * gh * gw, C * p * p))
    # prompt_learner: cat([prefix, ctx, suffix])
    prompts = jnp.concatenate(
        [tp['token_prefix'], tp['ctx'], tp['token_suffix']], axis=0)
    eot = jnp.argmax(tp['tokenized'], axis=-1).astype(jnp.int32)        # [1]

    vb, tb = vp['blocks'], tp['blocks']
    args = (
        eot,
        patches, vp['conv_w'], vp['class_emb'], vp['pos_emb'], vp['ln_pre'],
        vb['ln'], vb['w_qkv'], vb['b_qkv'], vb['w_o'], vb['b_o'],
        vb['w1'], vb['b1'], vb['w2'], vb['b2'],
        vp['ln_post'], vp['proj'],
        prompts, tp['pos_emb'],
        tb['ln'], tb['w_qkv'], tb['b_qkv'], tb['w_o'], tb['b_o'],
        tb['w1'], tb['b1'], tb['w2'], tb['b2'],
        tp['ln_final'], tp['text_projection'],
    )
    in_specs = [SMEM_SPEC] + [VMEM_SPEC] * (len(args) - 1)
    return pl.pallas_call(
        _forward_kernel,
        out_shape=jax.ShapeDtypeStruct((B, 1), jnp.float32),
        in_specs=in_specs,
        out_specs=VMEM_SPEC,
        compiler_params=pltpu.CompilerParams(
            vmem_limit_bytes=32 * 1024 * 1024),   # well within v7x's 64 MiB
    )(*args)


# ----------------------------- deterministic init --------------------------
def init_encoder_blocks(key, width, n_layers):
    def rnd(k, shape):
        return 0.02 * jax.random.normal(k, shape, jnp.float32)
    layer_keys = jax.random.split(key, n_layers)
    w_qkv, b_qkv, w_o, b_o, w1, b1, w2, b2 = [], [], [], [], [], [], [], []
    for lk in layer_keys:
        ks = jax.random.split(lk, 8)
        w_qkv.append(rnd(ks[0], (width, 3 * width)))
        b_qkv.append(rnd(ks[1], (1, 3 * width)))
        w_o.append(rnd(ks[2], (width, width)))
        b_o.append(rnd(ks[3], (1, width)))
        w1.append(rnd(ks[4], (width, 4 * width)))
        b1.append(rnd(ks[5], (1, 4 * width)))
        w2.append(rnd(ks[6], (4 * width, width)))
        b2.append(rnd(ks[7], (1, width)))
    ones = jnp.ones((width,), jnp.float32)
    zeros = jnp.zeros((width,), jnp.float32)
    ln = jnp.tile(jnp.stack([ones, zeros, ones, zeros])[None], (n_layers, 1, 1))
    return dict(ln=ln,
                w_qkv=jnp.stack(w_qkv), b_qkv=jnp.stack(b_qkv),
                w_o=jnp.stack(w_o), b_o=jnp.stack(b_o),
                w1=jnp.stack(w1), b1=jnp.stack(b1),
                w2=jnp.stack(w2), b2=jnp.stack(b2))


def init_params(key):
    def rnd(k, shape):
        return 0.02 * jax.random.normal(k, shape, jnp.float32)
    kv, kt = jax.random.split(key)
    # --- visual ---
    vks = jax.random.split(kv, 5)
    n_tokens = (IMG_H // PATCH) * (IMG_W // PATCH) + 1
    visual = dict(
        conv_w=rnd(vks[0], (IMG_C * PATCH * PATCH, VIS_WIDTH)),
        class_emb=rnd(vks[1], (1, VIS_WIDTH)),
        pos_emb=rnd(vks[2], (n_tokens, VIS_WIDTH)),
        ln_pre=jnp.stack([jnp.ones((VIS_WIDTH,), jnp.float32),
                          jnp.zeros((VIS_WIDTH,), jnp.float32)]),
        ln_post=jnp.stack([jnp.ones((VIS_WIDTH,), jnp.float32),
                           jnp.zeros((VIS_WIDTH,), jnp.float32)]),
        proj=rnd(vks[3], (VIS_WIDTH, EMBED_DIM)),
        blocks=init_encoder_blocks(vks[4], VIS_WIDTH, N_LAYERS),
    )
    # --- text ---
    tks = jax.random.split(kt, 6)
    n_suffix = CTX_LEN - 1 - N_CTX
    # synthetic tokenized prompt: [SOT, X, X, X, X, '.', EOT, pad]
    tokenized = jnp.array([[49406, 343, 343, 343, 343, 269, 49407, 0]],
                          jnp.int32)
    # TODO(synk): clip.tokenize / token_embedding lookup has no Pallas
    # equivalent; prefix/suffix embeddings are synthesized deterministically.
    text = dict(
        ctx=rnd(tks[0], (N_CTX, TXT_WIDTH)),
        token_prefix=rnd(tks[1], (1, TXT_WIDTH)),
        token_suffix=rnd(tks[2], (n_suffix, TXT_WIDTH)),
        pos_emb=rnd(tks[3], (CTX_LEN, TXT_WIDTH)),
        ln_final=jnp.stack([jnp.ones((TXT_WIDTH,), jnp.float32),
                            jnp.zeros((TXT_WIDTH,), jnp.float32)]),
        text_projection=rnd(tks[4], (TXT_WIDTH, EMBED_DIM)),
        tokenized=tokenized,
        blocks=init_encoder_blocks(tks[5], TXT_WIDTH, N_LAYERS),
    )
    return dict(visual=visual, text=text)


# ----------------------------- main ----------------------------------------
if __name__ == "__main__":
    key = jax.random.PRNGKey(0)
    k_params, k_img = jax.random.split(key)
    params = init_params(k_params)
    img = jax.random.normal(k_img, (BATCH, IMG_C, IMG_H, IMG_W), jnp.float32)

    fwd = jax.jit(son_clip_forward)
    scores = jax.block_until_ready(fwd(img, params))

    assert scores.shape == (BATCH, 1), scores.shape
    assert bool(jnp.all(jnp.isfinite(scores)))
    print("KERNEL_OK")
</pallas_src>

<mosaic_0001>
module attributes {stable_mosaic.version = 11 : i64} {
  func.func @_forward_kernel(%arg0: memref<1xi32, #tpu.memory_space<smem>>, %arg1: memref<8x192xf32, #tpu.memory_space<vmem>>, %arg2: memref<192x64xf32, #tpu.memory_space<vmem>>, %arg3: memref<1x64xf32, #tpu.memory_space<vmem>>, %arg4: memref<5x64xf32, #tpu.memory_space<vmem>>, %arg5: memref<2x64xf32, #tpu.memory_space<vmem>>, %arg6: memref<2x4x64xf32, #tpu.memory_space<vmem>>, %arg7: memref<2x64x192xf32, #tpu.memory_space<vmem>>, %arg8: memref<2x1x192xf32, #tpu.memory_space<vmem>>, %arg9: memref<2x64x64xf32, #tpu.memory_space<vmem>>, %arg10: memref<2x1x64xf32, #tpu.memory_space<vmem>>, %arg11: memref<2x64x256xf32, #tpu.memory_space<vmem>>, %arg12: memref<2x1x256xf32, #tpu.memory_space<vmem>>, %arg13: memref<2x256x64xf32, #tpu.memory_space<vmem>>, %arg14: memref<2x1x64xf32, #tpu.memory_space<vmem>>, %arg15: memref<2x64xf32, #tpu.memory_space<vmem>>, %arg16: memref<64x32xf32, #tpu.memory_space<vmem>>, %arg17: memref<8x64xf32, #tpu.memory_space<vmem>>, %arg18: memref<8x64xf32, #tpu.memory_space<vmem>>, %arg19: memref<2x4x64xf32, #tpu.memory_space<vmem>>, %arg20: memref<2x64x192xf32, #tpu.memory_space<vmem>>, %arg21: memref<2x1x192xf32, #tpu.memory_space<vmem>>, %arg22: memref<2x64x64xf32, #tpu.memory_space<vmem>>, %arg23: memref<2x1x64xf32, #tpu.memory_space<vmem>>, %arg24: memref<2x64x256xf32, #tpu.memory_space<vmem>>, %arg25: memref<2x1x256xf32, #tpu.memory_space<vmem>>, %arg26: memref<2x256x64xf32, #tpu.memory_space<vmem>>, %arg27: memref<2x1x64xf32, #tpu.memory_space<vmem>>, %arg28: memref<2x64xf32, #tpu.memory_space<vmem>>, %arg29: memref<64x32xf32, #tpu.memory_space<vmem>>, %arg30: memref<2x1xf32, #tpu.memory_space<vmem>>) attributes {dimension_semantics = [], scalar_prefetch = 0 : i64, scratch_operands = 0 : i64, tpu.core_type = #tpu.core_type<tc>} {
    %c0 = arith.constant 0 : index
    %c0_0 = arith.constant 0 : index
    %0 = vector.load %arg1[%c0, %c0_0] : memref<8x192xf32, #tpu.memory_space<vmem>>, vector<8x192xf32>
    %c0_1 = arith.constant 0 : index
    %c0_2 = arith.constant 0 : index
    %1 = vector.load %arg2[%c0_1, %c0_2] : memref<192x64xf32, #tpu.memory_space<vmem>>, vector<192x64xf32>
    %cst = arith.constant dense<0.000000e+00> : vector<8x64xf32>
    %2 = tpu.matmul %0, %1, %cst {dimension_numbers = #tpu.dot_dimension_numbers<[1], [0], [0], [1], [0, 0, 1, 1], [], []>} : vector<8x192xf32>, vector<192x64xf32>, vector<8x64xf32> -> vector<8x64xf32>
    %c0_3 = arith.constant 0 : index
    %c0_4 = arith.constant 0 : index
    %3 = vector.load %arg3[%c0_3, %c0_4] : memref<1x64xf32, #tpu.memory_space<vmem>>, vector<1x64xf32>
    %c0_5 = arith.constant 0 : index
    %c0_6 = arith.constant 0 : index
    %4 = vector.load %arg4[%c0_5, %c0_6] : memref<5x64xf32, #tpu.memory_space<vmem>>, vector<5x64xf32>
    %5 = vector.extract_strided_slice %4 {offsets = [0, 0], sizes = [1, 64], strides = [1, 1]} : vector<5x64xf32> to vector<1x64xf32>
    %6 = arith.addf %3, %5 : vector<1x64xf32>
    %7 = vector.extract_strided_slice %2 {offsets = [0, 0], sizes = [4, 64], strides = [1, 1]} : vector<8x64xf32> to vector<4x64xf32>
    %8 = vector.extract_strided_slice %4 {offsets = [1, 0], sizes = [4, 64], strides = [1, 1]} : vector<5x64xf32> to vector<4x64xf32>
    %9 = arith.addf %7, %8 : vector<4x64xf32>
    %10 = vector.extract_strided_slice %4 {offsets = [0, 0], sizes = [1, 64], strides = [1, 1]} : vector<5x64xf32> to vector<1x64xf32>
    %11 = arith.addf %3, %10 : vector<1x64xf32>
    %12 = vector.extract_strided_slice %2 {offsets = [4, 0], sizes = [4, 64], strides = [1, 1]} : vector<8x64xf32> to vector<4x64xf32>
    %13 = vector.extract_strided_slice %4 {offsets = [1, 0], sizes = [4, 64], strides = [1, 1]} : vector<5x64xf32> to vector<4x64xf32>
    %14 = arith.addf %12, %13 : vector<4x64xf32>
    %15 = tpu.concatenate %6, %9, %11, %14 in 0 : vector<1x64xf32>, vector<4x64xf32>, vector<1x64xf32>, vector<4x64xf32> -> vector<10x64xf32>
    %c0_7 = arith.constant 0 : index
    %c0_8 = arith.constant 0 : index
    %16 = vector.load %arg5[%c0_7, %c0_8] : memref<2x64xf32, #tpu.memory_space<vmem>>, vector<2x64xf32>
    %17 = vector.extract_strided_slice %16 {offsets = [0, 0], sizes = [1, 64], strides = [1, 1]} : vector<2x64xf32> to vector<1x64xf32>
    %18 = vector.extract_strided_slice %16 {offsets = [1, 0], sizes = [1, 64], strides = [1, 1]} : vector<2x64xf32> to vector<1x64xf32>
    %cst_9 = arith.constant dense<0.000000e+00> : vector<10xf32>
    %19 = vector.multi_reduction <add>, %15, %cst_9 [1] : vector<10x64xf32> to vector<10xf32>
    %20 = vector.shape_cast %19 : vector<10xf32> to vector<10x1xf32>
    %cst_10 = arith.constant 6.400000e+01 : f32
    %21 = vector.broadcast %cst_10 : f32 to vector<10x1xf32>
    %22 = arith.divf %20, %21 : vector<10x1xf32>
    %23 = vector.broadcast %22 : vector<10x1xf32> to vector<10x64xf32>
    %24 = arith.subf %15, %23 : vector<10x64xf32>
    %25 = arith.mulf %24, %24 : vector<10x64xf32>
    %cst_11 = arith.constant dense<0.000000e+00> : vector<10xf32>
    %26 = vector.multi_reduction <add>, %25, %cst_11 [1] : vector<10x64xf32> to vector<10xf32>
    %27 = vector.shape_cast %26 : vector<10xf32> to vector<10x1xf32>
    %cst_12 = arith.constant 6.400000e+01 : f32
    %28 = vector.broadcast %cst_12 : f32 to vector<10x1xf32>
    %29 = arith.divf %27, %28 : vector<10x1xf32>
    %cst_13 = arith.constant 9.99999974E-6 : f32
    %30 = vector.broadcast %cst_13 : f32 to vector<10x1xf32>
    %31 = arith.addf %29, %30 : vector<10x1xf32>
    %32 = math.rsqrt %31 : vector<10x1xf32>
    %33 = vector.broadcast %32 : vector<10x1xf32> to vector<10x64xf32>
    %34 = arith.mulf %24, %33 : vector<10x64xf32>
    %35 = vector.broadcast %17 : vector<1x64xf32> to vector<10x64xf32>
    %36 = arith.mulf %34, %35 : vector<10x64xf32>
    %37 = vector.broadcast %18 : vector<1x64xf32> to vector<10x64xf32>
    %38 = arith.addf %36, %37 : vector<10x64xf32>
    %c0_14 = arith.constant 0 : index
    %c0_15 = arith.constant 0 : index
    %c0_16 = arith.constant 0 : index
    %39 = vector.load %arg6[%c0_14, %c0_15, %c0_16] : memref<2x4x64xf32, #tpu.memory_space<vmem>>, vector<1x4x64xf32>
    %40 = vector.shape_cast %39 : vector<1x4x64xf32> to vector<4x64xf32>
    %41 = vector.extract_strided_slice %40 {offsets = [0, 0], sizes = [1, 64], strides = [1, 1]} : vector<4x64xf32> to vector<1x64xf32>
    %42 = vector.extract_strided_slice %40 {offsets = [1, 0], sizes = [1, 64], strides = [1, 1]} : vector<4x64xf32> to vector<1x64xf32>
    %cst_17 = arith.constant dense<0.000000e+00> : vector<10xf32>
    %43 = vector.multi_reduction <add>, %38, %cst_17 [1] : vector<10x64xf32> to vector<10xf32>
    %44 = vector.shape_cast %43 : vector<10xf32> to vector<10x1xf32>
    %cst_18 = arith.constant 6.400000e+01 : f32
    %45 = vector.broadcast %cst_18 : f32 to vector<10x1xf32>
    %46 = arith.divf %44, %45 : vector<10x1xf32>
    %47 = vector.broadcast %46 : vector<10x1xf32> to vector<10x64xf32>
    %48 = arith.subf %38, %47 : vector<10x64xf32>
    %49 = arith.mulf %48, %48 : vector<10x64xf32>
    %cst_19 = arith.constant dense<0.000000e+00> : vector<10xf32>
    %50 = vector.multi_reduction <add>, %49, %cst_19 [1] : vector<10x64xf32> to vector<10xf32>
    %51 = vector.shape_cast %50 : vector<10xf32> to vector<10x1xf32>
    %cst_20 = arith.constant 6.400000e+01 : f32
    %52 = vector.broadcast %cst_20 : f32 to vector<10x1xf32>
    %53 = arith.divf %51, %52 : vector<10x1xf32>
    %cst_21 = arith.constant 9.99999974E-6 : f32
    %54 = vector.broadcast %cst_21 : f32 to vector<10x1xf32>
    %55 = arith.addf %53, %54 : vector<10x1xf32>
    %56 = math.rsqrt %55 : vector<10x1xf32>
    %57 = vector.broadcast %56 : vector<10x1xf32> to vector<10x64xf32>
    %58 = arith.mulf %48, %57 : vector<10x64xf32>
    %59 = vector.broadcast %41 : vector<1x64xf32> to vector<10x64xf32>
    %60 = arith.mulf %58, %59 : vector<10x64xf32>
    %61 = vector.broadcast %42 : vector<1x64xf32> to vector<10x64xf32>
    %62 = arith.addf %60, %61 : vector<10x64xf32>
    %c0_22 = arith.constant 0 : index
    %c0_23 = arith.constant 0 : index
    %c0_24 = arith.constant 0 : index
    %63 = vector.load %arg7[%c0_22, %c0_23, %c0_24] : memref<2x64x192xf32, #tpu.memory_space<vmem>>, vector<1x64x192xf32>
    %64 = vector.shape_cast %63 : vector<1x64x192xf32> to vector<64x192xf32>
    %cst_25 = arith.constant dense<0.000000e+00> : vector<10x192xf32>
    %65 = tpu.matmul %62, %64, %cst_25 {dimension_numbers = #tpu.dot_dimension_numbers<[1], [0], [0], [1], [0, 0, 1, 1], [], []>} : vector<10x64xf32>, vector<64x192xf32>, vector<10x192xf32> -> vector<10x192xf32>
    %c0_26 = arith.constant 0 : index
    %c0_27 = arith.constant 0 : index
    %c0_28 = arith.constant 0 : index
    %66 = vector.load %arg8[%c0_26, %c0_27, %c0_28] : memref<2x1x192xf32, #tpu.memory_space<vmem>>, vector<1x1x192xf32>
    %67 = vector.shape_cast %66 : vector<1x1x192xf32> to vector<1x192xf32>
    %68 = vector.broadcast %67 : vector<1x192xf32> to vector<10x192xf32>
    %69 = arith.addf %65, %68 : vector<10x192xf32>
    %70 = vector.extract_strided_slice %69 {offsets = [0, 0], sizes = [5, 16], strides = [1, 1]} : vector<10x192xf32> to vector<5x16xf32>
    %71 = vector.extract_strided_slice %69 {offsets = [0, 64], sizes = [5, 16], strides = [1, 1]} : vector<10x192xf32> to vector<5x16xf32>
    %72 = vector.extract_strided_slice %69 {offsets = [0, 128], sizes = [5, 16], strides = [1, 1]} : vector<10x192xf32> to vector<5x16xf32>
    %73 = tpu.transpose %71, [1, 0] : vector<5x16xf32> -> vector<16x5xf32>
    %cst_29 = arith.constant dense<0.000000e+00> : vector<5x5xf32>
    %74 = tpu.matmul %70, %73, %cst_29 {dimension_numbers = #tpu.dot_dimension_numbers<[1], [0], [0], [1], [0, 0, 1, 1], [], []>} : vector<5x16xf32>, vector<16x5xf32>, vector<5x5xf32> -> vector<5x5xf32>
    %cst_30 = arith.constant 2.500000e-01 : f32
    %75 = vector.broadcast %cst_30 : f32 to vector<5x5xf32>
    %76 = arith.mulf %74, %75 : vector<5x5xf32>
    %cst_31 = arith.constant dense<0xFF800000> : vector<5xf32>
    %77 = vector.multi_reduction <maximumf>, %76, %cst_31 [1] : vector<5x5xf32> to vector<5xf32>
    %78 = vector.shape_cast %77 : vector<5xf32> to vector<5x1xf32>
    %79 = vector.broadcast %78 : vector<5x1xf32> to vector<5x5xf32>
    %80 = arith.subf %76, %79 : vector<5x5xf32>
    %81 = math.exp %80 : vector<5x5xf32>
    %cst_32 = arith.constant dense<0.000000e+00> : vector<5xf32>
    %82 = vector.multi_reduction <add>, %81, %cst_32 [1] : vector<5x5xf32> to vector<5xf32>
    %83 = vector.shape_cast %82 : vector<5xf32> to vector<5x1xf32>
    %84 = tpu.reciprocal %83 {approx = true} : vector<5x1xf32> -> vector<5x1xf32>
    %85 = vector.broadcast %84 : vector<5x1xf32> to vector<5x5xf32>
    %86 = arith.mulf %81, %85 : vector<5x5xf32>
    %cst_33 = arith.constant dense<0.000000e+00> : vector<5x16xf32>
    %87 = tpu.matmul %86, %72, %cst_33 {dimension_numbers = #tpu.dot_dimension_numbers<[1], [0], [0], [1], [0, 0, 1, 1], [], []>} : vector<5x5xf32>, vector<5x16xf32>, vector<5x16xf32> -> vector<5x16xf32>
    %88 = vector.extract_strided_slice %69 {offsets = [0, 16], sizes = [5, 16], strides = [1, 1]} : vector<10x192xf32> to vector<5x16xf32>
    %89 = vector.extract_strided_slice %69 {offsets = [0, 80], sizes = [5, 16], strides = [1, 1]} : vector<10x192xf32> to vector<5x16xf32>
    %90 = vector.extract_strided_slice %69 {offsets = [0, 144], sizes = [5, 16], strides = [1, 1]} : vector<10x192xf32> to vector<5x16xf32>
    %91 = tpu.transpose %89, [1, 0] : vector<5x16xf32> -> vector<16x5xf32>
    %cst_34 = arith.constant dense<0.000000e+00> : vector<5x5xf32>
    %92 = tpu.matmul %88, %91, %cst_34 {dimension_numbers = #tpu.dot_dimension_numbers<[1], [0], [0], [1], [0, 0, 1, 1], [], []>} : vector<5x16xf32>, vector<16x5xf32>, vector<5x5xf32> -> vector<5x5xf32>
    %cst_35 = arith.constant 2.500000e-01 : f32
    %93 = vector.broadcast %cst_35 : f32 to vector<5x5xf32>
    %94 = arith.mulf %92, %93 : vector<5x5xf32>
    %cst_36 = arith.constant dense<0xFF800000> : vector<5xf32>
    %95 = vector.multi_reduction <maximumf>, %94, %cst_36 [1] : vector<5x5xf32> to vector<5xf32>
    %96 = vector.shape_cast %95 : vector<5xf32> to vector<5x1xf32>
    %97 = vector.broadcast %96 : vector<5x1xf32> to vector<5x5xf32>
    %98 = arith.subf %94, %97 : vector<5x5xf32>
    %99 = math.exp %98 : vector<5x5xf32>
    %cst_37 = arith.constant dense<0.000000e+00> : vector<5xf32>
    %100 = vector.multi_reduction <add>, %99, %cst_37 [1] : vector<5x5xf32> to vector<5xf32>
    %101 = vector.shape_cast %100 : vector<5xf32> to vector<5x1xf32>
    %102 = tpu.reciprocal %101 {approx = true} : vector<5x1xf32> -> vector<5x1xf32>
    %103 = vector.broadcast %102 : vector<5x1xf32> to vector<5x5xf32>
    %104 = arith.mulf %99, %103 : vector<5x5xf32>
    %cst_38 = arith.constant dense<0.000000e+00> : vector<5x16xf32>
    %105 = tpu.matmul %104, %90, %cst_38 {dimension_numbers = #tpu.dot_dimension_numbers<[1], [0], [0], [1], [0, 0, 1, 1], [], []>} : vector<5x5xf32>, vector<5x16xf32>, vector<5x16xf32> -> vector<5x16xf32>
    %106 = vector.extract_strided_slice %69 {offsets = [0, 32], sizes = [5, 16], strides = [1, 1]} : vector<10x192xf32> to vector<5x16xf32>
    %107 = vector.extract_strided_slice %69 {offsets = [0, 96], sizes = [5, 16], strides = [1, 1]} : vector<10x192xf32> to vector<5x16xf32>
    %108 = vector.extract_strided_slice %69 {offsets = [0, 160], sizes = [5, 16], strides = [1, 1]} : vector<10x192xf32> to vector<5x16xf32>
    %109 = tpu.transpose %107, [1, 0] : vector<5x16xf32> -> vector<16x5xf32>
    %cst_39 = arith.constant dense<0.000000e+00> : vector<5x5xf32>
    %110 = tpu.matmul %106, %109, %cst_39 {dimension_numbers = #tpu.dot_dimension_numbers<[1], [0], [0], [1], [0, 0, 1, 1], [], []>} : vector<5x16xf32>, vector<16x5xf32>, vector<5x5xf32> -> vector<5x5xf32>
    %cst_40 = arith.constant 2.500000e-01 : f32
    %111 = vector.broadcast %cst_40 : f32 to vector<5x5xf32>
    %112 = arith.mulf %110, %111 : vector<5x5xf32>
    %cst_41 = arith.constant dense<0xFF800000> : vector<5xf32>
    %113 = vector.multi_reduction <maximumf>, %112, %cst_41 [1] : vector<5x5xf32> to vector<5xf32>
    %114 = vector.shape_cast %113 : vector<5xf32> to vector<5x1xf32>
    %115 = vector.broadcast %114 : vector<5x1xf32> to vector<5x5xf32>
    %116 = arith.subf %112, %115 : vector<5x5xf32>
    %117 = math.exp %116 : vector<5x5xf32>
    %cst_42 = arith.constant dense<0.000000e+00> : vector<5xf32>
    %118 = vector.multi_reduction <add>, %117, %cst_42 [1] : vector<5x5xf32> to vector<5xf32>
    %119 = vector.shape_cast %118 : vector<5xf32> to vector<5x1xf32>
    %120 = tpu.reciprocal %119 {approx = true} : vector<5x1xf32> -> vector<5x1xf32>
    %121 = vector.broadcast %120 : vector<5x1xf32> to vector<5x5xf32>
    %122 = arith.mulf %117, %121 : vector<5x5xf32>
    %cst_43 = arith.constant dense<0.000000e+00> : vector<5x16xf32>
    %123 = tpu.matmul %122, %108, %cst_43 {dimension_numbers = #tpu.dot_dimension_numbers<[1], [0], [0], [1], [0, 0, 1, 1], [], []>} : vector<5x5xf32>, vector<5x16xf32>, vector<5x16xf32> -> vector<5x16xf32>
    %124 = vector.extract_strided_slice %69 {offsets = [0, 48], sizes = [5, 16], strides = [1, 1]} : vector<10x192xf32> to vector<5x16xf32>
    %125 = vector.extract_strided_slice %69 {offsets = [0, 112], sizes = [5, 16], strides = [1, 1]} : vector<10x192xf32> to vector<5x16xf32>
    %126 = vector.extract_strided_slice %69 {offsets = [0, 176], sizes = [5, 16], strides = [1, 1]} : vector<10x192xf32> to vector<5x16xf32>
    %127 = tpu.transpose %125, [1, 0] : vector<5x16xf32> -> vector<16x5xf32>
    %cst_44 = arith.constant dense<0.000000e+00> : vector<5x5xf32>
    %128 = tpu.matmul %124, %127, %cst_44 {dimension_numbers = #tpu.dot_dimension_numbers<[1], [0], [0], [1], [0, 0, 1, 1], [], []>} : vector<5x16xf32>, vector<16x5xf32>, vector<5x5xf32> -> vector<5x5xf32>
    %cst_45 = arith.constant 2.500000e-01 : f32
    %129 = vector.broadcast %cst_45 : f32 to vector<5x5xf32>
    %130 = arith.mulf %128, %129 : vector<5x5xf32>
    %cst_46 = arith.constant dense<0xFF800000> : vector<5xf32>
    %131 = vector.multi_reduction <maximumf>, %130, %cst_46 [1] : vector<5x5xf32> to vector<5xf32>
    %132 = vector.shape_cast %131 : vector<5xf32> to vector<5x1xf32>
    %133 = vector.broadcast %132 : vector<5x1xf32> to vector<5x5xf32>
    %134 = arith.subf %130, %133 : vector<5x5xf32>
    %135 = math.exp %134 : vector<5x5xf32>
    %cst_47 = arith.constant dense<0.000000e+00> : vector<5xf32>
    %136 = vector.multi_reduction <add>, %135, %cst_47 [1] : vector<5x5xf32> to vector<5xf32>
    %137 = vector.shape_cast %136 : vector<5xf32> to vector<5x1xf32>
    %138 = tpu.reciprocal %137 {approx = true} : vector<5x1xf32> -> vector<5x1xf32>
    %139 = vector.broadcast %138 : vector<5x1xf32> to vector<5x5xf32>
    %140 = arith.mulf %135, %139 : vector<5x5xf32>
    %cst_48 = arith.constant dense<0.000000e+00> : vector<5x16xf32>
    %141 = tpu.matmul %140, %126, %cst_48 {dimension_numbers = #tpu.dot_dimension_numbers<[1], [0], [0], [1], [0, 0, 1, 1], [], []>} : vector<5x5xf32>, vector<5x16xf32>, vector<5x16xf32> -> vector<5x16xf32>
    %142 = tpu.concatenate %87, %105, %123, %141 in 1 : vector<5x16xf32>, vector<5x16xf32>, vector<5x16xf32>, vector<5x16xf32> -> vector<5x64xf32>
    %143 = vector.extract_strided_slice %69 {offsets = [5, 0], sizes = [5, 16], strides = [1, 1]} : vector<10x192xf32> to vector<5x16xf32>
    %144 = vector.extract_strided_slice %69 {offsets = [5, 64], sizes = [5, 16], strides = [1, 1]} : vector<10x192xf32> to vector<5x16xf32>
    %145 = vector.extract_strided_slice %69 {offsets = [5, 128], sizes = [5, 16], strides = [1, 1]} : vector<10x192xf32> to vector<5x16xf32>
    %146 = tpu.transpose %144, [1, 0] : vector<5x16xf32> -> vector<16x5xf32>
    %cst_49 = arith.constant dense<0.000000e+00> : vector<5x5xf32>
    %147 = tpu.matmul %143, %146, %cst_49 {dimension_numbers = #tpu.dot_dimension_numbers<[1], [0], [0], [1], [0, 0, 1, 1], [], []>} : vector<5x16xf32>, vector<16x5xf32>, vector<5x5xf32> -> vector<5x5xf32>
    %cst_50 = arith.constant 2.500000e-01 : f32
    %148 = vector.broadcast %cst_50 : f32 to vector<5x5xf32>
    %149 = arith.mulf %147, %148 : vector<5x5xf32>
    %cst_51 = arith.constant dense<0xFF800000> : vector<5xf32>
    %150 = vector.multi_reduction <maximumf>, %149, %cst_51 [1] : vector<5x5xf32> to vector<5xf32>
    %151 = vector.shape_cast %150 : vector<5xf32> to vector<5x1xf32>
    %152 = vector.broadcast %151 : vector<5x1xf32> to vector<5x5xf32>
    %153 = arith.subf %149, %152 : vector<5x5xf32>
    %154 = math.exp %153 : vector<5x5xf32>
    %cst_52 = arith.constant dense<0.000000e+00> : vector<5xf32>
    %155 = vector.multi_reduction <add>, %154, %cst_52 [1] : vector<5x5xf32> to vector<5xf32>
    %156 = vector.shape_cast %155 : vector<5xf32> to vector<5x1xf32>
    %157 = tpu.reciprocal %156 {approx = true} : vector<5x1xf32> -> vector<5x1xf32>
    %158 = vector.broadcast %157 : vector<5x1xf32> to vector<5x5xf32>
    %159 = arith.mulf %154, %158 : vector<5x5xf32>
    %cst_53 = arith.constant dense<0.000000e+00> : vector<5x16xf32>
    %160 = tpu.matmul %159, %145, %cst_53 {dimension_numbers = #tpu.dot_dimension_numbers<[1], [0], [0], [1], [0, 0, 1, 1], [], []>} : vector<5x5xf32>, vector<5x16xf32>, vector<5x16xf32> -> vector<5x16xf32>
    %161 = vector.extract_strided_slice %69 {offsets = [5, 16], sizes = [5, 16], strides = [1, 1]} : vector<10x192xf32> to vector<5x16xf32>
    %162 = vector.extract_strided_slice %69 {offsets = [5, 80], sizes = [5, 16], strides = [1, 1]} : vector<10x192xf32> to vector<5x16xf32>
    %163 = vector.extract_strided_slice %69 {offsets = [5, 144], sizes = [5, 16], strides = [1, 1]} : vector<10x192xf32> to vector<5x16xf32>
    %164 = tpu.transpose %162, [1, 0] : vector<5x16xf32> -> vector<16x5xf32>
    %cst_54 = arith.constant dense<0.000000e+00> : vector<5x5xf32>
    %165 = tpu.matmul %161, %164, %cst_54 {dimension_numbers = #tpu.dot_dimension_numbers<[1], [0], [0], [1], [0, 0, 1, 1], [], []>} : vector<5x16xf32>, vector<16x5xf32>, vector<5x5xf32> -> vector<5x5xf32>
    %cst_55 = arith.constant 2.500000e-01 : f32
    %166 = vector.broadcast %cst_55 : f32 to vector<5x5xf32>
    %167 = arith.mulf %165, %166 : vector<5x5xf32>
    %cst_56 = arith.constant dense<0xFF800000> : vector<5xf32>
    %168 = vector.multi_reduction <maximumf>, %167, %cst_56 [1] : vector<5x5xf32> to vector<5xf32>
    %169 = vector.shape_cast %168 : vector<5xf32> to vector<5x1xf32>
    %170 = vector.broadcast %169 : vector<5x1xf32> to vector<5x5xf32>
    %171 = arith.subf %167, %170 : vector<5x5xf32>
    %172 = math.exp %171 : vector<5x5xf32>
    %cst_57 = arith.constant dense<0.000000e+00> : vector<5xf32>
    %173 = vector.multi_reduction <add>, %172, %cst_57 [1] : vector<5x5xf32> to vector<5xf32>
    %174 = vector.shape_cast %173 : vector<5xf32> to vector<5x1xf32>
    %175 = tpu.reciprocal %174 {approx = true} : vector<5x1xf32> -> vector<5x1xf32>
    %176 = vector.broadcast %175 : vector<5x1xf32> to vector<5x5xf32>
    %177 = arith.mulf %172, %176 : vector<5x5xf32>
    %cst_58 = arith.constant dense<0.000000e+00> : vector<5x16xf32>
    %178 = tpu.matmul %177, %163, %cst_58 {dimension_numbers = #tpu.dot_dimension_numbers<[1], [0], [0], [1], [0, 0, 1, 1], [], []>} : vector<5x5xf32>, vector<5x16xf32>, vector<5x16xf32> -> vector<5x16xf32>
    %179 = vector.extract_strided_slice %69 {offsets = [5, 32], sizes = [5, 16], strides = [1, 1]} : vector<10x192xf32> to vector<5x16xf32>
    %180 = vector.extract_strided_slice %69 {offsets = [5, 96], sizes = [5, 16], strides = [1, 1]} : vector<10x192xf32> to vector<5x16xf32>
    %181 = vector.extract_strided_slice %69 {offsets = [5, 160], sizes = [5, 16], strides = [1, 1]} : vector<10x192xf32> to vector<5x16xf32>
    %182 = tpu.transpose %180, [1, 0] : vector<5x16xf32> -> vector<16x5xf32>
    %cst_59 = arith.constant dense<0.000000e+00> : vector<5x5xf32>
    %183 = tpu.matmul %179, %182, %cst_59 {dimension_numbers = #tpu.dot_dimension_numbers<[1], [0], [0], [1], [0, 0, 1, 1], [], []>} : vector<5x16xf32>, vector<16x5xf32>, vector<5x5xf32> -> vector<5x5xf32>
    %cst_60 = arith.constant 2.500000e-01 : f32
    %184 = vector.broadcast %cst_60 : f32 to vector<5x5xf32>
    %185 = arith.mulf %183, %184 : vector<5x5xf32>
    %cst_61 = arith.constant dense<0xFF800000> : vector<5xf32>
    %186 = vector.multi_reduction <maximumf>, %185, %cst_61 [1] : vector<5x5xf32> to vector<5xf32>
    %187 = vector.shape_cast %186 : vector<5xf32> to vector<5x1xf32>
    %188 = vector.broadcast %187 : vector<5x1xf32> to vector<5x5xf32>
    %189 = arith.subf %185, %188 : vector<5x5xf32>
    %190 = math.exp %189 : vector<5x5xf32>
    %cst_62 = arith.constant dense<0.000000e+00> : vector<5xf32>
    %191 = vector.multi_reduction <add>, %190, %cst_62 [1] : vector<5x5xf32> to vector<5xf32>
    %192 = vector.shape_cast %191 : vector<5xf32> to vector<5x1xf32>
    %193 = tpu.reciprocal %192 {approx = true} : vector<5x1xf32> -> vector<5x1xf32>
    %194 = vector.broadcast %193 : vector<5x1xf32> to vector<5x5xf32>
    %195 = arith.mulf %190, %194 : vector<5x5xf32>
    %cst_63 = arith.constant dense<0.000000e+00> : vector<5x16xf32>
    %196 = tpu.matmul %195, %181, %cst_63 {dimension_numbers = #tpu.dot_dimension_numbers<[1], [0], [0], [1], [0, 0, 1, 1], [], []>} : vector<5x5xf32>, vector<5x16xf32>, vector<5x16xf32> -> vector<5x16xf32>
    %197 = vector.extract_strided_slice %69 {offsets = [5, 48], sizes = [5, 16], strides = [1, 1]} : vector<10x192xf32> to vector<5x16xf32>
    %198 = vector.extract_strided_slice %69 {offsets = [5, 112], sizes = [5, 16], strides = [1, 1]} : vector<10x192xf32> to vector<5x16xf32>
    %199 = vector.extract_strided_slice %69 {offsets = [5, 176], sizes = [5, 16], strides = [1, 1]} : vector<10x192xf32> to vector<5x16xf32>
    %200 = tpu.transpose %198, [1, 0] : vector<5x16xf32> -> vector<16x5xf32>
    %cst_64 = arith.constant dense<0.000000e+00> : vector<5x5xf32>
    %201 = tpu.matmul %197, %200, %cst_64 {dimension_numbers = #tpu.dot_dimension_numbers<[1], [0], [0], [1], [0, 0, 1, 1], [], []>} : vector<5x16xf32>, vector<16x5xf32>, vector<5x5xf32> -> vector<5x5xf32>
    %cst_65 = arith.constant 2.500000e-01 : f32
    %202 = vector.broadcast %cst_65 : f32 to vector<5x5xf32>
    %203 = arith.mulf %201, %202 : vector<5x5xf32>
    %cst_66 = arith.constant dense<0xFF800000> : vector<5xf32>
    %204 = vector.multi_reduction <maximumf>, %203, %cst_66 [1] : vector<5x5xf32> to vector<5xf32>
    %205 = vector.shape_cast %204 : vector<5xf32> to vector<5x1xf32>
    %206 = vector.broadcast %205 : vector<5x1xf32> to vector<5x5xf32>
    %207 = arith.subf %203, %206 : vector<5x5xf32>
    %208 = math.exp %207 : vector<5x5xf32>
    %cst_67 = arith.constant dense<0.000000e+00> : vector<5xf32>
    %209 = vector.multi_reduction <add>, %208, %cst_67 [1] : vector<5x5xf32> to vector<5xf32>
    %210 = vector.shape_cast %209 : vector<5xf32> to vector<5x1xf32>
    %211 = tpu.reciprocal %210 {approx = true} : vector<5x1xf32> -> vector<5x1xf32>
    %212 = vector.broadcast %211 : vector<5x1xf32> to vector<5x5xf32>
    %213 = arith.mulf %208, %212 : vector<5x5xf32>
    %cst_68 = arith.constant dense<0.000000e+00> : vector<5x16xf32>
    %214 = tpu.matmul %213, %199, %cst_68 {dimension_numbers = #tpu.dot_dimension_numbers<[1], [0], [0], [1], [0, 0, 1, 1], [], []>} : vector<5x5xf32>, vector<5x16xf32>, vector<5x16xf32> -> vector<5x16xf32>
    %215 = tpu.concatenate %160, %178, %196, %214 in 1 : vector<5x16xf32>, vector<5x16xf32>, vector<5x16xf32>, vector<5x16xf32> -> vector<5x64xf32>
    %216 = tpu.concatenate %142, %215 in 0 : vector<5x64xf32>, vector<5x64xf32> -> vector<10x64xf32>
    %c0_69 = arith.constant 0 : index
    %c0_70 = arith.constant 0 : index
    %c0_71 = arith.constant 0 : index
    %217 = vector.load %arg9[%c0_69, %c0_70, %c0_71] : memref<2x64x64xf32, #tpu.memory_space<vmem>>, vector<1x64x64xf32>
    %218 = vector.shape_cast %217 : vector<1x64x64xf32> to vector<64x64xf32>
    %cst_72 = arith.constant dense<0.000000e+00> : vector<10x64xf32>
    %219 = tpu.matmul %216, %218, %cst_72 {dimension_numbers = #tpu.dot_dimension_numbers<[1], [0], [0], [1], [0, 0, 1, 1], [], []>} : vector<10x64xf32>, vector<64x64xf32>, vector<10x64xf32> -> vector<10x64xf32>
    %c0_73 = arith.constant 0 : index
    %c0_74 = arith.constant 0 : index
    %c0_75 = arith.constant 0 : index
    %220 = vector.load %arg10[%c0_73, %c0_74, %c0_75] : memref<2x1x64xf32, #tpu.memory_space<vmem>>, vector<1x1x64xf32>
    %221 = vector.shape_cast %220 : vector<1x1x64xf32> to vector<1x64xf32>
    %222 = vector.broadcast %221 : vector<1x64xf32> to vector<10x64xf32>
    %223 = arith.addf %219, %222 : vector<10x64xf32>
    %224 = arith.addf %38, %223 : vector<10x64xf32>
    %225 = vector.extract_strided_slice %40 {offsets = [2, 0], sizes = [1, 64], strides = [1, 1]} : vector<4x64xf32> to vector<1x64xf32>
    %226 = vector.extract_strided_slice %40 {offsets = [3, 0], sizes = [1, 64], strides = [1, 1]} : vector<4x64xf32> to vector<1x64xf32>
    %cst_76 = arith.constant dense<0.000000e+00> : vector<10xf32>
    %227 = vector.multi_reduction <add>, %224, %cst_76 [1] : vector<10x64xf32> to vector<10xf32>
    %228 = vector.shape_cast %227 : vector<10xf32> to vector<10x1xf32>
    %cst_77 = arith.constant 6.400000e+01 : f32
    %229 = vector.broadcast %cst_77 : f32 to vector<10x1xf32>
    %230 = arith.divf %228, %229 : vector<10x1xf32>
    %231 = vector.broadcast %230 : vector<10x1xf32> to vector<10x64xf32>
    %232 = arith.subf %224, %231 : vector<10x64xf32>
    %233 = arith.mulf %232, %232 : vector<10x64xf32>
    %cst_78 = arith.constant dense<0.000000e+00> : vector<10xf32>
    %234 = vector.multi_reduction <add>, %233, %cst_78 [1] : vector<10x64xf32> to vector<10xf32>
    %235 = vector.shape_cast %234 : vector<10xf32> to vector<10x1xf32>
    %cst_79 = arith.constant 6.400000e+01 : f32
    %236 = vector.broadcast %cst_79 : f32 to vector<10x1xf32>
    %237 = arith.divf %235, %236 : vector<10x1xf32>
    %cst_80 = arith.constant 9.99999974E-6 : f32
    %238 = vector.broadcast %cst_80 : f32 to vector<10x1xf32>
    %239 = arith.addf %237, %238 : vector<10x1xf32>
    %240 = math.rsqrt %239 : vector<10x1xf32>
    %241 = vector.broadcast %240 : vector<10x1xf32> to vector<10x64xf32>
    %242 = arith.mulf %232, %241 : vector<10x64xf32>
    %243 = vector.broadcast %225 : vector<1x64xf32> to vector<10x64xf32>
    %244 = arith.mulf %242, %243 : vector<10x64xf32>
    %245 = vector.broadcast %226 : vector<1x64xf32> to vector<10x64xf32>
    %246 = arith.addf %244, %245 : vector<10x64xf32>
    %c0_81 = arith.constant 0 : index
    %c0_82 = arith.constant 0 : index
    %c0_83 = arith.constant 0 : index
    %247 = vector.load %arg11[%c0_81, %c0_82, %c0_83] : memref<2x64x256xf32, #tpu.memory_space<vmem>>, vector<1x64x256xf32>
    %248 = vector.shape_cast %247 : vector<1x64x256xf32> to vector<64x256xf32>
    %cst_84 = arith.constant dense<0.000000e+00> : vector<10x256xf32>
    %249 = tpu.matmul %246, %248, %cst_84 {dimension_numbers = #tpu.dot_dimension_numbers<[1], [0], [0], [1], [0, 0, 1, 1], [], []>} : vector<10x64xf32>, vector<64x256xf32>, vector<10x256xf32> -> vector<10x256xf32>
    %c0_85 = arith.constant 0 : index
    %c0_86 = arith.constant 0 : index
    %c0_87 = arith.constant 0 : index
    %250 = vector.load %arg12[%c0_85, %c0_86, %c0_87] : memref<2x1x256xf32, #tpu.memory_space<vmem>>, vector<1x1x256xf32>
    %251 = vector.shape_cast %250 : vector<1x1x256xf32> to vector<1x256xf32>
    %252 = vector.broadcast %251 : vector<1x256xf32> to vector<10x256xf32>
    %253 = arith.addf %249, %252 : vector<10x256xf32>
    %cst_88 = arith.constant 1.702000e+00 : f32
    %254 = vector.broadcast %cst_88 : f32 to vector<10x256xf32>
    %255 = arith.mulf %254, %253 : vector<10x256xf32>
    %256 = arith.negf %255 : vector<10x256xf32>
    %257 = math.exp %256 : vector<10x256xf32>
    %cst_89 = arith.constant 1.000000e+00 : f32
    %258 = vector.broadcast %cst_89 : f32 to vector<10x256xf32>
    %259 = arith.addf %258, %257 : vector<10x256xf32>
    %260 = arith.divf %258, %259 : vector<10x256xf32>
    %261 = arith.mulf %253, %260 : vector<10x256xf32>
    %c0_90 = arith.constant 0 : index
    %c0_91 = arith.constant 0 : index
    %c0_92 = arith.constant 0 : index
    %262 = vector.load %arg13[%c0_90, %c0_91, %c0_92] : memref<2x256x64xf32, #tpu.memory_space<vmem>>, vector<1x256x64xf32>
    %263 = vector.shape_cast %262 : vector<1x256x64xf32> to vector<256x64xf32>
    %cst_93 = arith.constant dense<0.000000e+00> : vector<10x64xf32>
    %264 = tpu.matmul %261, %263, %cst_93 {dimension_numbers = #tpu.dot_dimension_numbers<[1], [0], [0], [1], [0, 0, 1, 1], [], []>} : vector<10x256xf32>, vector<256x64xf32>, vector<10x64xf32> -> vector<10x64xf32>
    %c0_94 = arith.constant 0 : index
    %c0_95 = arith.constant 0 : index
    %c0_96 = arith.constant 0 : index
    %265 = vector.load %arg14[%c0_94, %c0_95, %c0_96] : memref<2x1x64xf32, #tpu.memory_space<vmem>>, vector<1x1x64xf32>
    %266 = vector.shape_cast %265 : vector<1x1x64xf32> to vector<1x64xf32>
    %267 = vector.broadcast %266 : vector<1x64xf32> to vector<10x64xf32>
    %268 = arith.addf %264, %267 : vector<10x64xf32>
    %269 = arith.addf %224, %268 : vector<10x64xf32>
    %c1 = arith.constant 1 : index
    %c0_97 = arith.constant 0 : index
    %c0_98 = arith.constant 0 : index
    %270 = vector.load %arg6[%c1, %c0_97, %c0_98] : memref<2x4x64xf32, #tpu.memory_space<vmem>>, vector<1x4x64xf32>
    %271 = vector.shape_cast %270 : vector<1x4x64xf32> to vector<4x64xf32>
    %272 = vector.extract_strided_slice %271 {offsets = [0, 0], sizes = [1, 64], strides = [1, 1]} : vector<4x64xf32> to vector<1x64xf32>
    %273 = vector.extract_strided_slice %271 {offsets = [1, 0], sizes = [1, 64], strides = [1, 1]} : vector<4x64xf32> to vector<1x64xf32>
    %cst_99 = arith.constant dense<0.000000e+00> : vector<10xf32>
    %274 = vector.multi_reduction <add>, %269, %cst_99 [1] : vector<10x64xf32> to vector<10xf32>
    %275 = vector.shape_cast %274 : vector<10xf32> to vector<10x1xf32>
    %cst_100 = arith.constant 6.400000e+01 : f32
    %276 = vector.broadcast %cst_100 : f32 to vector<10x1xf32>
    %277 = arith.divf %275, %276 : vector<10x1xf32>
    %278 = vector.broadcast %277 : vector<10x1xf32> to vector<10x64xf32>
    %279 = arith.subf %269, %278 : vector<10x64xf32>
    %280 = arith.mulf %279, %279 : vector<10x64xf32>
    %cst_101 = arith.constant dense<0.000000e+00> : vector<10xf32>
    %281 = vector.multi_reduction <add>, %280, %cst_101 [1] : vector<10x64xf32> to vector<10xf32>
    %282 = vector.shape_cast %281 : vector<10xf32> to vector<10x1xf32>
    %cst_102 = arith.constant 6.400000e+01 : f32
    %283 = vector.broadcast %cst_102 : f32 to vector<10x1xf32>
    %284 = arith.divf %282, %283 : vector<10x1xf32>
    %cst_103 = arith.constant 9.99999974E-6 : f32
    %285 = vector.broadcast %cst_103 : f32 to vector<10x1xf32>
    %286 = arith.addf %284, %285 : vector<10x1xf32>
    %287 = math.rsqrt %286 : vector<10x1xf32>
    %288 = vector.broadcast %287 : vector<10x1xf32> to vector<10x64xf32>
    %289 = arith.mulf %279, %288 : vector<10x64xf32>
    %290 = vector.broadcast %272 : vector<1x64xf32> to vector<10x64xf32>
    %291 = arith.mulf %289, %290 : vector<10x64xf32>
    %292 = vector.broadcast %273 : vector<1x64xf32> to vector<10x64xf32>
    %293 = arith.addf %291, %292 : vector<10x64xf32>
    %c1_104 = arith.constant 1 : index
    %c0_105 = arith.constant 0 : index
    %c0_106 = arith.constant 0 : index
    %294 = vector.load %arg7[%c1_104, %c0_105, %c0_106] : memref<2x64x192xf32, #tpu.memory_space<vmem>>, vector<1x64x192xf32>
    %295 = vector.shape_cast %294 : vector<1x64x192xf32> to vector<64x192xf32>
    %cst_107 = arith.constant dense<0.000000e+00> : vector<10x192xf32>
    %296 = tpu.matmul %293, %295, %cst_107 {dimension_numbers = #tpu.dot_dimension_numbers<[1], [0], [0], [1], [0, 0, 1, 1], [], []>} : vector<10x64xf32>, vector<64x192xf32>, vector<10x192xf32> -> vector<10x192xf32>
    %c1_108 = arith.constant 1 : index
    %c0_109 = arith.constant 0 : index
    %c0_110 = arith.constant 0 : index
    %297 = vector.load %arg8[%c1_108, %c0_109, %c0_110] : memref<2x1x192xf32, #tpu.memory_space<vmem>>, vector<1x1x192xf32>
    %298 = vector.shape_cast %297 : vector<1x1x192xf32> to vector<1x192xf32>
    %299 = vector.broadcast %298 : vector<1x192xf32> to vector<10x192xf32>
    %300 = arith.addf %296, %299 : vector<10x192xf32>
    %301 = vector.extract_strided_slice %300 {offsets = [0, 0], sizes = [5, 16], strides = [1, 1]} : vector<10x192xf32> to vector<5x16xf32>
    %302 = vector.extract_strided_slice %300 {offsets = [0, 64], sizes = [5, 16], strides = [1, 1]} : vector<10x192xf32> to vector<5x16xf32>
    %303 = vector.extract_strided_slice %300 {offsets = [0, 128], sizes = [5, 16], strides = [1, 1]} : vector<10x192xf32> to vector<5x16xf32>
    %304 = tpu.transpose %302, [1, 0] : vector<5x16xf32> -> vector<16x5xf32>
    %cst_111 = arith.constant dense<0.000000e+00> : vector<5x5xf32>
    %305 = tpu.matmul %301, %304, %cst_111 {dimension_numbers = #tpu.dot_dimension_numbers<[1], [0], [0], [1], [0, 0, 1, 1], [], []>} : vector<5x16xf32>, vector<16x5xf32>, vector<5x5xf32> -> vector<5x5xf32>
    %cst_112 = arith.constant 2.500000e-01 : f32
    %306 = vector.broadcast %cst_112 : f32 to vector<5x5xf32>
    %307 = arith.mulf %305, %306 : vector<5x5xf32>
    %cst_113 = arith.constant dense<0xFF800000> : vector<5xf32>
    %308 = vector.multi_reduction <maximumf>, %307, %cst_113 [1] : vector<5x5xf32> to vector<5xf32>
    %309 = vector.shape_cast %308 : vector<5xf32> to vector<5x1xf32>
    %310 = vector.broadcast %309 : vector<5x1xf32> to vector<5x5xf32>
    %311 = arith.subf %307, %310 : vector<5x5xf32>
    %312 = math.exp %311 : vector<5x5xf32>
    %cst_114 = arith.constant dense<0.000000e+00> : vector<5xf32>
    %313 = vector.multi_reduction <add>, %312, %cst_114 [1] : vector<5x5xf32> to vector<5xf32>
    %314 = vector.shape_cast %313 : vector<5xf32> to vector<5x1xf32>
    %315 = tpu.reciprocal %314 {approx = true} : vector<5x1xf32> -> vector<5x1xf32>
    %316 = vector.broadcast %315 : vector<5x1xf32> to vector<5x5xf32>
    %317 = arith.mulf %312, %316 : vector<5x5xf32>
    %cst_115 = arith.constant dense<0.000000e+00> : vector<5x16xf32>
    %318 = tpu.matmul %317, %303, %cst_115 {dimension_numbers = #tpu.dot_dimension_numbers<[1], [0], [0], [1], [0, 0, 1, 1], [], []>} : vector<5x5xf32>, vector<5x16xf32>, vector<5x16xf32> -> vector<5x16xf32>
    %319 = vector.extract_strided_slice %300 {offsets = [0, 16], sizes = [5, 16], strides = [1, 1]} : vector<10x192xf32> to vector<5x16xf32>
    %320 = vector.extract_strided_slice %300 {offsets = [0, 80], sizes = [5, 16], strides = [1, 1]} : vector<10x192xf32> to vector<5x16xf32>
    %321 = vector.extract_strided_slice %300 {offsets = [0, 144], sizes = [5, 16], strides = [1, 1]} : vector<10x192xf32> to vector<5x16xf32>
    %322 = tpu.transpose %320, [1, 0] : vector<5x16xf32> -> vector<16x5xf32>
    %cst_116 = arith.constant dense<0.000000e+00> : vector<5x5xf32>
    %323 = tpu.matmul %319, %322, %cst_116 {dimension_numbers = #tpu.dot_dimension_numbers<[1], [0], [0], [1], [0, 0, 1, 1], [], []>} : vector<5x16xf32>, vector<16x5xf32>, vector<5x5xf32> -> vector<5x5xf32>
    %cst_117 = arith.constant 2.500000e-01 : f32
    %324 = vector.broadcast %cst_117 : f32 to vector<5x5xf32>
    %325 = arith.mulf %323, %324 : vector<5x5xf32>
    %cst_118 = arith.constant dense<0xFF800000> : vector<5xf32>
    %326 = vector.multi_reduction <maximumf>, %325, %cst_118 [1] : vector<5x5xf32> to vector<5xf32>
    %327 = vector.shape_cast %326 : vector<5xf32> to vector<5x1xf32>
    %328 = vector.broadcast %327 : vector<5x1xf32> to vector<5x5xf32>
    %329 = arith.subf %325, %328 : vector<5x5xf32>
    %330 = math.exp %329 : vector<5x5xf32>
    %cst_119 = arith.constant dense<0.000000e+00> : vector<5xf32>
    %331 = vector.multi_reduction <add>, %330, %cst_119 [1] : vector<5x5xf32> to vector<5xf32>
    %332 = vector.shape_cast %331 : vector<5xf32> to vector<5x1xf32>
    %333 = tpu.reciprocal %332 {approx = true} : vector<5x1xf32> -> vector<5x1xf32>
    %334 = vector.broadcast %333 : vector<5x1xf32> to vector<5x5xf32>
    %335 = arith.mulf %330, %334 : vector<5x5xf32>
    %cst_120 = arith.constant dense<0.000000e+00> : vector<5x16xf32>
    %336 = tpu.matmul %335, %321, %cst_120 {dimension_numbers = #tpu.dot_dimension_numbers<[1], [0], [0], [1], [0, 0, 1, 1], [], []>} : vector<5x5xf32>, vector<5x16xf32>, vector<5x16xf32> -> vector<5x16xf32>
    %337 = vector.extract_strided_slice %300 {offsets = [0, 32], sizes = [5, 16], strides = [1, 1]} : vector<10x192xf32> to vector<5x16xf32>
    %338 = vector.extract_strided_slice %300 {offsets = [0, 96], sizes = [5, 16], strides = [1, 1]} : vector<10x192xf32> to vector<5x16xf32>
    %339 = vector.extract_strided_slice %300 {offsets = [0, 160], sizes = [5, 16], strides = [1, 1]} : vector<10x192xf32> to vector<5x16xf32>
    %340 = tpu.transpose %338, [1, 0] : vector<5x16xf32> -> vector<16x5xf32>
    %cst_121 = arith.constant dense<0.000000e+00> : vector<5x5xf32>
    %341 = tpu.matmul %337, %340, %cst_121 {dimension_numbers = #tpu.dot_dimension_numbers<[1], [0], [0], [1], [0, 0, 1, 1], [], []>} : vector<5x16xf32>, vector<16x5xf32>, vector<5x5xf32> -> vector<5x5xf32>
    %cst_122 = arith.constant 2.500000e-01 : f32
    %342 = vector.broadcast %cst_122 : f32 to vector<5x5xf32>
    %343 = arith.mulf %341, %342 : vector<5x5xf32>
    %cst_123 = arith.constant dense<0xFF800000> : vector<5xf32>
    %344 = vector.multi_reduction <maximumf>, %343, %cst_123 [1] : vector<5x5xf32> to vector<5xf32>
    %345 = vector.shape_cast %344 : vector<5xf32> to vector<5x1xf32>
    %346 = vector.broadcast %345 : vector<5x1xf32> to vector<5x5xf32>
    %347 = arith.subf %343, %346 : vector<5x5xf32>
    %348 = math.exp %347 : vector<5x5xf32>
    %cst_124 = arith.constant dense<0.000000e+00> : vector<5xf32>
    %349 = vector.multi_reduction <add>, %348, %cst_124 [1] : vector<5x5xf32> to vector<5xf32>
    %350 = vector.shape_cast %349 : vector<5xf32> to vector<5x1xf32>
    %351 = tpu.reciprocal %350 {approx = true} : vector<5x1xf32> -> vector<5x1xf32>
    %352 = vector.broadcast %351 : vector<5x1xf32> to vector<5x5xf32>
    %353 = arith.mulf %348, %352 : vector<5x5xf32>
    %cst_125 = arith.constant dense<0.000000e+00> : vector<5x16xf32>
    %354 = tpu.matmul %353, %339, %cst_125 {dimension_numbers = #tpu.dot_dimension_numbers<[1], [0], [0], [1], [0, 0, 1, 1], [], []>} : vector<5x5xf32>, vector<5x16xf32>, vector<5x16xf32> -> vector<5x16xf32>
    %355 = vector.extract_strided_slice %300 {offsets = [0, 48], sizes = [5, 16], strides = [1, 1]} : vector<10x192xf32> to vector<5x16xf32>
    %356 = vector.extract_strided_slice %300 {offsets = [0, 112], sizes = [5, 16], strides = [1, 1]} : vector<10x192xf32> to vector<5x16xf32>
    %357 = vector.extract_strided_slice %300 {offsets = [0, 176], sizes = [5, 16], strides = [1, 1]} : vector<10x192xf32> to vector<5x16xf32>
    %358 = tpu.transpose %356, [1, 0] : vector<5x16xf32> -> vector<16x5xf32>
    %cst_126 = arith.constant dense<0.000000e+00> : vector<5x5xf32>
    %359 = tpu.matmul %355, %358, %cst_126 {dimension_numbers = #tpu.dot_dimension_numbers<[1], [0], [0], [1], [0, 0, 1, 1], [], []>} : vector<5x16xf32>, vector<16x5xf32>, vector<5x5xf32> -> vector<5x5xf32>
    %cst_127 = arith.constant 2.500000e-01 : f32
    %360 = vector.broadcast %cst_127 : f32 to vector<5x5xf32>
    %361 = arith.mulf %359, %360 : vector<5x5xf32>
    %cst_128 = arith.constant dense<0xFF800000> : vector<5xf32>
    %362 = vector.multi_reduction <maximumf>, %361, %cst_128 [1] : vector<5x5xf32> to vector<5xf32>
    %363 = vector.shape_cast %362 : vector<5xf32> to vector<5x1xf32>
    %364 = vector.broadcast %363 : vector<5x1xf32> to vector<5x5xf32>
    %365 = arith.subf %361, %364 : vector<5x5xf32>
    %366 = math.exp %365 : vector<5x5xf32>
    %cst_129 = arith.constant dense<0.000000e+00> : vector<5xf32>
    %367 = vector.multi_reduction <add>, %366, %cst_129 [1] : vector<5x5xf32> to vector<5xf32>
    %368 = vector.shape_cast %367 : vector<5xf32> to vector<5x1xf32>
    %369 = tpu.reciprocal %368 {approx = true} : vector<5x1xf32> -> vector<5x1xf32>
    %370 = vector.broadcast %369 : vector<5x1xf32> to vector<5x5xf32>
    %371 = arith.mulf %366, %370 : vector<5x5xf32>
    %cst_130 = arith.constant dense<0.000000e+00> : vector<5x16xf32>
    %372 = tpu.matmul %371, %357, %cst_130 {dimension_numbers = #tpu.dot_dimension_numbers<[1], [0], [0], [1], [0, 0, 1, 1], [], []>} : vector<5x5xf32>, vector<5x16xf32>, vector<5x16xf32> -> vector<5x16xf32>
    %373 = tpu.concatenate %318, %336, %354, %372 in 1 : vector<5x16xf32>, vector<5x16xf32>, vector<5x16xf32>, vector<5x16xf32> -> vector<5x64xf32>
    %374 = vector.extract_strided_slice %300 {offsets = [5, 0], sizes = [5, 16], strides = [1, 1]} : vector<10x192xf32> to vector<5x16xf32>
    %375 = vector.extract_strided_slice %300 {offsets = [5, 64], sizes = [5, 16], strides = [1, 1]} : vector<10x192xf32> to vector<5x16xf32>
    %376 = vector.extract_strided_slice %300 {offsets = [5, 128], sizes = [5, 16], strides = [1, 1]} : vector<10x192xf32> to vector<5x16xf32>
    %377 = tpu.transpose %375, [1, 0] : vector<5x16xf32> -> vector<16x5xf32>
    %cst_131 = arith.constant dense<0.000000e+00> : vector<5x5xf32>
    %378 = tpu.matmul %374, %377, %cst_131 {dimension_numbers = #tpu.dot_dimension_numbers<[1], [0], [0], [1], [0, 0, 1, 1], [], []>} : vector<5x16xf32>, vector<16x5xf32>, vector<5x5xf32> -> vector<5x5xf32>
    %cst_132 = arith.constant 2.500000e-01 : f32
    %379 = vector.broadcast %cst_132 : f32 to vector<5x5xf32>
    %380 = arith.mulf %378, %379 : vector<5x5xf32>
    %cst_133 = arith.constant dense<0xFF800000> : vector<5xf32>
    %381 = vector.multi_reduction <maximumf>, %380, %cst_133 [1] : vector<5x5xf32> to vector<5xf32>
    %382 = vector.shape_cast %381 : vector<5xf32> to vector<5x1xf32>
    %383 = vector.broadcast %382 : vector<5x1xf32> to vector<5x5xf32>
    %384 = arith.subf %380, %383 : vector<5x5xf32>
    %385 = math.exp %384 : vector<5x5xf32>
    %cst_134 = arith.constant dense<0.000000e+00> : vector<5xf32>
    %386 = vector.multi_reduction <add>, %385, %cst_134 [1] : vector<5x5xf32> to vector<5xf32>
    %387 = vector.shape_cast %386 : vector<5xf32> to vector<5x1xf32>
    %388 = tpu.reciprocal %387 {approx = true} : vector<5x1xf32> -> vector<5x1xf32>
    %389 = vector.broadcast %388 : vector<5x1xf32> to vector<5x5xf32>
    %390 = arith.mulf %385, %389 : vector<5x5xf32>
    %cst_135 = arith.constant dense<0.000000e+00> : vector<5x16xf32>
    %391 = tpu.matmul %390, %376, %cst_135 {dimension_numbers = #tpu.dot_dimension_numbers<[1], [0], [0], [1], [0, 0, 1, 1], [], []>} : vector<5x5xf32>, vector<5x16xf32>, vector<5x16xf32> -> vector<5x16xf32>
    %392 = vector.extract_strided_slice %300 {offsets = [5, 16], sizes = [5, 16], strides = [1, 1]} : vector<10x192xf32> to vector<5x16xf32>
    %393 = vector.extract_strided_slice %300 {offsets = [5, 80], sizes = [5, 16], strides = [1, 1]} : vector<10x192xf32> to vector<5x16xf32>
    %394 = vector.extract_strided_slice %300 {offsets = [5, 144], sizes = [5, 16], strides = [1, 1]} : vector<10x192xf32> to vector<5x16xf32>
    %395 = tpu.transpose %393, [1, 0] : vector<5x16xf32> -> vector<16x5xf32>
    %cst_136 = arith.constant dense<0.000000e+00> : vector<5x5xf32>
    %396 = tpu.matmul %392, %395, %cst_136 {dimension_numbers = #tpu.dot_dimension_numbers<[1], [0], [0], [1], [0, 0, 1, 1], [], []>} : vector<5x16xf32>, vector<16x5xf32>, vector<5x5xf32> -> vector<5x5xf32>
    %cst_137 = arith.constant 2.500000e-01 : f32
    %397 = vector.broadcast %cst_137 : f32 to vector<5x5xf32>
    %398 = arith.mulf %396, %397 : vector<5x5xf32>
    %cst_138 = arith.constant dense<0xFF800000> : vector<5xf32>
    %399 = vector.multi_reduction <maximumf>, %398, %cst_138 [1] : vector<5x5xf32> to vector<5xf32>
    %400 = vector.shape_cast %399 : vector<5xf32> to vector<5x1xf32>
    %401 = vector.broadcast %400 : vector<5x1xf32> to vector<5x5xf32>
    %402 = arith.subf %398, %401 : vector<5x5xf32>
    %403 = math.exp %402 : vector<5x5xf32>
    %cst_139 = arith.constant dense<0.000000e+00> : vector<5xf32>
    %404 = vector.multi_reduction <add>, %403, %cst_139 [1] : vector<5x5xf32> to vector<5xf32>
    %405 = vector.shape_cast %404 : vector<5xf32> to vector<5x1xf32>
    %406 = tpu.reciprocal %405 {approx = true} : vector<5x1xf32> -> vector<5x1xf32>
    %407 = vector.broadcast %406 : vector<5x1xf32> to vector<5x5xf32>
    %408 = arith.mulf %403, %407 : vector<5x5xf32>
    %cst_140 = arith.constant dense<0.000000e+00> : vector<5x16xf32>
    %409 = tpu.matmul %408, %394, %cst_140 {dimension_numbers = #tpu.dot_dimension_numbers<[1], [0], [0], [1], [0, 0, 1, 1], [], []>} : vector<5x5xf32>, vector<5x16xf32>, vector<5x16xf32> -> vector<5x16xf32>
    %410 = vector.extract_strided_slice %300 {offsets = [5, 32], sizes = [5, 16], strides = [1, 1]} : vector<10x192xf32> to vector<5x16xf32>
    %411 = vector.extract_strided_slice %300 {offsets = [5, 96], sizes = [5, 16], strides = [1, 1]} : vector<10x192xf32> to vector<5x16xf32>
    %412 = vector.extract_strided_slice %300 {offsets = [5, 160], sizes = [5, 16], strides = [1, 1]} : vector<10x192xf32> to vector<5x16xf32>
    %413 = tpu.transpose %411, [1, 0] : vector<5x16xf32> -> vector<16x5xf32>
    %cst_141 = arith.constant dense<0.000000e+00> : vector<5x5xf32>
    %414 = tpu.matmul %410, %413, %cst_141 {dimension_numbers = #tpu.dot_dimension_numbers<[1], [0], [0], [1], [0, 0, 1, 1], [], []>} : vector<5x16xf32>, vector<16x5xf32>, vector<5x5xf32> -> vector<5x5xf32>
    %cst_142 = arith.constant 2.500000e-01 : f32
    %415 = vector.broadcast %cst_142 : f32 to vector<5x5xf32>
    %416 = arith.mulf %414, %415 : vector<5x5xf32>
    %cst_143 = arith.constant dense<0xFF800000> : vector<5xf32>
    %417 = vector.multi_reduction <maximumf>, %416, %cst_143 [1] : vector<5x5xf32> to vector<5xf32>
    %418 = vector.shape_cast %417 : vector<5xf32> to vector<5x1xf32>
    %419 = vector.broadcast %418 : vector<5x1xf32> to vector<5x5xf32>
    %420 = arith.subf %416, %419 : vector<5x5xf32>
    %421 = math.exp %420 : vector<5x5xf32>
    %cst_144 = arith.constant dense<0.000000e+00> : vector<5xf32>
    %422 = vector.multi_reduction <add>, %421, %cst_144 [1] : vector<5x5xf32> to vector<5xf32>
    %423 = vector.shape_cast %422 : vector<5xf32> to vector<5x1xf32>
    %424 = tpu.reciprocal %423 {approx = true} : vector<5x1xf32> -> vector<5x1xf32>
    %425 = vector.broadcast %424 : vector<5x1xf32> to vector<5x5xf32>
    %426 = arith.mulf %421, %425 : vector<5x5xf32>
    %cst_145 = arith.constant dense<0.000000e+00> : vector<5x16xf32>
    %427 = tpu.matmul %426, %412, %cst_145 {dimension_numbers = #tpu.dot_dimension_numbers<[1], [0], [0], [1], [0, 0, 1, 1], [], []>} : vector<5x5xf32>, vector<5x16xf32>, vector<5x16xf32> -> vector<5x16xf32>
    %428 = vector.extract_strided_slice %300 {offsets = [5, 48], sizes = [5, 16], strides = [1, 1]} : vector<10x192xf32> to vector<5x16xf32>
    %429 = vector.extract_strided_slice %300 {offsets = [5, 112], sizes = [5, 16], strides = [1, 1]} : vector<10x192xf32> to vector<5x16xf32>
    %430 = vector.extract_strided_slice %300 {offsets = [5, 176], sizes = [5, 16], strides = [1, 1]} : vector<10x192xf32> to vector<5x16xf32>
    %431 = tpu.transpose %429, [1, 0] : vector<5x16xf32> -> vector<16x5xf32>
    %cst_146 = arith.constant dense<0.000000e+00> : vector<5x5xf32>
    %432 = tpu.matmul %428, %431, %cst_146 {dimension_numbers = #tpu.dot_dimension_numbers<[1], [0], [0], [1], [0, 0, 1, 1], [], []>} : vector<5x16xf32>, vector<16x5xf32>, vector<5x5xf32> -> vector<5x5xf32>
    %cst_147 = arith.constant 2.500000e-01 : f32
    %433 = vector.broadcast %cst_147 : f32 to vector<5x5xf32>
    %434 = arith.mulf %432, %433 : vector<5x5xf32>
    %cst_148 = arith.constant dense<0xFF800000> : vector<5xf32>
    %435 = vector.multi_reduction <maximumf>, %434, %cst_148 [1] : vector<5x5xf32> to vector<5xf32>
    %436 = vector.shape_cast %435 : vector<5xf32> to vector<5x1xf32>
    %437 = vector.broadcast %436 : vector<5x1xf32> to vector<5x5xf32>
    %438 = arith.subf %434, %437 : vector<5x5xf32>
    %439 = math.exp %438 : vector<5x5xf32>
    %cst_149 = arith.constant dense<0.000000e+00> : vector<5xf32>
    %440 = vector.multi_reduction <add>, %439, %cst_149 [1] : vector<5x5xf32> to vector<5xf32>
    %441 = vector.shape_cast %440 : vector<5xf32> to vector<5x1xf32>
    %442 = tpu.reciprocal %441 {approx = true} : vector<5x1xf32> -> vector<5x1xf32>
    %443 = vector.broadcast %442 : vector<5x1xf32> to vector<5x5xf32>
    %444 = arith.mulf %439, %443 : vector<5x5xf32>
    %cst_150 = arith.constant dense<0.000000e+00> : vector<5x16xf32>
    %445 = tpu.matmul %444, %430, %cst_150 {dimension_numbers = #tpu.dot_dimension_numbers<[1], [0], [0], [1], [0, 0, 1, 1], [], []>} : vector<5x5xf32>, vector<5x16xf32>, vector<5x16xf32> -> vector<5x16xf32>
    %446 = tpu.concatenate %391, %409, %427, %445 in 1 : vector<5x16xf32>, vector<5x16xf32>, vector<5x16xf32>, vector<5x16xf32> -> vector<5x64xf32>
    %447 = tpu.concatenate %373, %446 in 0 : vector<5x64xf32>, vector<5x64xf32> -> vector<10x64xf32>
    %c1_151 = arith.constant 1 : index
    %c0_152 = arith.constant 0 : index
    %c0_153 = arith.constant 0 : index
    %448 = vector.load %arg9[%c1_151, %c0_152, %c0_153] : memref<2x64x64xf32, #tpu.memory_space<vmem>>, vector<1x64x64xf32>
    %449 = vector.shape_cast %448 : vector<1x64x64xf32> to vector<64x64xf32>
    %cst_154 = arith.constant dense<0.000000e+00> : vector<10x64xf32>
    %450 = tpu.matmul %447, %449, %cst_154 {dimension_numbers = #tpu.dot_dimension_numbers<[1], [0], [0], [1], [0, 0, 1, 1], [], []>} : vector<10x64xf32>, vector<64x64xf32>, vector<10x64xf32> -> vector<10x64xf32>
    %c1_155 = arith.constant 1 : index
    %c0_156 = arith.constant 0 : index
    %c0_157 = arith.constant 0 : index
    %451 = vector.load %arg10[%c1_155, %c0_156, %c0_157] : memref<2x1x64xf32, #tpu.memory_space<vmem>>, vector<1x1x64xf32>
    %452 = vector.shape_cast %451 : vector<1x1x64xf32> to vector<1x64xf32>
    %453 = vector.broadcast %452 : vector<1x64xf32> to vector<10x64xf32>
    %454 = arith.addf %450, %453 : vector<10x64xf32>
    %455 = arith.addf %269, %454 : vector<10x64xf32>
    %456 = vector.extract_strided_slice %271 {offsets = [2, 0], sizes = [1, 64], strides = [1, 1]} : vector<4x64xf32> to vector<1x64xf32>
    %457 = vector.extract_strided_slice %271 {offsets = [3, 0], sizes = [1, 64], strides = [1, 1]} : vector<4x64xf32> to vector<1x64xf32>
    %cst_158 = arith.constant dense<0.000000e+00> : vector<10xf32>
    %458 = vector.multi_reduction <add>, %455, %cst_158 [1] : vector<10x64xf32> to vector<10xf32>
    %459 = vector.shape_cast %458 : vector<10xf32> to vector<10x1xf32>
    %cst_159 = arith.constant 6.400000e+01 : f32
    %460 = vector.broadcast %cst_159 : f32 to vector<10x1xf32>
    %461 = arith.divf %459, %460 : vector<10x1xf32>
    %462 = vector.broadcast %461 : vector<10x1xf32> to vector<10x64xf32>
    %463 = arith.subf %455, %462 : vector<10x64xf32>
    %464 = arith.mulf %463, %463 : vector<10x64xf32>
    %cst_160 = arith.constant dense<0.000000e+00> : vector<10xf32>
    %465 = vector.multi_reduction <add>, %464, %cst_160 [1] : vector<10x64xf32> to vector<10xf32>
    %466 = vector.shape_cast %465 : vector<10xf32> to vector<10x1xf32>
    %cst_161 = arith.constant 6.400000e+01 : f32
    %467 = vector.broadcast %cst_161 : f32 to vector<10x1xf32>
    %468 = arith.divf %466, %467 : vector<10x1xf32>
    %cst_162 = arith.constant 9.99999974E-6 : f32
    %469 = vector.broadcast %cst_162 : f32 to vector<10x1xf32>
    %470 = arith.addf %468, %469 : vector<10x1xf32>
    %471 = math.rsqrt %470 : vector<10x1xf32>
    %472 = vector.broadcast %471 : vector<10x1xf32> to vector<10x64xf32>
    %473 = arith.mulf %463, %472 : vector<10x64xf32>
    %474 = vector.broadcast %456 : vector<1x64xf32> to vector<10x64xf32>
    %475 = arith.mulf %473, %474 : vector<10x64xf32>
    %476 = vector.broadcast %457 : vector<1x64xf32> to vector<10x64xf32>
    %477 = arith.addf %475, %476 : vector<10x64xf32>
    %c1_163 = arith.constant 1 : index
    %c0_164 = arith.constant 0 : index
    %c0_165 = arith.constant 0 : index
    %478 = vector.load %arg11[%c1_163, %c0_164, %c0_165] : memref<2x64x256xf32, #tpu.memory_space<vmem>>, vector<1x64x256xf32>
    %479 = vector.shape_cast %478 : vector<1x64x256xf32> to vector<64x256xf32>
    %cst_166 = arith.constant dense<0.000000e+00> : vector<10x256xf32>
    %480 = tpu.matmul %477, %479, %cst_166 {dimension_numbers = #tpu.dot_dimension_numbers<[1], [0], [0], [1], [0, 0, 1, 1], [], []>} : vector<10x64xf32>, vector<64x256xf32>, vector<10x256xf32> -> vector<10x256xf32>
    %c1_167 = arith.constant 1 : index
    %c0_168 = arith.constant 0 : index
    %c0_169 = arith.constant 0 : index
    %481 = vector.load %arg12[%c1_167, %c0_168, %c0_169] : memref<2x1x256xf32, #tpu.memory_space<vmem>>, vector<1x1x256xf32>
    %482 = vector.shape_cast %481 : vector<1x1x256xf32> to vector<1x256xf32>
    %483 = vector.broadcast %482 : vector<1x256xf32> to vector<10x256xf32>
    %484 = arith.addf %480, %483 : vector<10x256xf32>
    %cst_170 = arith.constant 1.702000e+00 : f32
    %485 = vector.broadcast %cst_170 : f32 to vector<10x256xf32>
    %486 = arith.mulf %485, %484 : vector<10x256xf32>
    %487 = arith.negf %486 : vector<10x256xf32>
    %488 = math.exp %487 : vector<10x256xf32>
    %cst_171 = arith.constant 1.000000e+00 : f32
    %489 = vector.broadcast %cst_171 : f32 to vector<10x256xf32>
    %490 = arith.addf %489, %488 : vector<10x256xf32>
    %491 = arith.divf %489, %490 : vector<10x256xf32>
    %492 = arith.mulf %484, %491 : vector<10x256xf32>
    %c1_172 = arith.constant 1 : index
    %c0_173 = arith.constant 0 : index
    %c0_174 = arith.constant 0 : index
    %493 = vector.load %arg13[%c1_172, %c0_173, %c0_174] : memref<2x256x64xf32, #tpu.memory_space<vmem>>, vector<1x256x64xf32>
    %494 = vector.shape_cast %493 : vector<1x256x64xf32> to vector<256x64xf32>
    %cst_175 = arith.constant dense<0.000000e+00> : vector<10x64xf32>
    %495 = tpu.matmul %492, %494, %cst_175 {dimension_numbers = #tpu.dot_dimension_numbers<[1], [0], [0], [1], [0, 0, 1, 1], [], []>} : vector<10x256xf32>, vector<256x64xf32>, vector<10x64xf32> -> vector<10x64xf32>
    %c1_176 = arith.constant 1 : index
    %c0_177 = arith.constant 0 : index
    %c0_178 = arith.constant 0 : index
    %496 = vector.load %arg14[%c1_176, %c0_177, %c0_178] : memref<2x1x64xf32, #tpu.memory_space<vmem>>, vector<1x1x64xf32>
    %497 = vector.shape_cast %496 : vector<1x1x64xf32> to vector<1x64xf32>
    %498 = vector.broadcast %497 : vector<1x64xf32> to vector<10x64xf32>
    %499 = arith.addf %495, %498 : vector<10x64xf32>
    %500 = arith.addf %455, %499 : vector<10x64xf32>
    %501 = vector.extract_strided_slice %500 {offsets = [0, 0], sizes = [1, 64], strides = [1, 1]} : vector<10x64xf32> to vector<1x64xf32>
    %502 = vector.extract_strided_slice %500 {offsets = [5, 0], sizes = [1, 64], strides = [1, 1]} : vector<10x64xf32> to vector<1x64xf32>
    %503 = tpu.concatenate %501, %502 in 0 : vector<1x64xf32>, vector<1x64xf32> -> vector<2x64xf32>
    %c0_179 = arith.constant 0 : index
    %c0_180 = arith.constant 0 : index
    %504 = vector.load %arg15[%c0_179, %c0_180] : memref<2x64xf32, #tpu.memory_space<vmem>>, vector<2x64xf32>
    %505 = vector.extract_strided_slice %504 {offsets = [0, 0], sizes = [1, 64], strides = [1, 1]} : vector<2x64xf32> to vector<1x64xf32>
    %506 = vector.extract_strided_slice %504 {offsets = [1, 0], sizes = [1, 64], strides = [1, 1]} : vector<2x64xf32> to vector<1x64xf32>
    %cst_181 = arith.constant dense<0.000000e+00> : vector<2xf32>
    %507 = vector.multi_reduction <add>, %503, %cst_181 [1] : vector<2x64xf32> to vector<2xf32>
    %508 = vector.shape_cast %507 : vector<2xf32> to vector<2x1xf32>
    %cst_182 = arith.constant 6.400000e+01 : f32
    %509 = vector.broadcast %cst_182 : f32 to vector<2x1xf32>
    %510 = arith.divf %508, %509 : vector<2x1xf32>
    %511 = vector.broadcast %510 : vector<2x1xf32> to vector<2x64xf32>
    %512 = arith.subf %503, %511 : vector<2x64xf32>
    %513 = arith.mulf %512, %512 : vector<2x64xf32>
    %cst_183 = arith.constant dense<0.000000e+00> : vector<2xf32>
    %514 = vector.multi_reduction <add>, %513, %cst_183 [1] : vector<2x64xf32> to vector<2xf32>
    %515 = vector.shape_cast %514 : vector<2xf32> to vector<2x1xf32>
    %cst_184 = arith.constant 6.400000e+01 : f32
    %516 = vector.broadcast %cst_184 : f32 to vector<2x1xf32>
    %517 = arith.divf %515, %516 : vector<2x1xf32>
    %cst_185 = arith.constant 9.99999974E-6 : f32
    %518 = vector.broadcast %cst_185 : f32 to vector<2x1xf32>
    %519 = arith.addf %517, %518 : vector<2x1xf32>
    %520 = math.rsqrt %519 : vector<2x1xf32>
    %521 = vector.broadcast %520 : vector<2x1xf32> to vector<2x64xf32>
    %522 = arith.mulf %512, %521 : vector<2x64xf32>
    %523 = vector.broadcast %505 : vector<1x64xf32> to vector<2x64xf32>
    %524 = arith.mulf %522, %523 : vector<2x64xf32>
    %525 = vector.broadcast %506 : vector<1x64xf32> to vector<2x64xf32>
    %526 = arith.addf %524, %525 : vector<2x64xf32>
    %c0_186 = arith.constant 0 : index
    %c0_187 = arith.constant 0 : index
    %527 = vector.load %arg16[%c0_186, %c0_187] : memref<64x32xf32, #tpu.memory_space<vmem>>, vector<64x32xf32>
    %cst_188 = arith.constant dense<0.000000e+00> : vector<2x32xf32>
    %528 = tpu.matmul %526, %527, %cst_188 {dimension_numbers = #tpu.dot_dimension_numbers<[1], [0], [0], [1], [0, 0, 1, 1], [], []>} : vector<2x64xf32>, vector<64x32xf32>, vector<2x32xf32> -> vector<2x32xf32>
    %c0_189 = arith.constant 0 : index
    %c0_190 = arith.constant 0 : index
    %529 = vector.load %arg17[%c0_189, %c0_190] : memref<8x64xf32, #tpu.memory_space<vmem>>, vector<8x64xf32>
    %c0_191 = arith.constant 0 : index
    %c0_192 = arith.constant 0 : index
    %530 = vector.load %arg18[%c0_191, %c0_192] : memref<8x64xf32, #tpu.memory_space<vmem>>, vector<8x64xf32>
    %531 = arith.addf %529, %530 : vector<8x64xf32>
    %c0_193 = arith.constant 0 : index
    %c0_194 = arith.constant 0 : index
    %c0_195 = arith.constant 0 : index
    %532 = vector.load %arg19[%c0_193, %c0_194, %c0_195] : memref<2x4x64xf32, #tpu.memory_space<vmem>>, vector<1x4x64xf32>
    %533 = vector.shape_cast %532 : vector<1x4x64xf32> to vector<4x64xf32>
    %534 = vector.extract_strided_slice %533 {offsets = [0, 0], sizes = [1, 64], strides = [1, 1]} : vector<4x64xf32> to vector<1x64xf32>
    %535 = vector.extract_strided_slice %533 {offsets = [1, 0], sizes = [1, 64], strides = [1, 1]} : vector<4x64xf32> to vector<1x64xf32>
    %cst_196 = arith.constant dense<0.000000e+00> : vector<8xf32>
    %536 = vector.multi_reduction <add>, %531, %cst_196 [1] : vector<8x64xf32> to vector<8xf32>
    %537 = vector.shape_cast %536 : vector<8xf32> to vector<8x1xf32>
    %cst_197 = arith.constant 6.400000e+01 : f32
    %538 = vector.broadcast %cst_197 : f32 to vector<8x1xf32>
    %539 = arith.divf %537, %538 : vector<8x1xf32>
    %540 = vector.broadcast %539 : vector<8x1xf32> to vector<8x64xf32>
    %541 = arith.subf %531, %540 : vector<8x64xf32>
    %542 = arith.mulf %541, %541 : vector<8x64xf32>
    %cst_198 = arith.constant dense<0.000000e+00> : vector<8xf32>
    %543 = vector.multi_reduction <add>, %542, %cst_198 [1] : vector<8x64xf32> to vector<8xf32>
    %544 = vector.shape_cast %543 : vector<8xf32> to vector<8x1xf32>
    %cst_199 = arith.constant 6.400000e+01 : f32
    %545 = vector.broadcast %cst_199 : f32 to vector<8x1xf32>
    %546 = arith.divf %544, %545 : vector<8x1xf32>
    %cst_200 = arith.constant 9.99999974E-6 : f32
    %547 = vector.broadcast %cst_200 : f32 to vector<8x1xf32>
    %548 = arith.addf %546, %547 : vector<8x1xf32>
    %549 = math.rsqrt %548 : vector<8x1xf32>
    %550 = vector.broadcast %549 : vector<8x1xf32> to vector<8x64xf32>
    %551 = arith.mulf %541, %550 : vector<8x64xf32>
    %552 = vector.broadcast %534 : vector<1x64xf32> to vector<8x64xf32>
    %553 = arith.mulf %551, %552 : vector<8x64xf32>
    %554 = vector.broadcast %535 : vector<1x64xf32> to vector<8x64xf32>
    %555 = arith.addf %553, %554 : vector<8x64xf32>
    %c0_201 = arith.constant 0 : index
    %c0_202 = arith.constant 0 : index
    %c0_203 = arith.constant 0 : index
    %556 = vector.load %arg20[%c0_201, %c0_202, %c0_203] : memref<2x64x192xf32, #tpu.memory_space<vmem>>, vector<1x64x192xf32>
    %557 = vector.shape_cast %556 : vector<1x64x192xf32> to vector<64x192xf32>
    %cst_204 = arith.constant dense<0.000000e+00> : vector<8x192xf32>
    %558 = tpu.matmul %555, %557, %cst_204 {dimension_numbers = #tpu.dot_dimension_numbers<[1], [0], [0], [1], [0, 0, 1, 1], [], []>} : vector<8x64xf32>, vector<64x192xf32>, vector<8x192xf32> -> vector<8x192xf32>
    %c0_205 = arith.constant 0 : index
    %c0_206 = arith.constant 0 : index
    %c0_207 = arith.constant 0 : index
    %559 = vector.load %arg21[%c0_205, %c0_206, %c0_207] : memref<2x1x192xf32, #tpu.memory_space<vmem>>, vector<1x1x192xf32>
    %560 = vector.shape_cast %559 : vector<1x1x192xf32> to vector<1x192xf32>
    %561 = vector.broadcast %560 : vector<1x192xf32> to vector<8x192xf32>
    %562 = arith.addf %558, %561 : vector<8x192xf32>
    %563 = vector.extract_strided_slice %562 {offsets = [0, 0], sizes = [8, 16], strides = [1, 1]} : vector<8x192xf32> to vector<8x16xf32>
    %564 = vector.extract_strided_slice %562 {offsets = [0, 64], sizes = [8, 16], strides = [1, 1]} : vector<8x192xf32> to vector<8x16xf32>
    %565 = vector.extract_strided_slice %562 {offsets = [0, 128], sizes = [8, 16], strides = [1, 1]} : vector<8x192xf32> to vector<8x16xf32>
    %566 = tpu.transpose %564, [1, 0] : vector<8x16xf32> -> vector<16x8xf32>
    %cst_208 = arith.constant dense<0.000000e+00> : vector<8x8xf32>
    %567 = tpu.matmul %563, %566, %cst_208 {dimension_numbers = #tpu.dot_dimension_numbers<[1], [0], [0], [1], [0, 0, 1, 1], [], []>} : vector<8x16xf32>, vector<16x8xf32>, vector<8x8xf32> -> vector<8x8xf32>
    %cst_209 = arith.constant 2.500000e-01 : f32
    %568 = vector.broadcast %cst_209 : f32 to vector<8x8xf32>
    %569 = arith.mulf %567, %568 : vector<8x8xf32>
    %570 = tpu.iota {dimensions = array<i32: 0>} : vector<8x8xi32>
    %571 = tpu.iota {dimensions = array<i32: 1>} : vector<8x8xi32>
    %572 = arith.cmpi sge, %570, %571 : vector<8x8xi32>
    %cst_210 = arith.constant -1.000000e+30 : f32
    %573 = vector.broadcast %cst_210 : f32 to vector<8x8xf32>
    %574 = arith.select %572, %569, %573 : vector<8x8xi1>, vector<8x8xf32>
    %cst_211 = arith.constant dense<0xFF800000> : vector<8xf32>
    %575 = vector.multi_reduction <maximumf>, %574, %cst_211 [1] : vector<8x8xf32> to vector<8xf32>
    %576 = vector.shape_cast %575 : vector<8xf32> to vector<8x1xf32>
    %577 = vector.broadcast %576 : vector<8x1xf32> to vector<8x8xf32>
    %578 = arith.subf %574, %577 : vector<8x8xf32>
    %579 = math.exp %578 : vector<8x8xf32>
    %cst_212 = arith.constant dense<0.000000e+00> : vector<8xf32>
    %580 = vector.multi_reduction <add>, %579, %cst_212 [1] : vector<8x8xf32> to vector<8xf32>
    %581 = vector.shape_cast %580 : vector<8xf32> to vector<8x1xf32>
    %582 = tpu.reciprocal %581 {approx = true} : vector<8x1xf32> -> vector<8x1xf32>
    %583 = vector.broadcast %582 : vector<8x1xf32> to vector<8x8xf32>
    %584 = arith.mulf %579, %583 : vector<8x8xf32>
    %cst_213 = arith.constant dense<0.000000e+00> : vector<8x16xf32>
    %585 = tpu.matmul %584, %565, %cst_213 {dimension_numbers = #tpu.dot_dimension_numbers<[1], [0], [0], [1], [0, 0, 1, 1], [], []>} : vector<8x8xf32>, vector<8x16xf32>, vector<8x16xf32> -> vector<8x16xf32>
    %586 = vector.extract_strided_slice %562 {offsets = [0, 16], sizes = [8, 16], strides = [1, 1]} : vector<8x192xf32> to vector<8x16xf32>
    %587 = vector.extract_strided_slice %562 {offsets = [0, 80], sizes = [8, 16], strides = [1, 1]} : vector<8x192xf32> to vector<8x16xf32>
    %588 = vector.extract_strided_slice %562 {offsets = [0, 144], sizes = [8, 16], strides = [1, 1]} : vector<8x192xf32> to vector<8x16xf32>
    %589 = tpu.transpose %587, [1, 0] : vector<8x16xf32> -> vector<16x8xf32>
    %cst_214 = arith.constant dense<0.000000e+00> : vector<8x8xf32>
    %590 = tpu.matmul %586, %589, %cst_214 {dimension_numbers = #tpu.dot_dimension_numbers<[1], [0], [0], [1], [0, 0, 1, 1], [], []>} : vector<8x16xf32>, vector<16x8xf32>, vector<8x8xf32> -> vector<8x8xf32>
    %cst_215 = arith.constant 2.500000e-01 : f32
    %591 = vector.broadcast %cst_215 : f32 to vector<8x8xf32>
    %592 = arith.mulf %590, %591 : vector<8x8xf32>
    %593 = tpu.iota {dimensions = array<i32: 0>} : vector<8x8xi32>
    %594 = tpu.iota {dimensions = array<i32: 1>} : vector<8x8xi32>
    %595 = arith.cmpi sge, %593, %594 : vector<8x8xi32>
    %cst_216 = arith.constant -1.000000e+30 : f32
    %596 = vector.broadcast %cst_216 : f32 to vector<8x8xf32>
    %597 = arith.select %595, %592, %596 : vector<8x8xi1>, vector<8x8xf32>
    %cst_217 = arith.constant dense<0xFF800000> : vector<8xf32>
    %598 = vector.multi_reduction <maximumf>, %597, %cst_217 [1] : vector<8x8xf32> to vector<8xf32>
    %599 = vector.shape_cast %598 : vector<8xf32> to vector<8x1xf32>
    %600 = vector.broadcast %599 : vector<8x1xf32> to vector<8x8xf32>
    %601 = arith.subf %597, %600 : vector<8x8xf32>
    %602 = math.exp %601 : vector<8x8xf32>
    %cst_218 = arith.constant dense<0.000000e+00> : vector<8xf32>
    %603 = vector.multi_reduction <add>, %602, %cst_218 [1] : vector<8x8xf32> to vector<8xf32>
    %604 = vector.shape_cast %603 : vector<8xf32> to vector<8x1xf32>
    %605 = tpu.reciprocal %604 {approx = true} : vector<8x1xf32> -> vector<8x1xf32>
    %606 = vector.broadcast %605 : vector<8x1xf32> to vector<8x8xf32>
    %607 = arith.mulf %602, %606 : vector<8x8xf32>
    %cst_219 = arith.constant dense<0.000000e+00> : vector<8x16xf32>
    %608 = tpu.matmul %607, %588, %cst_219 {dimension_numbers = #tpu.dot_dimension_numbers<[1], [0], [0], [1], [0, 0, 1, 1], [], []>} : vector<8x8xf32>, vector<8x16xf32>, vector<8x16xf32> -> vector<8x16xf32>
    %609 = vector.extract_strided_slice %562 {offsets = [0, 32], sizes = [8, 16], strides = [1, 1]} : vector<8x192xf32> to vector<8x16xf32>
    %610 = vector.extract_strided_slice %562 {offsets = [0, 96], sizes = [8, 16], strides = [1, 1]} : vector<8x192xf32> to vector<8x16xf32>
    %611 = vector.extract_strided_slice %562 {offsets = [0, 160], sizes = [8, 16], strides = [1, 1]} : vector<8x192xf32> to vector<8x16xf32>
    %612 = tpu.transpose %610, [1, 0] : vector<8x16xf32> -> vector<16x8xf32>
    %cst_220 = arith.constant dense<0.000000e+00> : vector<8x8xf32>
    %613 = tpu.matmul %609, %612, %cst_220 {dimension_numbers = #tpu.dot_dimension_numbers<[1], [0], [0], [1], [0, 0, 1, 1], [], []>} : vector<8x16xf32>, vector<16x8xf32>, vector<8x8xf32> -> vector<8x8xf32>
    %cst_221 = arith.constant 2.500000e-01 : f32
    %614 = vector.broadcast %cst_221 : f32 to vector<8x8xf32>
    %615 = arith.mulf %613, %614 : vector<8x8xf32>
    %616 = tpu.iota {dimensions = array<i32: 0>} : vector<8x8xi32>
    %617 = tpu.iota {dimensions = array<i32: 1>} : vector<8x8xi32>
    %618 = arith.cmpi sge, %616, %617 : vector<8x8xi32>
    %cst_222 = arith.constant -1.000000e+30 : f32
    %619 = vector.broadcast %cst_222 : f32 to vector<8x8xf32>
    %620 = arith.select %618, %615, %619 : vector<8x8xi1>, vector<8x8xf32>
    %cst_223 = arith.constant dense<0xFF800000> : vector<8xf32>
    %621 = vector.multi_reduction <maximumf>, %620, %cst_223 [1] : vector<8x8xf32> to vector<8xf32>
    %622 = vector.shape_cast %621 : vector<8xf32> to vector<8x1xf32>
    %623 = vector.broadcast %622 : vector<8x1xf32> to vector<8x8xf32>
    %624 = arith.subf %620, %623 : vector<8x8xf32>
    %625 = math.exp %624 : vector<8x8xf32>
    %cst_224 = arith.constant dense<0.000000e+00> : vector<8xf32>
    %626 = vector.multi_reduction <add>, %625, %cst_224 [1] : vector<8x8xf32> to vector<8xf32>
    %627 = vector.shape_cast %626 : vector<8xf32> to vector<8x1xf32>
    %628 = tpu.reciprocal %627 {approx = true} : vector<8x1xf32> -> vector<8x1xf32>
    %629 = vector.broadcast %628 : vector<8x1xf32> to vector<8x8xf32>
    %630 = arith.mulf %625, %629 : vector<8x8xf32>
    %cst_225 = arith.constant dense<0.000000e+00> : vector<8x16xf32>
    %631 = tpu.matmul %630, %611, %cst_225 {dimension_numbers = #tpu.dot_dimension_numbers<[1], [0], [0], [1], [0, 0, 1, 1], [], []>} : vector<8x8xf32>, vector<8x16xf32>, vector<8x16xf32> -> vector<8x16xf32>
    %632 = vector.extract_strided_slice %562 {offsets = [0, 48], sizes = [8, 16], strides = [1, 1]} : vector<8x192xf32> to vector<8x16xf32>
    %633 = vector.extract_strided_slice %562 {offsets = [0, 112], sizes = [8, 16], strides = [1, 1]} : vector<8x192xf32> to vector<8x16xf32>
    %634 = vector.extract_strided_slice %562 {offsets = [0, 176], sizes = [8, 16], strides = [1, 1]} : vector<8x192xf32> to vector<8x16xf32>
    %635 = tpu.transpose %633, [1, 0] : vector<8x16xf32> -> vector<16x8xf32>
    %cst_226 = arith.constant dense<0.000000e+00> : vector<8x8xf32>
    %636 = tpu.matmul %632, %635, %cst_226 {dimension_numbers = #tpu.dot_dimension_numbers<[1], [0], [0], [1], [0, 0, 1, 1], [], []>} : vector<8x16xf32>, vector<16x8xf32>, vector<8x8xf32> -> vector<8x8xf32>
    %cst_227 = arith.constant 2.500000e-01 : f32
    %637 = vector.broadcast %cst_227 : f32 to vector<8x8xf32>
    %638 = arith.mulf %636, %637 : vector<8x8xf32>
    %639 = tpu.iota {dimensions = array<i32: 0>} : vector<8x8xi32>
    %640 = tpu.iota {dimensions = array<i32: 1>} : vector<8x8xi32>
    %641 = arith.cmpi sge, %639, %640 : vector<8x8xi32>
    %cst_228 = arith.constant -1.000000e+30 : f32
    %642 = vector.broadcast %cst_228 : f32 to vector<8x8xf32>
    %643 = arith.select %641, %638, %642 : vector<8x8xi1>, vector<8x8xf32>
    %cst_229 = arith.constant dense<0xFF800000> : vector<8xf32>
    %644 = vector.multi_reduction <maximumf>, %643, %cst_229 [1] : vector<8x8xf32> to vector<8xf32>
    %645 = vector.shape_cast %644 : vector<8xf32> to vector<8x1xf32>
    %646 = vector.broadcast %645 : vector<8x1xf32> to vector<8x8xf32>
    %647 = arith.subf %643, %646 : vector<8x8xf32>
    %648 = math.exp %647 : vector<8x8xf32>
    %cst_230 = arith.constant dense<0.000000e+00> : vector<8xf32>
    %649 = vector.multi_reduction <add>, %648, %cst_230 [1] : vector<8x8xf32> to vector<8xf32>
    %650 = vector.shape_cast %649 : vector<8xf32> to vector<8x1xf32>
    %651 = tpu.reciprocal %650 {approx = true} : vector<8x1xf32> -> vector<8x1xf32>
    %652 = vector.broadcast %651 : vector<8x1xf32> to vector<8x8xf32>
    %653 = arith.mulf %648, %652 : vector<8x8xf32>
    %cst_231 = arith.constant dense<0.000000e+00> : vector<8x16xf32>
    %654 = tpu.matmul %653, %634, %cst_231 {dimension_numbers = #tpu.dot_dimension_numbers<[1], [0], [0], [1], [0, 0, 1, 1], [], []>} : vector<8x8xf32>, vector<8x16xf32>, vector<8x16xf32> -> vector<8x16xf32>
    %655 = tpu.concatenate %585, %608, %631, %654 in 1 : vector<8x16xf32>, vector<8x16xf32>, vector<8x16xf32>, vector<8x16xf32> -> vector<8x64xf32>
    %c0_232 = arith.constant 0 : index
    %c0_233 = arith.constant 0 : index
    %c0_234 = arith.constant 0 : index
    %656 = vector.load %arg22[%c0_232, %c0_233, %c0_234] : memref<2x64x64xf32, #tpu.memory_space<vmem>>, vector<1x64x64xf32>
    %657 = vector.shape_cast %656 : vector<1x64x64xf32> to vector<64x64xf32>
    %cst_235 = arith.constant dense<0.000000e+00> : vector<8x64xf32>
    %658 = tpu.matmul %655, %657, %cst_235 {dimension_numbers = #tpu.dot_dimension_numbers<[1], [0], [0], [1], [0, 0, 1, 1], [], []>} : vector<8x64xf32>, vector<64x64xf32>, vector<8x64xf32> -> vector<8x64xf32>
    %c0_236 = arith.constant 0 : index
    %c0_237 = arith.constant 0 : index
    %c0_238 = arith.constant 0 : index
    %659 = vector.load %arg23[%c0_236, %c0_237, %c0_238] : memref<2x1x64xf32, #tpu.memory_space<vmem>>, vector<1x1x64xf32>
    %660 = vector.shape_cast %659 : vector<1x1x64xf32> to vector<1x64xf32>
    %661 = vector.broadcast %660 : vector<1x64xf32> to vector<8x64xf32>
    %662 = arith.addf %658, %661 : vector<8x64xf32>
    %663 = arith.addf %531, %662 : vector<8x64xf32>
    %664 = vector.extract_strided_slice %533 {offsets = [2, 0], sizes = [1, 64], strides = [1, 1]} : vector<4x64xf32> to vector<1x64xf32>
    %665 = vector.extract_strided_slice %533 {offsets = [3, 0], sizes = [1, 64], strides = [1, 1]} : vector<4x64xf32> to vector<1x64xf32>
    %cst_239 = arith.constant dense<0.000000e+00> : vector<8xf32>
    %666 = vector.multi_reduction <add>, %663, %cst_239 [1] : vector<8x64xf32> to vector<8xf32>
    %667 = vector.shape_cast %666 : vector<8xf32> to vector<8x1xf32>
    %cst_240 = arith.constant 6.400000e+01 : f32
    %668 = vector.broadcast %cst_240 : f32 to vector<8x1xf32>
    %669 = arith.divf %667, %668 : vector<8x1xf32>
    %670 = vector.broadcast %669 : vector<8x1xf32> to vector<8x64xf32>
    %671 = arith.subf %663, %670 : vector<8x64xf32>
    %672 = arith.mulf %671, %671 : vector<8x64xf32>
    %cst_241 = arith.constant dense<0.000000e+00> : vector<8xf32>
    %673 = vector.multi_reduction <add>, %672, %cst_241 [1] : vector<8x64xf32> to vector<8xf32>
    %674 = vector.shape_cast %673 : vector<8xf32> to vector<8x1xf32>
    %cst_242 = arith.constant 6.400000e+01 : f32
    %675 = vector.broadcast %cst_242 : f32 to vector<8x1xf32>
    %676 = arith.divf %674, %675 : vector<8x1xf32>
    %cst_243 = arith.constant 9.99999974E-6 : f32
    %677 = vector.broadcast %cst_243 : f32 to vector<8x1xf32>
    %678 = arith.addf %676, %677 : vector<8x1xf32>
    %679 = math.rsqrt %678 : vector<8x1xf32>
    %680 = vector.broadcast %679 : vector<8x1xf32> to vector<8x64xf32>
    %681 = arith.mulf %671, %680 : vector<8x64xf32>
    %682 = vector.broadcast %664 : vector<1x64xf32> to vector<8x64xf32>
    %683 = arith.mulf %681, %682 : vector<8x64xf32>
    %684 = vector.broadcast %665 : vector<1x64xf32> to vector<8x64xf32>
    %685 = arith.addf %683, %684 : vector<8x64xf32>
    %c0_244 = arith.constant 0 : index
    %c0_245 = arith.constant 0 : index
    %c0_246 = arith.constant 0 : index
    %686 = vector.load %arg24[%c0_244, %c0_245, %c0_246] : memref<2x64x256xf32, #tpu.memory_space<vmem>>, vector<1x64x256xf32>
    %687 = vector.shape_cast %686 : vector<1x64x256xf32> to vector<64x256xf32>
    %cst_247 = arith.constant dense<0.000000e+00> : vector<8x256xf32>
    %688 = tpu.matmul %685, %687, %cst_247 {dimension_numbers = #tpu.dot_dimension_numbers<[1], [0], [0], [1], [0, 0, 1, 1], [], []>} : vector<8x64xf32>, vector<64x256xf32>, vector<8x256xf32> -> vector<8x256xf32>
    %c0_248 = arith.constant 0 : index
    %c0_249 = arith.constant 0 : index
    %c0_250 = arith.constant 0 : index
    %689 = vector.load %arg25[%c0_248, %c0_249, %c0_250] : memref<2x1x256xf32, #tpu.memory_space<vmem>>, vector<1x1x256xf32>
    %690 = vector.shape_cast %689 : vector<1x1x256xf32> to vector<1x256xf32>
    %691 = vector.broadcast %690 : vector<1x256xf32> to vector<8x256xf32>
    %692 = arith.addf %688, %691 : vector<8x256xf32>
    %cst_251 = arith.constant 1.702000e+00 : f32
    %693 = vector.broadcast %cst_251 : f32 to vector<8x256xf32>
    %694 = arith.mulf %693, %692 : vector<8x256xf32>
    %695 = arith.negf %694 : vector<8x256xf32>
    %696 = math.exp %695 : vector<8x256xf32>
    %cst_252 = arith.constant 1.000000e+00 : f32
    %697 = vector.broadcast %cst_252 : f32 to vector<8x256xf32>
    %698 = arith.addf %697, %696 : vector<8x256xf32>
    %699 = arith.divf %697, %698 : vector<8x256xf32>
    %700 = arith.mulf %692, %699 : vector<8x256xf32>
    %c0_253 = arith.constant 0 : index
    %c0_254 = arith.constant 0 : index
    %c0_255 = arith.constant 0 : index
    %701 = vector.load %arg26[%c0_253, %c0_254, %c0_255] : memref<2x256x64xf32, #tpu.memory_space<vmem>>, vector<1x256x64xf32>
    %702 = vector.shape_cast %701 : vector<1x256x64xf32> to vector<256x64xf32>
    %cst_256 = arith.constant dense<0.000000e+00> : vector<8x64xf32>
    %703 = tpu.matmul %700, %702, %cst_256 {dimension_numbers = #tpu.dot_dimension_numbers<[1], [0], [0], [1], [0, 0, 1, 1], [], []>} : vector<8x256xf32>, vector<256x64xf32>, vector<8x64xf32> -> vector<8x64xf32>
    %c0_257 = arith.constant 0 : index
    %c0_258 = arith.constant 0 : index
    %c0_259 = arith.constant 0 : index
    %704 = vector.load %arg27[%c0_257, %c0_258, %c0_259] : memref<2x1x64xf32, #tpu.memory_space<vmem>>, vector<1x1x64xf32>
    %705 = vector.shape_cast %704 : vector<1x1x64xf32> to vector<1x64xf32>
    %706 = vector.broadcast %705 : vector<1x64xf32> to vector<8x64xf32>
    %707 = arith.addf %703, %706 : vector<8x64xf32>
    %708 = arith.addf %663, %707 : vector<8x64xf32>
    %c1_260 = arith.constant 1 : index
    %c0_261 = arith.constant 0 : index
    %c0_262 = arith.constant 0 : index
    %709 = vector.load %arg19[%c1_260, %c0_261, %c0_262] : memref<2x4x64xf32, #tpu.memory_space<vmem>>, vector<1x4x64xf32>
    %710 = vector.shape_cast %709 : vector<1x4x64xf32> to vector<4x64xf32>
    %711 = vector.extract_strided_slice %710 {offsets = [0, 0], sizes = [1, 64], strides = [1, 1]} : vector<4x64xf32> to vector<1x64xf32>
    %712 = vector.extract_strided_slice %710 {offsets = [1, 0], sizes = [1, 64], strides = [1, 1]} : vector<4x64xf32> to vector<1x64xf32>
    %cst_263 = arith.constant dense<0.000000e+00> : vector<8xf32>
    %713 = vector.multi_reduction <add>, %708, %cst_263 [1] : vector<8x64xf32> to vector<8xf32>
    %714 = vector.shape_cast %713 : vector<8xf32> to vector<8x1xf32>
    %cst_264 = arith.constant 6.400000e+01 : f32
    %715 = vector.broadcast %cst_264 : f32 to vector<8x1xf32>
    %716 = arith.divf %714, %715 : vector<8x1xf32>
    %717 = vector.broadcast %716 : vector<8x1xf32> to vector<8x64xf32>
    %718 = arith.subf %708, %717 : vector<8x64xf32>
    %719 = arith.mulf %718, %718 : vector<8x64xf32>
    %cst_265 = arith.constant dense<0.000000e+00> : vector<8xf32>
    %720 = vector.multi_reduction <add>, %719, %cst_265 [1] : vector<8x64xf32> to vector<8xf32>
    %721 = vector.shape_cast %720 : vector<8xf32> to vector<8x1xf32>
    %cst_266 = arith.constant 6.400000e+01 : f32
    %722 = vector.broadcast %cst_266 : f32 to vector<8x1xf32>
    %723 = arith.divf %721, %722 : vector<8x1xf32>
    %cst_267 = arith.constant 9.99999974E-6 : f32
    %724 = vector.broadcast %cst_267 : f32 to vector<8x1xf32>
    %725 = arith.addf %723, %724 : vector<8x1xf32>
    %726 = math.rsqrt %725 : vector<8x1xf32>
    %727 = vector.broadcast %726 : vector<8x1xf32> to vector<8x64xf32>
    %728 = arith.mulf %718, %727 : vector<8x64xf32>
    %729 = vector.broadcast %711 : vector<1x64xf32> to vector<8x64xf32>
    %730 = arith.mulf %728, %729 : vector<8x64xf32>
    %731 = vector.broadcast %712 : vector<1x64xf32> to vector<8x64xf32>
    %732 = arith.addf %730, %731 : vector<8x64xf32>
    %c1_268 = arith.constant 1 : index
    %c0_269 = arith.constant 0 : index
    %c0_270 = arith.constant 0 : index
    %733 = vector.load %arg20[%c1_268, %c0_269, %c0_270] : memref<2x64x192xf32, #tpu.memory_space<vmem>>, vector<1x64x192xf32>
    %734 = vector.shape_cast %733 : vector<1x64x192xf32> to vector<64x192xf32>
    %cst_271 = arith.constant dense<0.000000e+00> : vector<8x192xf32>
    %735 = tpu.matmul %732, %734, %cst_271 {dimension_numbers = #tpu.dot_dimension_numbers<[1], [0], [0], [1], [0, 0, 1, 1], [], []>} : vector<8x64xf32>, vector<64x192xf32>, vector<8x192xf32> -> vector<8x192xf32>
    %c1_272 = arith.constant 1 : index
    %c0_273 = arith.constant 0 : index
    %c0_274 = arith.constant 0 : index
    %736 = vector.load %arg21[%c1_272, %c0_273, %c0_274] : memref<2x1x192xf32, #tpu.memory_space<vmem>>, vector<1x1x192xf32>
    %737 = vector.shape_cast %736 : vector<1x1x192xf32> to vector<1x192xf32>
    %738 = vector.broadcast %737 : vector<1x192xf32> to vector<8x192xf32>
    %739 = arith.addf %735, %738 : vector<8x192xf32>
    %740 = vector.extract_strided_slice %739 {offsets = [0, 0], sizes = [8, 16], strides = [1, 1]} : vector<8x192xf32> to vector<8x16xf32>
    %741 = vector.extract_strided_slice %739 {offsets = [0, 64], sizes = [8, 16], strides = [1, 1]} : vector<8x192xf32> to vector<8x16xf32>
    %742 = vector.extract_strided_slice %739 {offsets = [0, 128], sizes = [8, 16], strides = [1, 1]} : vector<8x192xf32> to vector<8x16xf32>
    %743 = tpu.transpose %741, [1, 0] : vector<8x16xf32> -> vector<16x8xf32>
    %cst_275 = arith.constant dense<0.000000e+00> : vector<8x8xf32>
    %744 = tpu.matmul %740, %743, %cst_275 {dimension_numbers = #tpu.dot_dimension_numbers<[1], [0], [0], [1], [0, 0, 1, 1], [], []>} : vector<8x16xf32>, vector<16x8xf32>, vector<8x8xf32> -> vector<8x8xf32>
    %cst_276 = arith.constant 2.500000e-01 : f32
    %745 = vector.broadcast %cst_276 : f32 to vector<8x8xf32>
    %746 = arith.mulf %744, %745 : vector<8x8xf32>
    %747 = tpu.iota {dimensions = array<i32: 0>} : vector<8x8xi32>
    %748 = tpu.iota {dimensions = array<i32: 1>} : vector<8x8xi32>
    %749 = arith.cmpi sge, %747, %748 : vector<8x8xi32>
    %cst_277 = arith.constant -1.000000e+30 : f32
    %750 = vector.broadcast %cst_277 : f32 to vector<8x8xf32>
    %751 = arith.select %749, %746, %750 : vector<8x8xi1>, vector<8x8xf32>
    %cst_278 = arith.constant dense<0xFF800000> : vector<8xf32>
    %752 = vector.multi_reduction <maximumf>, %751, %cst_278 [1] : vector<8x8xf32> to vector<8xf32>
    %753 = vector.shape_cast %752 : vector<8xf32> to vector<8x1xf32>
    %754 = vector.broadcast %753 : vector<8x1xf32> to vector<8x8xf32>
    %755 = arith.subf %751, %754 : vector<8x8xf32>
    %756 = math.exp %755 : vector<8x8xf32>
    %cst_279 = arith.constant dense<0.000000e+00> : vector<8xf32>
    %757 = vector.multi_reduction <add>, %756, %cst_279 [1] : vector<8x8xf32> to vector<8xf32>
    %758 = vector.shape_cast %757 : vector<8xf32> to vector<8x1xf32>
    %759 = tpu.reciprocal %758 {approx = true} : vector<8x1xf32> -> vector<8x1xf32>
    %760 = vector.broadcast %759 : vector<8x1xf32> to vector<8x8xf32>
    %761 = arith.mulf %756, %760 : vector<8x8xf32>
    %cst_280 = arith.constant dense<0.000000e+00> : vector<8x16xf32>
    %762 = tpu.matmul %761, %742, %cst_280 {dimension_numbers = #tpu.dot_dimension_numbers<[1], [0], [0], [1], [0, 0, 1, 1], [], []>} : vector<8x8xf32>, vector<8x16xf32>, vector<8x16xf32> -> vector<8x16xf32>
    %763 = vector.extract_strided_slice %739 {offsets = [0, 16], sizes = [8, 16], strides = [1, 1]} : vector<8x192xf32> to vector<8x16xf32>
    %764 = vector.extract_strided_slice %739 {offsets = [0, 80], sizes = [8, 16], strides = [1, 1]} : vector<8x192xf32> to vector<8x16xf32>
    %765 = vector.extract_strided_slice %739 {offsets = [0, 144], sizes = [8, 16], strides = [1, 1]} : vector<8x192xf32> to vector<8x16xf32>
    %766 = tpu.transpose %764, [1, 0] : vector<8x16xf32> -> vector<16x8xf32>
    %cst_281 = arith.constant dense<0.000000e+00> : vector<8x8xf32>
    %767 = tpu.matmul %763, %766, %cst_281 {dimension_numbers = #tpu.dot_dimension_numbers<[1], [0], [0], [1], [0, 0, 1, 1], [], []>} : vector<8x16xf32>, vector<16x8xf32>, vector<8x8xf32> -> vector<8x8xf32>
    %cst_282 = arith.constant 2.500000e-01 : f32
    %768 = vector.broadcast %cst_282 : f32 to vector<8x8xf32>
    %769 = arith.mulf %767, %768 : vector<8x8xf32>
    %770 = tpu.iota {dimensions = array<i32: 0>} : vector<8x8xi32>
    %771 = tpu.iota {dimensions = array<i32: 1>} : vector<8x8xi32>
    %772 = arith.cmpi sge, %770, %771 : vector<8x8xi32>
    %cst_283 = arith.constant -1.000000e+30 : f32
    %773 = vector.broadcast %cst_283 : f32 to vector<8x8xf32>
    %774 = arith.select %772, %769, %773 : vector<8x8xi1>, vector<8x8xf32>
    %cst_284 = arith.constant dense<0xFF800000> : vector<8xf32>
    %775 = vector.multi_reduction <maximumf>, %774, %cst_284 [1] : vector<8x8xf32> to vector<8xf32>
    %776 = vector.shape_cast %775 : vector<8xf32> to vector<8x1xf32>
    %777 = vector.broadcast %776 : vector<8x1xf32> to vector<8x8xf32>
    %778 = arith.subf %774, %777 : vector<8x8xf32>
    %779 = math.exp %778 : vector<8x8xf32>
    %cst_285 = arith.constant dense<0.000000e+00> : vector<8xf32>
    %780 = vector.multi_reduction <add>, %779, %cst_285 [1] : vector<8x8xf32> to vector<8xf32>
    %781 = vector.shape_cast %780 : vector<8xf32> to vector<8x1xf32>
    %782 = tpu.reciprocal %781 {approx = true} : vector<8x1xf32> -> vector<8x1xf32>
    %783 = vector.broadcast %782 : vector<8x1xf32> to vector<8x8xf32>
    %784 = arith.mulf %779, %783 : vector<8x8xf32>
    %cst_286 = arith.constant dense<0.000000e+00> : vector<8x16xf32>
    %785 = tpu.matmul %784, %765, %cst_286 {dimension_numbers = #tpu.dot_dimension_numbers<[1], [0], [0], [1], [0, 0, 1, 1], [], []>} : vector<8x8xf32>, vector<8x16xf32>, vector<8x16xf32> -> vector<8x16xf32>
    %786 = vector.extract_strided_slice %739 {offsets = [0, 32], sizes = [8, 16], strides = [1, 1]} : vector<8x192xf32> to vector<8x16xf32>
    %787 = vector.extract_strided_slice %739 {offsets = [0, 96], sizes = [8, 16], strides = [1, 1]} : vector<8x192xf32> to vector<8x16xf32>
    %788 = vector.extract_strided_slice %739 {offsets = [0, 160], sizes = [8, 16], strides = [1, 1]} : vector<8x192xf32> to vector<8x16xf32>
    %789 = tpu.transpose %787, [1, 0] : vector<8x16xf32> -> vector<16x8xf32>
    %cst_287 = arith.constant dense<0.000000e+00> : vector<8x8xf32>
    %790 = tpu.matmul %786, %789, %cst_287 {dimension_numbers = #tpu.dot_dimension_numbers<[1], [0], [0], [1], [0, 0, 1, 1], [], []>} : vector<8x16xf32>, vector<16x8xf32>, vector<8x8xf32> -> vector<8x8xf32>
    %cst_288 = arith.constant 2.500000e-01 : f32
    %791 = vector.broadcast %cst_288 : f32 to vector<8x8xf32>
    %792 = arith.mulf %790, %791 : vector<8x8xf32>
    %793 = tpu.iota {dimensions = array<i32: 0>} : vector<8x8xi32>
    %794 = tpu.iota {dimensions = array<i32: 1>} : vector<8x8xi32>
    %795 = arith.cmpi sge, %793, %794 : vector<8x8xi32>
    %cst_289 = arith.constant -1.000000e+30 : f32
    %796 = vector.broadcast %cst_289 : f32 to vector<8x8xf32>
    %797 = arith.select %795, %792, %796 : vector<8x8xi1>, vector<8x8xf32>
    %cst_290 = arith.constant dense<0xFF800000> : vector<8xf32>
    %798 = vector.multi_reduction <maximumf>, %797, %cst_290 [1] : vector<8x8xf32> to vector<8xf32>
    %799 = vector.shape_cast %798 : vector<8xf32> to vector<8x1xf32>
    %800 = vector.broadcast %799 : vector<8x1xf32> to vector<8x8xf32>
    %801 = arith.subf %797, %800 : vector<8x8xf32>
    %802 = math.exp %801 : vector<8x8xf32>
    %cst_291 = arith.constant dense<0.000000e+00> : vector<8xf32>
    %803 = vector.multi_reduction <add>, %802, %cst_291 [1] : vector<8x8xf32> to vector<8xf32>
    %804 = vector.shape_cast %803 : vector<8xf32> to vector<8x1xf32>
    %805 = tpu.reciprocal %804 {approx = true} : vector<8x1xf32> -> vector<8x1xf32>
    %806 = vector.broadcast %805 : vector<8x1xf32> to vector<8x8xf32>
    %807 = arith.mulf %802, %806 : vector<8x8xf32>
    %cst_292 = arith.constant dense<0.000000e+00> : vector<8x16xf32>
    %808 = tpu.matmul %807, %788, %cst_292 {dimension_numbers = #tpu.dot_dimension_numbers<[1], [0], [0], [1], [0, 0, 1, 1], [], []>} : vector<8x8xf32>, vector<8x16xf32>, vector<8x16xf32> -> vector<8x16xf32>
    %809 = vector.extract_strided_slice %739 {offsets = [0, 48], sizes = [8, 16], strides = [1, 1]} : vector<8x192xf32> to vector<8x16xf32>
    %810 = vector.extract_strided_slice %739 {offsets = [0, 112], sizes = [8, 16], strides = [1, 1]} : vector<8x192xf32> to vector<8x16xf32>
    %811 = vector.extract_strided_slice %739 {offsets = [0, 176], sizes = [8, 16], strides = [1, 1]} : vector<8x192xf32> to vector<8x16xf32>
    %812 = tpu.transpose %810, [1, 0] : vector<8x16xf32> -> vector<16x8xf32>
    %cst_293 = arith.constant dense<0.000000e+00> : vector<8x8xf32>
    %813 = tpu.matmul %809, %812, %cst_293 {dimension_numbers = #tpu.dot_dimension_numbers<[1], [0], [0], [1], [0, 0, 1, 1], [], []>} : vector<8x16xf32>, vector<16x8xf32>, vector<8x8xf32> -> vector<8x8xf32>
    %cst_294 = arith.constant 2.500000e-01 : f32
    %814 = vector.broadcast %cst_294 : f32 to vector<8x8xf32>
    %815 = arith.mulf %813, %814 : vector<8x8xf32>
    %816 = tpu.iota {dimensions = array<i32: 0>} : vector<8x8xi32>
    %817 = tpu.iota {dimensions = array<i32: 1>} : vector<8x8xi32>
    %818 = arith.cmpi sge, %816, %817 : vector<8x8xi32>
    %cst_295 = arith.constant -1.000000e+30 : f32
    %819 = vector.broadcast %cst_295 : f32 to vector<8x8xf32>
    %820 = arith.select %818, %815, %819 : vector<8x8xi1>, vector<8x8xf32>
    %cst_296 = arith.constant dense<0xFF800000> : vector<8xf32>
    %821 = vector.multi_reduction <maximumf>, %820, %cst_296 [1] : vector<8x8xf32> to vector<8xf32>
    %822 = vector.shape_cast %821 : vector<8xf32> to vector<8x1xf32>
    %823 = vector.broadcast %822 : vector<8x1xf32> to vector<8x8xf32>
    %824 = arith.subf %820, %823 : vector<8x8xf32>
    %825 = math.exp %824 : vector<8x8xf32>
    %cst_297 = arith.constant dense<0.000000e+00> : vector<8xf32>
    %826 = vector.multi_reduction <add>, %825, %cst_297 [1] : vector<8x8xf32> to vector<8xf32>
    %827 = vector.shape_cast %826 : vector<8xf32> to vector<8x1xf32>
    %828 = tpu.reciprocal %827 {approx = true} : vector<8x1xf32> -> vector<8x1xf32>
    %829 = vector.broadcast %828 : vector<8x1xf32> to vector<8x8xf32>
    %830 = arith.mulf %825, %829 : vector<8x8xf32>
    %cst_298 = arith.constant dense<0.000000e+00> : vector<8x16xf32>
    %831 = tpu.matmul %830, %811, %cst_298 {dimension_numbers = #tpu.dot_dimension_numbers<[1], [0], [0], [1], [0, 0, 1, 1], [], []>} : vector<8x8xf32>, vector<8x16xf32>, vector<8x16xf32> -> vector<8x16xf32>
    %832 = tpu.concatenate %762, %785, %808, %831 in 1 : vector<8x16xf32>, vector<8x16xf32>, vector<8x16xf32>, vector<8x16xf32> -> vector<8x64xf32>
    %c1_299 = arith.constant 1 : index
    %c0_300 = arith.constant 0 : index
    %c0_301 = arith.constant 0 : index
    %833 = vector.load %arg22[%c1_299, %c0_300, %c0_301] : memref<2x64x64xf32, #tpu.memory_space<vmem>>, vector<1x64x64xf32>
    %834 = vector.shape_cast %833 : vector<1x64x64xf32> to vector<64x64xf32>
    %cst_302 = arith.constant dense<0.000000e+00> : vector<8x64xf32>
    %835 = tpu.matmul %832, %834, %cst_302 {dimension_numbers = #tpu.dot_dimension_numbers<[1], [0], [0], [1], [0, 0, 1, 1], [], []>} : vector<8x64xf32>, vector<64x64xf32>, vector<8x64xf32> -> vector<8x64xf32>
    %c1_303 = arith.constant 1 : index
    %c0_304 = arith.constant 0 : index
    %c0_305 = arith.constant 0 : index
    %836 = vector.load %arg23[%c1_303, %c0_304, %c0_305] : memref<2x1x64xf32, #tpu.memory_space<vmem>>, vector<1x1x64xf32>
    %837 = vector.shape_cast %836 : vector<1x1x64xf32> to vector<1x64xf32>
    %838 = vector.broadcast %837 : vector<1x64xf32> to vector<8x64xf32>
    %839 = arith.addf %835, %838 : vector<8x64xf32>
    %840 = arith.addf %708, %839 : vector<8x64xf32>
    %841 = vector.extract_strided_slice %710 {offsets = [2, 0], sizes = [1, 64], strides = [1, 1]} : vector<4x64xf32> to vector<1x64xf32>
    %842 = vector.extract_strided_slice %710 {offsets = [3, 0], sizes = [1, 64], strides = [1, 1]} : vector<4x64xf32> to vector<1x64xf32>
    %cst_306 = arith.constant dense<0.000000e+00> : vector<8xf32>
    %843 = vector.multi_reduction <add>, %840, %cst_306 [1] : vector<8x64xf32> to vector<8xf32>
    %844 = vector.shape_cast %843 : vector<8xf32> to vector<8x1xf32>
    %cst_307 = arith.constant 6.400000e+01 : f32
    %845 = vector.broadcast %cst_307 : f32 to vector<8x1xf32>
    %846 = arith.divf %844, %845 : vector<8x1xf32>
    %847 = vector.broadcast %846 : vector<8x1xf32> to vector<8x64xf32>
    %848 = arith.subf %840, %847 : vector<8x64xf32>
    %849 = arith.mulf %848, %848 : vector<8x64xf32>
    %cst_308 = arith.constant dense<0.000000e+00> : vector<8xf32>
    %850 = vector.multi_reduction <add>, %849, %cst_308 [1] : vector<8x64xf32> to vector<8xf32>
    %851 = vector.shape_cast %850 : vector<8xf32> to vector<8x1xf32>
    %cst_309 = arith.constant 6.400000e+01 : f32
    %852 = vector.broadcast %cst_309 : f32 to vector<8x1xf32>
    %853 = arith.divf %851, %852 : vector<8x1xf32>
    %cst_310 = arith.constant 9.99999974E-6 : f32
    %854 = vector.broadcast %cst_310 : f32 to vector<8x1xf32>
    %855 = arith.addf %853, %854 : vector<8x1xf32>
    %856 = math.rsqrt %855 : vector<8x1xf32>
    %857 = vector.broadcast %856 : vector<8x1xf32> to vector<8x64xf32>
    %858 = arith.mulf %848, %857 : vector<8x64xf32>
    %859 = vector.broadcast %841 : vector<1x64xf32> to vector<8x64xf32>
    %860 = arith.mulf %858, %859 : vector<8x64xf32>
    %861 = vector.broadcast %842 : vector<1x64xf32> to vector<8x64xf32>
    %862 = arith.addf %860, %861 : vector<8x64xf32>
    %c1_311 = arith.constant 1 : index
    %c0_312 = arith.constant 0 : index
    %c0_313 = arith.constant 0 : index
    %863 = vector.load %arg24[%c1_311, %c0_312, %c0_313] : memref<2x64x256xf32, #tpu.memory_space<vmem>>, vector<1x64x256xf32>
    %864 = vector.shape_cast %863 : vector<1x64x256xf32> to vector<64x256xf32>
    %cst_314 = arith.constant dense<0.000000e+00> : vector<8x256xf32>
    %865 = tpu.matmul %862, %864, %cst_314 {dimension_numbers = #tpu.dot_dimension_numbers<[1], [0], [0], [1], [0, 0, 1, 1], [], []>} : vector<8x64xf32>, vector<64x256xf32>, vector<8x256xf32> -> vector<8x256xf32>
    %c1_315 = arith.constant 1 : index
    %c0_316 = arith.constant 0 : index
    %c0_317 = arith.constant 0 : index
    %866 = vector.load %arg25[%c1_315, %c0_316, %c0_317] : memref<2x1x256xf32, #tpu.memory_space<vmem>>, vector<1x1x256xf32>
    %867 = vector.shape_cast %866 : vector<1x1x256xf32> to vector<1x256xf32>
    %868 = vector.broadcast %867 : vector<1x256xf32> to vector<8x256xf32>
    %869 = arith.addf %865, %868 : vector<8x256xf32>
    %cst_318 = arith.constant 1.702000e+00 : f32
    %870 = vector.broadcast %cst_318 : f32 to vector<8x256xf32>
    %871 = arith.mulf %870, %869 : vector<8x256xf32>
    %872 = arith.negf %871 : vector<8x256xf32>
    %873 = math.exp %872 : vector<8x256xf32>
    %cst_319 = arith.constant 1.000000e+00 : f32
    %874 = vector.broadcast %cst_319 : f32 to vector<8x256xf32>
    %875 = arith.addf %874, %873 : vector<8x256xf32>
    %876 = arith.divf %874, %875 : vector<8x256xf32>
    %877 = arith.mulf %869, %876 : vector<8x256xf32>
    %c1_320 = arith.constant 1 : index
    %c0_321 = arith.constant 0 : index
    %c0_322 = arith.constant 0 : index
    %878 = vector.load %arg26[%c1_320, %c0_321, %c0_322] : memref<2x256x64xf32, #tpu.memory_space<vmem>>, vector<1x256x64xf32>
    %879 = vector.shape_cast %878 : vector<1x256x64xf32> to vector<256x64xf32>
    %cst_323 = arith.constant dense<0.000000e+00> : vector<8x64xf32>
    %880 = tpu.matmul %877, %879, %cst_323 {dimension_numbers = #tpu.dot_dimension_numbers<[1], [0], [0], [1], [0, 0, 1, 1], [], []>} : vector<8x256xf32>, vector<256x64xf32>, vector<8x64xf32> -> vector<8x64xf32>
    %c1_324 = arith.constant 1 : index
    %c0_325 = arith.constant 0 : index
    %c0_326 = arith.constant 0 : index
    %881 = vector.load %arg27[%c1_324, %c0_325, %c0_326] : memref<2x1x64xf32, #tpu.memory_space<vmem>>, vector<1x1x64xf32>
    %882 = vector.shape_cast %881 : vector<1x1x64xf32> to vector<1x64xf32>
    %883 = vector.broadcast %882 : vector<1x64xf32> to vector<8x64xf32>
    %884 = arith.addf %880, %883 : vector<8x64xf32>
    %885 = arith.addf %840, %884 : vector<8x64xf32>
    %c0_327 = arith.constant 0 : index
    %c0_328 = arith.constant 0 : index
    %886 = vector.load %arg28[%c0_327, %c0_328] : memref<2x64xf32, #tpu.memory_space<vmem>>, vector<2x64xf32>
    %887 = vector.extract_strided_slice %886 {offsets = [0, 0], sizes = [1, 64], strides = [1, 1]} : vector<2x64xf32> to vector<1x64xf32>
    %888 = vector.extract_strided_slice %886 {offsets = [1, 0], sizes = [1, 64], strides = [1, 1]} : vector<2x64xf32> to vector<1x64xf32>
    %cst_329 = arith.constant dense<0.000000e+00> : vector<8xf32>
    %889 = vector.multi_reduction <add>, %885, %cst_329 [1] : vector<8x64xf32> to vector<8xf32>
    %890 = vector.shape_cast %889 : vector<8xf32> to vector<8x1xf32>
    %cst_330 = arith.constant 6.400000e+01 : f32
    %891 = vector.broadcast %cst_330 : f32 to vector<8x1xf32>
    %892 = arith.divf %890, %891 : vector<8x1xf32>
    %893 = vector.broadcast %892 : vector<8x1xf32> to vector<8x64xf32>
    %894 = arith.subf %885, %893 : vector<8x64xf32>
    %895 = arith.mulf %894, %894 : vector<8x64xf32>
    %cst_331 = arith.constant dense<0.000000e+00> : vector<8xf32>
    %896 = vector.multi_reduction <add>, %895, %cst_331 [1] : vector<8x64xf32> to vector<8xf32>
    %897 = vector.shape_cast %896 : vector<8xf32> to vector<8x1xf32>
    %cst_332 = arith.constant 6.400000e+01 : f32
    %898 = vector.broadcast %cst_332 : f32 to vector<8x1xf32>
    %899 = arith.divf %897, %898 : vector<8x1xf32>
    %cst_333 = arith.constant 9.99999974E-6 : f32
    %900 = vector.broadcast %cst_333 : f32 to vector<8x1xf32>
    %901 = arith.addf %899, %900 : vector<8x1xf32>
    %902 = math.rsqrt %901 : vector<8x1xf32>
    %903 = vector.broadcast %902 : vector<8x1xf32> to vector<8x64xf32>
    %904 = arith.mulf %894, %903 : vector<8x64xf32>
    %905 = vector.broadcast %887 : vector<1x64xf32> to vector<8x64xf32>
    %906 = arith.mulf %904, %905 : vector<8x64xf32>
    %907 = vector.broadcast %888 : vector<1x64xf32> to vector<8x64xf32>
    %908 = arith.addf %906, %907 : vector<8x64xf32>
    %c0_334 = arith.constant 0 : index
    %909 = memref.load %arg0[%c0_334] : memref<1xi32, #tpu.memory_space<smem>>
    %910 = tpu.iota {dimensions = array<i32: 1>} : vector<1x8xi32>
    %911 = vector.broadcast %909 : i32 to vector<1x8xi32>
    %912 = arith.cmpi eq, %910, %911 : vector<1x8xi32>
    %913 = arith.extui %912 : vector<1x8xi1> to vector<1x8xi32>
    %914 = arith.sitofp %913 : vector<1x8xi32> to vector<1x8xf32>
    %cst_335 = arith.constant dense<0.000000e+00> : vector<1x64xf32>
    %915 = tpu.matmul %914, %908, %cst_335 {dimension_numbers = #tpu.dot_dimension_numbers<[1], [0], [0], [1], [0, 0, 1, 1], [], []>} : vector<1x8xf32>, vector<8x64xf32>, vector<1x64xf32> -> vector<1x64xf32>
    %c0_336 = arith.constant 0 : index
    %c0_337 = arith.constant 0 : index
    %916 = vector.load %arg29[%c0_336, %c0_337] : memref<64x32xf32, #tpu.memory_space<vmem>>, vector<64x32xf32>
    %cst_338 = arith.constant dense<0.000000e+00> : vector<1x32xf32>
    %917 = tpu.matmul %915, %916, %cst_338 {dimension_numbers = #tpu.dot_dimension_numbers<[1], [0], [0], [1], [0, 0, 1, 1], [], []>} : vector<1x64xf32>, vector<64x32xf32>, vector<1x32xf32> -> vector<1x32xf32>
    %918 = arith.mulf %528, %528 : vector<2x32xf32>
    %cst_339 = arith.constant dense<0.000000e+00> : vector<2xf32>
    %919 = vector.multi_reduction <add>, %918, %cst_339 [1] : vector<2x32xf32> to vector<2xf32>
    %920 = vector.shape_cast %919 : vector<2xf32> to vector<2x1xf32>
    %921 = math.rsqrt %920 : vector<2x1xf32>
    %922 = vector.broadcast %921 : vector<2x1xf32> to vector<2x32xf32>
    %923 = arith.mulf %528, %922 : vector<2x32xf32>
    %924 = arith.mulf %917, %917 : vector<1x32xf32>
    %cst_340 = arith.constant dense<0.000000e+00> : vector<1xf32>
    %925 = vector.multi_reduction <add>, %924, %cst_340 [1] : vector<1x32xf32> to vector<1xf32>
    %926 = vector.shape_cast %925 : vector<1xf32> to vector<1x1xf32>
    %927 = math.rsqrt %926 : vector<1x1xf32>
    %928 = vector.broadcast %927 : vector<1x1xf32> to vector<1x32xf32>
    %929 = arith.mulf %917, %928 : vector<1x32xf32>
    %930 = vector.broadcast %929 : vector<1x32xf32> to vector<2x32xf32>
    %931 = arith.mulf %923, %930 : vector<2x32xf32>
    %cst_341 = arith.constant dense<0.000000e+00> : vector<2xf32>
    %932 = vector.multi_reduction <add>, %931, %cst_341 [1] : vector<2x32xf32> to vector<2xf32>
    %933 = vector.shape_cast %932 : vector<2xf32> to vector<2x1xf32>
    %cst_342 = arith.constant 4.500000e+00 : f32
    %934 = vector.broadcast %cst_342 : f32 to vector<2x1xf32>
    %935 = arith.addf %933, %934 : vector<2x1xf32>
    %c0_343 = arith.constant 0 : index
    %c0_344 = arith.constant 0 : index
    %936 = vector.load %arg30[%c0_343, %c0_344] : memref<2x1xf32, #tpu.memory_space<vmem>>, vector<2x1xf32>
    tpu.vector_store %arg30[%c0_343, %c0_344], %935 {strides = array<i32>} : memref<2x1xf32, #tpu.memory_space<vmem>>, vector<2x1xf32>,
    return
  }
}

</mosaic_0001>

<bundles_post_ra>
// kernel: son_clip_forward.1
= control target key start
LH: loop header
LB: loop body
LE: loop exit
PB: predicated region body
PF: predicated region fallthrough
CT: control target
= control target key end

     0   :  { %v8337_v0 = vmov 0.0|0.0   ;;  %s8338_s3 = smov 2   ;;  %s8339_s7 = smov 1   ;;  %vm153_vm0 = vcmask 523264   ;;  %v241_v39 = vlaneseq  ;;  %vm249_vm1 = vcmask 1040384   ;;  %s9620_s0 = inlined_call_operand.smem [shape: u32[31], index: -1, kind: input, shape index: {}] }
   0x1   :  { %7746 = vmatprep.subr.bf16.mxu0 %v8337_v0  ;;  %s8385_s6 = sld [smem:[%s9620_s0 + %s8338_s3]]   ;;  %s8340_s11 = smov 4   ;;  %vm251_vm2 = vcmask 1044480   ;;  %vm253_vm3 = vcmask 1045504   ;;  %vm259_vm4 = vcmask 517120   ;;  %vm8347_vm5 = vmmov 0  }
   0x2   :  { %s8393_s10 = sld [smem:[%s9620_s0 + %s8339_s7]]   ;;  %s8341_s15 = smov 3   ;;  %v8437_v41 = vshrl.u32 %v241_v39, 7  ;;  %vm449_vm6 = vcmask 130048   ;;  %vm1133_vm7 = vcmask 1042432   ;;  %vm525_vm8 = vcmask 36864  }
   0x3   :  { %s6775_s14 = sld [smem:[%s9620_s0 + %s8340_s11]]   ;;  %s8342_s19 = smov 5   ;;  %vm537_vm9 = vcmask 39936   ;;  %vm1130_vm10 = vcmask 392192   ;;  %vm1128_vm11 = vcmask 261120   ;;  %vm4463_vm13 = vcmask 64512  }
   0x4   :  { %s6774_s18 = sld [smem:[%s9620_s0 + %s8341_s15]]   ;;  %v8440_v46 = vsub.s32 0, %v8437_v41  ;;  %s8343_s23 = smov 7   ;;  %vm6744_vm14 = vcmask 254976  }
   0x5   :  { %s6776_s22 = sld [smem:[%s9620_s0 + %s8342_s19]]   ;;  %s8345_s27 = smov 6  }
   0x6   :  { %s8476_s26 = sld [smem:[%s9620_s0 + %s8343_s23]]   ;;  %s8346_s1 = smov 8  }
   0x7   :  { %v129_v1 = vld [vmem:[%s8385_s6] sm:$0xff]  ;;  %v130_v2 = vld [vmem:[%s8385_s6 + $0x8] sm:$0xff]  ;;  %v131_v3 = vld [vmem:[%s8385_s6 + $0x10] sm:$0xff]  ;;  %s8500_s30 = sld [smem:[%s9620_s0 + %s8345_s27]]   ;;  %s8348_s5 = smov 64  }
   0x8   :  { %v7747_v4 = vpack.c.bf16 %v130_v2, %v129_v1  ;;  %v132_v5 = vld [vmem:[%s8385_s6 + $0x18] sm:$0xff]  ;;  %v133_v7 = vld [vmem:[%s8385_s6 + $0x20] sm:$0xff]  ;;  %v134_v8 = vld [vmem:[%s8385_s6 + $0x28] sm:$0xff]  ;;  %s8523_s4 = sld [smem:[%s9620_s0 + %s8346_s1]]   ;;  %s8350_s7 = smov 48  }
   0x9   :  { %v7750_v6 = vpack.c.bf16 %v132_v5, %v131_v3  ;;  %v7753_v9 = vpack.c.bf16 %v134_v8, %v133_v7  ;;  %v135_v10 = vld [vmem:[%s8385_s6 + $0x30] sm:$0xff]  ;;  %v136_v11 = vld [vmem:[%s8385_s6 + $0x38] sm:$0xff]  ;;  %v128_v12 = vld [vmem:[%s8393_s10 + $0x8] sm:$0xff]  ;;  %v8452_v5 = vsub.s32 1, %v8437_v41  ;;  %s8351_s8 = smov 32   ;;  %s8352_s9 = smov 96  }
   0xa   :  { %7748 = vmatpush1.bf16.msra.mxu0 %v7747_v4  ;;  %6802 = vmatprep.mubr.msk.f32.mxu0 %vm153_vm0, %v128_v12  ;;  %v7756_v13 = vpack.c.bf16 %v136_v11, %v135_v10  ;;  %v137_v14 = vld [vmem:[%s8385_s6 + $0x40] sm:$0xff]  ;;  %v138_v15 = vld [vmem:[%s8385_s6 + $0x48] sm:$0xff]  ;;  %v139_v17 = vld [vmem:[%s8385_s6 + $0x50] sm:$0xff]  ;;  %s8354_s11 = smov 16   ;;  %s8355_s12 = smov 9  }
   0xb   :  { %7749 = vmatprep.subr.bf16.mxu0 %v8337_v0  ;;  %v7759_v16 = vpack.c.bf16 %v138_v15, %v137_v14  ;;  %v140_v18 = vld [vmem:[%s8385_s6 + $0x58] sm:$0xff]  ;;  %v141_v20 = vld [vmem:[%s8385_s6 + $0x60] sm:$0xff]  ;;  %v142_v21 = vld [vmem:[%s8385_s6 + $0x68] sm:$0xff]  ;;  %s8692_s15 = sld [smem:[%s9620_s0 + %s8355_s12]]   ;;  %s8356_s16 = smov 10  }
   0xc   :  { %v7762_v19 = vpack.c.bf16 %v140_v18, %v139_v17  ;;  %v7765_v22 = vpack.c.bf16 %v142_v21, %v141_v20  ;;  %v143_v23 = vld [vmem:[%s8385_s6 + $0x70] sm:$0xff]  ;;  %v144_v24 = vld [vmem:[%s8385_s6 + $0x78] sm:$0xff]  ;;  %v145_v26 = vld [vmem:[%s8385_s6 + $0x80] sm:$0xff]  ;;  %s8720_s19 = sld [smem:[%s9620_s0 + %s8356_s16]]   ;;  %s8357_s20 = smov 11  }
   0xd   :  { %v7768_v25 = vpack.c.bf16 %v144_v24, %v143_v23  ;;  %v146_v27 = vld [vmem:[%s8385_s6 + $0x88] sm:$0xff]  ;;  %v147_v29 = vld [vmem:[%s8385_s6 + $0x90] sm:$0xff]  ;;  %v148_v30 = vld [vmem:[%s8385_s6 + $0x98] sm:$0xff]  ;;  %s8740_s23 = sld [smem:[%s9620_s0 + %s8357_s20]]   ;;  %s8358_s24 = smov 13  }
   0xe   :  { %7751 = vmatpush1.bf16.msra.mxu0 %v7750_v6  ;;  %v7771_v28 = vpack.c.bf16 %v146_v27, %v145_v26  ;;  %v7774_v31 = vpack.c.bf16 %v148_v30, %v147_v29  ;;  %v149_v32 = vld [vmem:[%s8385_s6 + $0xa0] sm:$0xff]  ;;  %v150_v33 = vld [vmem:[%s8385_s6 + $0xa8] sm:$0xff]  ;;  %v151_v35 = vld [vmem:[%s8385_s6 + $0xb0] sm:$0xff]  ;;  %s8775_s28 = sld [smem:[%s9620_s0 + %s8358_s24]]   ;;  %s8359_s29 = smov 12  }
   0xf   :  { %7752 = vmatprep.subr.bf16.mxu0 %v8337_v0  ;;  %v7777_v34 = vpack.c.bf16 %v150_v33, %v149_v32  ;;  %v152_v36 = vld [vmem:[%s8385_s6 + $0xb8] sm:$0xff]  ;;  %v127_v38 = vld [vmem:[%s8393_s10] sm:$0xff]  ;;  %v336_v23 = vld [vmem:[%s8476_s26 + $0x8] sm:$0xff]  ;;  %s8349_s6 = smov 112   ;;  %s8353_s10 = smov 80  }
  0x10   :  { %v7780_v37 = vpack.c.bf16 %v152_v36, %v151_v35  ;;  %v228_v40 = vld [vmem:[%s6775_s14] sm:$0x1f]  ;;  %v338_v24 = vld [vmem:[%s8476_s26 + $0x18] sm:$0xff]  ;;  %v337_v27 = vld [vmem:[%s8476_s26 + $0x10] sm:$0xff]  ;;  %s8813_s3 = sld [smem:[%s9620_s0 + %s8359_s29]]   ;;  %s8360_s12 = smov 14  }
  0x11   :  { %v227_v42 = vld [vmem:[%s6774_s18] sm:$0x1]  ;;  %v231_v43 = vrot.slane %v228_v40, 1  ;;  %v234_v44 = vrot.slane %v228_v40, 5  ;;  %v340_v29 = vld [vmem:[%s8476_s26 + $0x28] sm:$0xff]  ;;  %v342_v30 = vld [vmem:[%s8476_s26 + $0x38] sm:$0xff]  ;;  %s8823_s16 = sld [smem:[%s9620_s0 + %s8360_s12]]  }
  0x12   :  { %7754 = vmatpush1.bf16.msra.mxu0 %v7753_v9  ;;  %v229_v45 = vadd.f32 %v228_v40, %v227_v42  ;;  %v255_v4 = vld [vmem:[%s6776_s22] sm:$0x3]  ;;  %v341_v33 = vld [vmem:[%s8476_s26 + $0x30] sm:$0xff]  ;;  %v344_v35 = vld [vmem:[%s8476_s26 + $0x48] sm:$0xff]  ;;  %s8362_s17 = smov 18   ;;  %s8363_s24 = smov 20  }
  0x13   :  { %7755 = vmatprep.subr.bf16.mxu0 %v8337_v0  ;;  %v8455_v6 = vrot.slane %v255_v4, %v8440_v46  ;;  %v8458_v9 = vrot.slane %v255_v4, %v8452_v5  ;;  %v335_v26 = vld [vmem:[%s8476_s26] sm:$0xff]  ;;  %v346_v36 = vld [vmem:[%s8476_s26 + $0x58] sm:$0xff]  ;;  %v345_v40 = vld [vmem:[%s8476_s26 + $0x50] sm:$0xff]  ;;  %s6789_s20 = sld [smem:[%s9620_s0 + %s8362_s17]]   ;;  %s8364_s29 = smov 15  }
  0x14   :  { %v244_v51 = vrot.slane %v229_v45, %v8440_v46  ;;  %v339_v32 = vld [vmem:[%s8476_s26 + $0x20] sm:$0xff]  ;;  %v348_v42 = vld [vmem:[%s8476_s26 + $0x68] sm:$0xff]  ;;  %s8365_s12 = smov 19   ;;  %s8367_s17 = smov 22  }
  0x15   :  { %s8368_s21 = smov 23   ;;  %s8369_s25 = smov 24  }
  0x16   :  { %7757 = vmatpush1.bf16.msra.mxu0 %v7756_v13  ;;  %s9317_s1 = sld [smem:[%s9620_s0 + %s8369_s25]]   ;;  %s8370_s2 = smov 26  }
  0x17   :  { %7758 = vmatprep.subr.bf16.mxu0 %v8337_v0  ;;  %s9344_s13 = sld [smem:[%s9620_s0 + %s8370_s2]]   ;;  %s8371_s14 = smov 25  }
  0x18   :  { %s8375_s22 = smov 30  }
  0x19   :  { %s6801_s25 = sld [smem:[%s9620_s0 + %s8375_s22]]  }
  0x1a   :  { %7760 = vmatpush1.bf16.msra.mxu0 %v7759_v16 }
  0x1b   :  { %7761 = vmatprep.subr.bf16.mxu0 %v8337_v0 }
  0x1e   :  { %7763 = vmatpush1.bf16.msra.mxu0 %v7762_v19 }
  0x1f   :  { %7764 = vmatprep.subr.bf16.mxu0 %v8337_v0 }
  0x22   :  { %7766 = vmatpush1.bf16.msra.mxu0 %v7765_v22 }
  0x23   :  { %7767 = vmatprep.subr.bf16.mxu0 %v8337_v0 }
  0x26   :  { %7769 = vmatpush1.bf16.msra.mxu0 %v7768_v25  ;;  %v7782_v25 = vpack.c.bf16 %v338_v24, %v336_v23 }
  0x27   :  { %7770 = vmatprep.subr.bf16.mxu0 %v8337_v0 }
  0x28   :  { %7783 = vmatprep.subr.bf16.mxu1 %v7782_v25 }
  0x2a   :  { %7772 = vmatpush1.bf16.msra.mxu0 %v7771_v28  ;;  %v7784_v28 = vpack.c.bf16 %v337_v27, %v335_v26 }
  0x2b   :  { %7773 = vmatprep.subr.bf16.mxu0 %v8337_v0 }
  0x2c   :  { %7785 = vmatpush1.bf16.msra.mxu1 %v7784_v28 }
  0x2e   :  { %7775 = vmatpush1.bf16.msra.mxu0 %v7774_v31  ;;  %v7786_v31 = vpack.c.bf16 %v342_v30, %v340_v29 }
  0x2f   :  { %7776 = vmatprep.subr.bf16.mxu0 %v8337_v0 }
  0x30   :  { %7787 = vmatprep.subr.bf16.mxu1 %v7786_v31 }
  0x32   :  { %7778 = vmatpush1.bf16.msra.mxu0 %v7777_v34  ;;  %v7788_v34 = vpack.c.bf16 %v341_v33, %v339_v32 }
  0x33   :  { %7779 = vmatprep.subr.bf16.mxu0 %v8337_v0 }
  0x34   :  { %7789 = vmatpush1.bf16.msra.mxu1 %v7788_v34 }
  0x36   :  { %7781 = vmatpush1.bf16.msra.mxu0 %v7780_v37  ;;  %v343_v37 = vld [vmem:[%s8476_s26 + $0x40] sm:$0xff] }
  0x39   :  { %222 = vmatmul.mubr.f32.vlgmr.msra.gmra.mrb[0].mxu0 %v127_v38  ;;  %v7790_v38 = vpack.c.bf16 %v346_v36, %v344_v35 }
  0x3b   :  { %7791 = vmatprep.subr.bf16.mxu1 %v7790_v38 }
 0x10c   :  { %v223_v47 = vpop.f32.mrb[0].mxu0 }
 0x10d   :  { %v233_v48 = vadd.f32 %v231_v43, %v223_v47  ;;  %v236_v49 = vadd.f32 %v234_v44, %v223_v47  ;;  %v225_v50 = vpop.f32.mrb[1].mxu0  ;;  %v350_v43 = vld [vmem:[%s8476_s26 + $0x78] sm:$0xff]  ;;  %v8344_v44 = vmov 0.0  }
 0x10e   :  { %433 = vmatprep.mubr.f32.mxu1 %v8344_v44  ;;  %7432 = vmatprep.subr.mxu0 %v8344_v44  ;;  %v7794_v47 = vpack.c.bf16 %v350_v43, %v348_v42 }
 0x10f   :  { %v238_v52 = vrot.slane %v233_v48, 7  ;;  %v247_v53 = vrot.slane %v236_v49, 6  ;;  %v347_v48 = vld [vmem:[%s8476_s26 + $0x60] sm:$0xff]  ;;  %v349_v49 = vld [vmem:[%s8476_s26 + $0x70] sm:$0xff]  ;;  %7434 = vmatprep.mubr.msk.f32.mxu0 %vm8347_vm5, %v8344_v44 }
 0x110   :  { %v7796_v50 = vpack.c.bf16 %v349_v49, %v347_v48 }
 0x111   :  { %v250_v54 = vsel %vm249_vm1, %v229_v45, %v238_v52  ;;  %v260_v63 = vsel %vm259_vm4, %v247_v53, 0.0  ;;  %v7792_v45 = vpack.c.bf16 %v345_v40, %v343_v37 }
 0x112   :  { %v252_v55 = vsel %vm251_vm2, %v250_v54, %v244_v51 }
 0x113   :  { %v254_v56 = vsel %vm253_vm3, %v252_v55, %v247_v53  ;;  %7793 = vmatpush1.bf16.msra.mxu1 %v7792_v45 }
 0x114   :  { %v256_v57 = vsel %vm153_vm0, %v254_v56, 0.0  ;;  %7795 = vmatprep.subr.bf16.mxu1 %v7794_v47 }
 0x115   :  { %257 = vadd.xlane.f32.xlu0 %v256_v57  ;;  %v8503_v57 = vld [vmem:[%s8500_s30] sm:$0xf] }
 0x117   :  { %7797 = vmatpush1.bf16.msra.mxu1 %v7796_v50 }
 0x118   :  { %7387 = vmatprep.subr.mxu1 %v8344_v44 }
 0x1a2   :  { %v258_v58 = vpop.xlane.xlu0 %257 }
 0x1a3   :  { %v264_v59 = vmul.f32 0.015625, %v258_v58  ;;  %v326_v58 = vrot.slane %v8503_v57, %v8440_v46 }
 0x1a5   :  { %v266_v60 = vsub.f32 %v254_v56, %v264_v59 }
 0x1a7   :  { %v268_v61 = vmul.f32 %v266_v60, %v266_v60 }
 0x1a9   :  { %v270_v62 = vsel %vm153_vm0, %v268_v61, 0.0  ;;  %v332_v61 = vrot.slane %v8503_v57, %v8452_v5 }
 0x1aa   :  { %271 = vadd.xlane.f32.xlu0 %v270_v62 }
 0x1ae   :  { %261 = vadd.xlane.f32.xlu0 %v260_v63 }
 0x237   :  { %v272_v1 = vpop.xlane.xlu0 %271 }
 0x238   :  { %v276_v2 = vmul.f32 0.015625, %v272_v1 }
 0x23a   :  { %v278_v3 = vadd.f32 1e-05, %v276_v2 }
 0x23b   :  { %v262_v13 = vpop.xlane.xlu0 %261 }
 0x23c   :  { %8157 = vrsqrt.f32 %v278_v3  ;;  %v265_v14 = vmul.f32 0.015625, %v262_v13 }
 0x23e   :  { %v8466_v17 = vsub.f32 %v247_v53, %v265_v14 }
 0x240   :  { %v269_v21 = vmul.f32 %v8466_v17, %v8466_v17 }
 0x242   :  { %v273_v22 = vsel %vm259_vm4, %v269_v21, 0.0 }
 0x246   :  { %v8158_v7 = vpop.eup %8157 }
 0x247   :  { %v282_v8 = vmul.f32 %v8158_v7, %v266_v60 }
 0x249   :  { %v288_v10 = vmul.f32 %v8455_v6, %v282_v8 }
 0x24b   :  { %v8462_v11 = vadd.f32 %v8458_v9, %v288_v10 }
 0x24d   :  { %v297_v12 = vsel %vm153_vm0, %v8462_v11, 0.0 }
 0x24e   :  { %298 = vadd.xlane.f32.xlu1 %v297_v12 }
 0x2db   :  { %v299_v15 = vpop.xlane.xlu1 %298 }
 0x2dc   :  { %v303_v16 = vmul.f32 0.015625, %v299_v15 }
 0x2de   :  { %v305_v18 = vsub.f32 %v8462_v11, %v303_v16 }
 0x2e0   :  { %v307_v19 = vmul.f32 %v305_v18, %v305_v18 }
 0x2e2   :  { %v309_v20 = vsel %vm153_vm0, %v307_v19, 0.0 }
 0x2e3   :  { %310 = vadd.xlane.f32.xlu1 %v309_v20 }
 0x2e7   :  { %274 = vadd.xlane.f32.xlu1 %v273_v22 }
 0x370   :  { %v311_v51 = vpop.xlane.xlu1 %310 }
 0x371   :  { %v315_v52 = vmul.f32 0.015625, %v311_v51 }
 0x373   :  { %v317_v53 = vadd.f32 1e-05, %v315_v52 }
 0x374   :  { %v275_v54 = vpop.xlane.xlu1 %274 }
 0x375   :  { %8159 = vrsqrt.f32 %v317_v53  ;;  %v277_v55 = vmul.f32 0.015625, %v275_v54 }
 0x377   :  { %v279_v56 = vadd.f32 1e-05, %v277_v55 }
 0x379   :  { %8161 = vrsqrt.f32 %v279_v56 }
 0x37f   :  { %v8160_v59 = vpop.eup %8159 }
 0x380   :  { %v321_v60 = vmul.f32 %v8160_v59, %v305_v18 }
 0x382   :  { %v327_v62 = vmul.f32 %v326_v58, %v321_v60 }
 0x383   :  { %v8162_v63 = vpop.eup %8161 }
 0x384   :  { %v333_v1 = vadd.f32 %v332_v61, %v327_v62  ;;  %v283_v2 = vmul.f32 %v8162_v63, %v8466_v17 }
 0x386   :  { %6803 = vmatmul.mubr.msk.f32.vlgmr.msra.gmra.mrb[0].mxu1 %vm153_vm0, %v333_v1  ;;  %v289_v3 = vmul.f32 %v8455_v6, %v283_v2  ;;  %v351_v6 = vld [vmem:[%s8523_s4] sm:$0x3] }
 0x387   :  { %439 = vmatprep.mubr.f32.mxu1 %v8344_v44  ;;  %v360_v25 = vrot.slane %v351_v6, %v8452_v5 }
 0x388   :  { %v8514_v4 = vadd.f32 %v8458_v9, %v289_v3  ;;  %v8529_v9 = vrot.slane %v351_v6, %v8440_v46 }
 0x38a   :  { %v300_v7 = vsel %vm259_vm4, %v8514_v4, 0.0 }
 0x38b   :  { %301 = vadd.xlane.f32.xlu0 %v300_v7 }
 0x418   :  { %v302_v8 = vpop.xlane.xlu0 %301 }
 0x419   :  { %v304_v10 = vmul.f32 0.015625, %v302_v8 }
 0x41b   :  { %v306_v12 = vsub.f32 %v8514_v4, %v304_v10 }
 0x41d   :  { %v308_v13 = vmul.f32 %v306_v12, %v306_v12 }
 0x41f   :  { %v312_v14 = vsel %vm259_vm4, %v308_v13, 0.0 }
 0x420   :  { %313 = vadd.xlane.f32.xlu1 %v312_v14 }
 0x459   :  { %v435_v15 = vpop.f32.mrb[0].mxu1 }
 0x45a   :  { %v8532_v16 = vadd.f32 %v435_v15, %v8529_v9  ;;  %v437_v17 = vpop.f32.mrb[1].mxu1 }
 0x45b   :  { %v8544_v27 = vadd.f32 %v437_v17, %v360_v25 }
 0x45c   :  { %447 = vrot.lane.b32.xlu0 %v8532_v16, %s8348_s5 }
 0x45d   :  { %v1226_v31 = vrot.slane %v8544_v27, 5 }
 0x460   :  { %614 = vrot.lane.b32.xlu0 %v8532_v16, %s8349_s6 }
 0x4ad   :  { %v314_v18 = vpop.xlane.xlu1 %313 }
 0x4ae   :  { %v316_v19 = vmul.f32 0.015625, %v314_v18 }
 0x4b0   :  { %v318_v20 = vadd.f32 1e-05, %v316_v19 }
 0x4b2   :  { %8163 = vrsqrt.f32 %v318_v20 }
 0x4bc   :  { %v8164_v21 = vpop.eup %8163 }
 0x4bd   :  { %v322_v22 = vmul.f32 %v8164_v21, %v306_v12 }
 0x4bf   :  { %v328_v23 = vmul.f32 %v326_v58, %v322_v22 }
 0x4c1   :  { %v334_v24 = vadd.f32 %v332_v61, %v328_v23 }
 0x4c3   :  { %6804 = vmatmul.mubr.msk.f32.gmra.mrb[2].mxu1 %vm153_vm0, %v334_v24 }
 0x4c4   :  { %7389 = vmatprep.mubr.msk.f32.mxu1 %vm8347_vm5, %v8344_v44 }
 0x4ce   :  { %v448_v26 = vpop.permute.xlu0 %447 }
 0x4cf   :  { %7388 = vmatpush3.xpose.msk.msra.mxu1 %vm449_vm6, %v448_v26 }
 0x4d0   :  { %7392 = vmatprep.subr.mxu1 %v8344_v44 }
 0x4d2   :  { %7390 = vmatmul.mubr.msk.f32.vlgmr.msra.gmra.mrb[4].mxu1 %vm449_vm6, %v8532_v16  ;;  %v615_v51 = vpop.permute.xlu0 %614 }
 0x4d3   :  { %7393 = vmatpush3.msk.msra.mxu1 %vm251_vm2, %v8544_v27  ;;  %7394 = vmatprep.mubr.msk.f32.mxu1 %vm8347_vm5, %v8344_v44 }
 0x4d4   :  { %7397 = vmatprep.subr.mxu1 %v8344_v44 }
 0x596   :  { %v8553_v28 = vpop.f32.mrb[2].mxu1 }
 0x597   :  { %v443_v29 = vpop.f32.mrb[3].mxu1 }
 0x598   :  { %v444_v30 = vadd.f32 %v443_v29, %v360_v25 }
 0x59a   :  { %v1227_v32 = vrot.slane %v444_v30, 5 }
 0x59c   :  { %v8557_v33 = vsel %vm1133_vm7, %v1226_v31, %v1227_v32 }
 0x59d   :  { %7433 = vmatpush3.msk.msra.mxu0 %vm251_vm2, %v8557_v33 }
 0x59e   :  { %7442 = vmatprep.subr.mxu0 %v8344_v44 }
 0x5a5   :  { %v520_v34 = vpop.f32.mrb[4].mxu1 }
 0x5a6   :  { %v524_v35 = vmul.f32 0.25, %v520_v34  ;;  %v7391_v36 = vpop.f32.mrb[5].mxu1 }
 0x5a8   :  { %v526_v37 = vsel %vm525_vm8, %v524_v35, -inf }
 0x5a9   :  { %527 = vmax.xlane.f32.xlu1 %v526_v37 }
 0x636   :  { %v528_v38 = vpop.xlane.xlu1 %527 }
 0x637   :  { %v529_v40 = vsub.f32 %v524_v35, %v528_v38  ;;  %v442_v38 = vadd.f32 %v8553_v28, %v8529_v9 }
 0x639   :  { %v530_v42 = vmul.f32 1.442695, %v529_v40  ;;  %v1135_v40 = vrot.slane %v442_v38, 5 }
 0x63b   :  { %8165 = vpow2.f32 %v530_v42  ;;  %v1134_v42 = vrot.slane %v8532_v16, 5 }
 0x645   :  { %v8166_v43 = vpop.eup %8165 }
 0x646   :  { %v532_v45 = vsel %vm525_vm8, %v8166_v43, 0.0 }
 0x647   :  { %533 = vadd.xlane.f32.xlu1 %v532_v45 }
 0x658   :  { %616 = vrot.lane.b32.xlu1 %v8532_v16, %s8350_s7 }
 0x6d4   :  { %v534_v47 = vpop.xlane.xlu1 %533 }
 0x6d5   :  { %8167 = vrcp.f32 %v534_v47 }
 0x6d8   :  { %v617_v50 = vpop.permute.xlu1 %616 }
 0x6df   :  { %v8168_v48 = vpop.eup %8167 }
 0x6e0   :  { %v536_v49 = vmul.f32 %v8168_v48, %v8166_v43  ;;  %v1136_v43 = vsel %vm1133_vm7, %v1134_v42, %v1135_v40 }
 0x6e2   :  { %7395 = vmatmul.mubr.msk.f32.vlgmr.msra.gmra.mrb[6].mxu1 %vm537_vm9, %v536_v49 }
 0x6e3   :  { %7398 = vmatpush3.xpose.msk.msra.mxu1 %vm449_vm6, %v617_v50  ;;  %7399 = vmatprep.mubr.msk.f32.mxu1 %vm8347_vm5, %v8344_v44 }
 0x6e4   :  { %7402 = vmatprep.subr.mxu1 %v8344_v44 }
 0x6e6   :  { %7400 = vmatmul.mubr.msk.f32.vlgmr.msra.gmra.mrb[8].mxu1 %vm449_vm6, %v615_v51 }
 0x6e7   :  { %7404 = vmatprep.mubr.msk.f32.mxu1 %vm8347_vm5, %v8344_v44 }
 0x7b5   :  { %v8574_v52 = vpop.f32.mrb[6].mxu1 }
 0x7b6   :  { %v7396_v53 = vpop.f32.mrb[7].mxu1 }
 0x7b9   :  { %v688_v54 = vpop.f32.mrb[8].mxu1 }
 0x7ba   :  { %v692_v55 = vmul.f32 0.25, %v688_v54  ;;  %v7401_v56 = vpop.f32.mrb[9].mxu1 }
 0x7bc   :  { %v693_v58 = vsel %vm525_vm8, %v692_v55, -inf }
 0x7bd   :  { %694 = vmax.xlane.f32.xlu1 %v693_v58 }
 0x7ce   :  { %783 = vrot.lane.b32.xlu1 %v8532_v16, %s8351_s8 }
 0x7d2   :  { %781 = vrot.lane.b32.xlu1 %v8532_v16, %s8352_s9 }
 0x84a   :  { %v695_v59 = vpop.xlane.xlu1 %694 }
 0x84b   :  { %v696_v60 = vsub.f32 %v692_v55, %v695_v59 }
 0x84d   :  { %v697_v61 = vmul.f32 1.442695, %v696_v60 }
 0x84e   :  { %v784_v7 = vpop.permute.xlu1 %783 }
 0x84f   :  { %8169 = vpow2.f32 %v697_v61 }
 0x852   :  { %v782_v10 = vpop.permute.xlu1 %781 }
 0x859   :  { %v8170_v62 = vpop.eup %8169 }
 0x85a   :  { %v699_v63 = vsel %vm525_vm8, %v8170_v62, 0.0 }
 0x85b   :  { %700 = vadd.xlane.f32.xlu0 %v699_v63 }
 0x871   :  { %704 = vrot.lane.b32.xlu0 %v8544_v27, %s8349_s6 }
 0x8e8   :  { %v701_v1 = vpop.xlane.xlu0 %700 }
 0x8e9   :  { %8171 = vrcp.f32 %v701_v1 }
 0x8ec   :  { %v705_v2 = vpop.permute.xlu0 %704 }
 0x8ed   :  { %7403 = vmatpush3.msk.msra.mxu1 %vm251_vm2, %v705_v2 }
 0x8ee   :  { %7407 = vmatprep.subr.mxu1 %v8344_v44 }
 0x8f3   :  { %v8172_v3 = vpop.eup %8171 }
 0x8f4   :  { %v703_v8 = vmul.f32 %v8172_v3, %v8170_v62 }
 0x8f6   :  { %7405 = vmatmul.mubr.msk.f32.vlgmr.msra.gmra.mrb[10].mxu1 %vm537_vm9, %v703_v8 }
 0x8f7   :  { %7408 = vmatpush3.xpose.msk.msra.mxu1 %vm449_vm6, %v784_v7  ;;  %7409 = vmatprep.mubr.msk.f32.mxu1 %vm8347_vm5, %v8344_v44 }
 0x8f8   :  { %7412 = vmatprep.subr.mxu1 %v8344_v44 }
 0x8fa   :  { %7410 = vmatmul.mubr.msk.f32.vlgmr.msra.gmra.mrb[12].mxu1 %vm449_vm6, %v782_v10 }
 0x8fb   :  { %7414 = vmatprep.mubr.msk.f32.mxu1 %vm8347_vm5, %v8344_v44 }
 0x9c9   :  { %v8594_v12 = vpop.f32.mrb[10].mxu1 }
 0x9ca   :  { %v7406_v13 = vpop.f32.mrb[11].mxu1 }
 0x9cd   :  { %v855_v14 = vpop.f32.mrb[12].mxu1 }
 0x9ce   :  { %v859_v6 = vmul.f32 0.25, %v855_v14  ;;  %v7411_v15 = vpop.f32.mrb[13].mxu1 }
 0x9d0   :  { %v860_v17 = vsel %vm525_vm8, %v859_v6, -inf }
 0x9d1   :  { %861 = vmax.xlane.f32.xlu0 %v860_v17 }
 0x9e7   :  { %871 = vrot.lane.b32.xlu0 %v8544_v27, %s8352_s9 }
 0x9eb   :  { %948 = vrot.lane.b32.xlu0 %v8532_v16, %s8353_s10 }
 0xa5e   :  { %v862_v18 = vpop.xlane.xlu0 %861 }
 0xa5f   :  { %v863_v19 = vsub.f32 %v859_v6, %v862_v18 }
 0xa61   :  { %v864_v20 = vmul.f32 1.442695, %v863_v19 }
 0xa62   :  { %v872_v21 = vpop.permute.xlu0 %871 }
 0xa63   :  { %8173 = vpow2.f32 %v864_v20  ;;  %7413 = vmatpush3.msk.msra.mxu1 %vm251_vm2, %v872_v21 }
 0xa64   :  { %7417 = vmatprep.subr.mxu1 %v8344_v44 }
 0xa66   :  { %v949_v30 = vpop.permute.xlu0 %948 }
 0xa6d   :  { %v8174_v22 = vpop.eup %8173 }
 0xa6e   :  { %v866_v23 = vsel %vm525_vm8, %v8174_v22, 0.0 }
 0xa6f   :  { %867 = vadd.xlane.f32.xlu1 %v866_v23 }
 0xa80   :  { %950 = vrot.lane.b32.xlu1 %v8532_v16, %s8354_s11 }
 0xafc   :  { %v868_v24 = vpop.xlane.xlu1 %867 }
 0xafd   :  { %8175 = vrcp.f32 %v868_v24 }
 0xb00   :  { %v951_v29 = vpop.permute.xlu1 %950 }
 0xb07   :  { %v8176_v25 = vpop.eup %8175 }
 0xb08   :  { %v870_v26 = vmul.f32 %v8176_v25, %v8174_v22 }
 0xb0a   :  { %7415 = vmatmul.mubr.msk.f32.vlgmr.msra.gmra.mrb[14].mxu1 %vm537_vm9, %v870_v26 }
 0xb0b   :  { %7418 = vmatpush3.xpose.msk.msra.mxu1 %vm449_vm6, %v951_v29  ;;  %7419 = vmatprep.mubr.msk.f32.mxu1 %vm8347_vm5, %v8344_v44 }
 0xb0c   :  { %7422 = vmatprep.subr.mxu1 %v8344_v44 }
 0xb0e   :  { %7420 = vmatmul.mubr.msk.f32.vlgmr.msra.gmra.mrb[16].mxu1 %vm449_vm6, %v949_v30 }
 0xb0f   :  { %7424 = vmatprep.mubr.msk.f32.mxu1 %vm8347_vm5, %v8344_v44 }
 0xbdd   :  { %v8614_v31 = vpop.f32.mrb[14].mxu1 }
 0xbde   :  { %v7416_v32 = vpop.f32.mrb[15].mxu1 }
 0xbe1   :  { %v1022_v34 = vpop.f32.mrb[16].mxu1 }
 0xbe2   :  { %v1026_v35 = vmul.f32 0.25, %v1022_v34  ;;  %v7421_v36 = vpop.f32.mrb[17].mxu1 }
 0xbe4   :  { %v1027_v37 = vsel %vm525_vm8, %v1026_v35, -inf }
 0xbe5   :  { %1028 = vmax.xlane.f32.xlu1 %v1027_v37 }
 0xbf6   :  { %1137 = vrot.lane.b32.xlu1 %v1136_v43, %s8348_s5 }
 0xbfa   :  { %1306 = vrot.lane.b32.xlu1 %v1136_v43, %s8350_s7 }
 0xbfe   :  { %1473 = vrot.lane.b32.xlu1 %v1136_v43, %s8351_s8 }
 0xc02   :  { %1640 = vrot.lane.b32.xlu1 %v1136_v43, %s8354_s11 }
 0xc72   :  { %v1029_v45 = vpop.xlane.xlu1 %1028 }
 0xc73   :  { %v1030_v47 = vsub.f32 %v1026_v35, %v1029_v45 }
 0xc75   :  { %v1031_v48 = vmul.f32 1.442695, %v1030_v47 }
 0xc76   :  { %v1138_v50 = vpop.permute.xlu1 %1137 }
 0xc77   :  { %8177 = vpow2.f32 %v1031_v48 }
 0xc7a   :  { %v1307_v54 = vpop.permute.xlu1 %1306 }
 0xc7e   :  { %v1474_v55 = vpop.permute.xlu1 %1473 }
 0xc81   :  { %v8178_v49 = vpop.eup %8177 }
 0xc82   :  { %v1033_v9 = vsel %vm525_vm8, %v8178_v49, 0.0  ;;  %v1641_v58 = vpop.permute.xlu1 %1640 }
 0xc83   :  { %1034 = vadd.xlane.f32.xlu0 %v1033_v9 }
 0xc99   :  { %1038 = vrot.lane.b32.xlu0 %v8544_v27, %s8353_s10 }
 0xc9d   :  { %1304 = vrot.lane.b32.xlu0 %v1136_v43, %s8349_s6 }
 0xca1   :  { %1471 = vrot.lane.b32.xlu0 %v1136_v43, %s8352_s9 }
 0xca5   :  { %1638 = vrot.lane.b32.xlu0 %v1136_v43, %s8353_s10 }
 0xd10   :  { %v1035_v16 = vpop.xlane.xlu0 %1034 }
 0xd11   :  { %8179 = vrcp.f32 %v1035_v16 }
 0xd14   :  { %v1039_v28 = vpop.permute.xlu0 %1038 }
 0xd15   :  { %7423 = vmatpush3.msk.msra.mxu1 %vm251_vm2, %v1039_v28 }
 0xd16   :  { %7427 = vmatprep.subr.mxu1 %v8344_v44 }
 0xd18   :  { %v1305_v27 = vpop.permute.xlu0 %1304 }
 0xd1b   :  { %v8180_v51 = vpop.eup %8179 }
 0xd1c   :  { %v1037_v53 = vmul.f32 %v8180_v51, %v8178_v49  ;;  %v1472_v56 = vpop.permute.xlu0 %1471 }
 0xd1e   :  { %7425 = vmatmul.mubr.msk.f32.vlgmr.msra.gmra.mrb[18].mxu1 %vm537_vm9, %v1037_v53 }
 0xd1f   :  { %7428 = vmatpush3.xpose.msk.msra.mxu1 %vm449_vm6, %v1138_v50  ;;  %7429 = vmatprep.mubr.msk.f32.mxu1 %vm8347_vm5, %v8344_v44 }
 0xd20   :  { %7437 = vmatprep.subr.mxu1 %v8344_v44  ;;  %v1639_v59 = vpop.permute.xlu0 %1638 }
 0xd22   :  { %7430 = vmatmul.mubr.msk.f32.vlgmr.msra.gmra.mrb[20].mxu1 %vm449_vm6, %v1136_v43 }
 0xd23   :  { %7438 = vmatpush3.xpose.msk.msra.mxu1 %vm449_vm6, %v1307_v54  ;;  %7439 = vmatprep.mubr.msk.f32.mxu1 %vm8347_vm5, %v8344_v44 }
 0xd24   :  { %7447 = vmatprep.subr.mxu1 %v8344_v44 }
 0xd26   :  { %7440 = vmatmul.mubr.msk.f32.vlgmr.msra.gmra.mrb[22].mxu1 %vm449_vm6, %v1305_v27 }
 0xd27   :  { %7448 = vmatpush3.xpose.msk.msra.mxu1 %vm449_vm6, %v1474_v55  ;;  %7449 = vmatprep.mubr.msk.f32.mxu1 %vm8347_vm5, %v8344_v44 }
 0xd28   :  { %7457 = vmatprep.subr.mxu1 %v8344_v44 }
 0xd2a   :  { %7450 = vmatmul.mubr.msk.f32.vlgmr.msra.gmra.mrb[24].mxu1 %vm449_vm6, %v1472_v56 }
 0xd2b   :  { %7458 = vmatpush3.xpose.msk.msra.mxu1 %vm449_vm6, %v1641_v58  ;;  %7459 = vmatprep.mubr.msk.f32.mxu1 %vm8347_vm5, %v8344_v44 }
 0xd2e   :  { %7460 = vmatmul.mubr.msk.f32.vlgmr.msra.gmra.mrb[26].mxu1 %vm449_vm6, %v1639_v59  ;;  %v1824_v59 = vld [vmem:[%s8692_s15] sm:$0xff] }
 0xdf1   :  { %v8653_v60 = vpop.f32.mrb[18].mxu1 }
 0xdf2   :  { %v7426_v61 = vpop.f32.mrb[19].mxu1 }
 0xdf3   :  { %v1825_v61 = vld [vmem:[%s8692_s15 + $0x8] sm:$0xff] }
 0xdf5   :  { %v1209_v62 = vpop.f32.mrb[20].mxu1 }
 0xdf6   :  { %v1213_v63 = vmul.f32 0.25, %v1209_v62  ;;  %v7431_v1 = vpop.f32.mrb[21].mxu1  ;;  %v7798_v62 = vpack.c.bf16 %v1825_v61, %v1824_v59  ;;  %v1961_v59 = vld [vmem:[%s8740_s23 + $0x10] sm:$0xff] }
 0xdf7   :  { %v1827_v1 = vld [vmem:[%s8692_s15 + $0x18] sm:$0xff] }
 0xdf8   :  { %v1214_v2 = vsel %vm525_vm8, %v1213_v63, -inf  ;;  %7799 = vmatprep.subr.bf16.mxu1 %v7798_v62 }
 0xdf9   :  { %1215 = vmax.xlane.f32.xlu1 %v1214_v2  ;;  %v1378_v3 = vpop.f32.mrb[22].mxu1  ;;  %7801 = vmatpush3.bf16.msra.mxu1 %v7798_v62  ;;  %v1964_v62 = vld [vmem:[%s8740_s23 + $0x28] sm:$0xff] }
 0xdfa   :  { %v1382_v7 = vmul.f32 0.25, %v1378_v3  ;;  %v7441_v8 = vpop.f32.mrb[23].mxu1  ;;  %v1828_v3 = vld [vmem:[%s8692_s15 + $0x20] sm:$0xff] }
 0xdfc   :  { %v1383_v10 = vsel %vm525_vm8, %v1382_v7, -inf }
 0xdfd   :  { %1384 = vmax.xlane.f32.xlu0 %v1383_v10  ;;  %v1545_v13 = vpop.f32.mrb[24].mxu1 }
 0xdfe   :  { %v1549_v14 = vmul.f32 0.25, %v1545_v13  ;;  %v7451_v6 = vpop.f32.mrb[25].mxu1 }
 0xdff   :  { %v1831_v6 = vld [vmem:[%s8692_s15 + $0x38] sm:$0xff] }
 0xe00   :  { %v1550_v15 = vsel %vm525_vm8, %v1549_v14, -inf }
 0xe01   :  { %1551 = vmax.xlane.f32.xlu0 %v1550_v15  ;;  %v1712_v17 = vpop.f32.mrb[26].mxu1 }
 0xe02   :  { %v1716_v18 = vmul.f32 0.25, %v1712_v17  ;;  %v7461_v19 = vpop.f32.mrb[27].mxu1 }
 0xe04   :  { %v1717_v20 = vsel %vm525_vm8, %v1716_v18, -inf }
 0xe05   :  { %1718 = vmax.xlane.f32.xlu0 %v1717_v20 }
 0xe0a   :  { %1394 = vrot.lane.b32.xlu1 %v8557_v33, %s8349_s6 }
 0xe86   :  { %v1216_v21 = vpop.xlane.xlu1 %1215 }
 0xe87   :  { %v1217_v22 = vsub.f32 %v1213_v63, %v1216_v21  ;;  %v1826_v63 = vld [vmem:[%s8692_s15 + $0x10] sm:$0xff] }
 0xe88   :  { %v7802_v2 = vpack.c.bf16 %v1827_v1, %v1826_v63  ;;  %v1966_v63 = vld [vmem:[%s8740_s23 + $0x38] sm:$0xff] }
 0xe89   :  { %v1218_v23 = vmul.f32 1.442695, %v1217_v22  ;;  %v7818_v1 = vpack.c.bf16 %v1966_v63, %v1964_v62  ;;  %v2108_v63 = vld [vmem:[%s8775_s28 + $0x30] sm:$0xff] }
 0xe8a   :  { %v1385_v24 = vpop.xlane.xlu0 %1384  ;;  %v1395_v49 = vpop.permute.xlu1 %1394  ;;  %7803 = vmatprep.subr.bf16.mxu1 %v7802_v2 }
 0xe8b   :  { %8181 = vpow2.f32 %v1218_v23  ;;  %v1386_v25 = vsub.f32 %v1382_v7, %v1385_v24  ;;  %7805 = vmatpush3.bf16.msra.mxu1 %v7802_v2  ;;  %v1829_v7 = vld [vmem:[%s8692_s15 + $0x28] sm:$0xff]  ;;  %v1963_v2 = vld [vmem:[%s8740_s23 + $0x20] sm:$0xff] }
 0xe8c   :  { %v7806_v8 = vpack.c.bf16 %v1829_v7, %v1828_v3  ;;  %v1965_v3 = vld [vmem:[%s8740_s23 + $0x30] sm:$0xff] }
 0xe8d   :  { %v1387_v26 = vmul.f32 1.442695, %v1386_v25  ;;  %v7820_v7 = vpack.c.bf16 %v1965_v3, %v1963_v2  ;;  %v2126_v3 = vld [vmem:[%s8775_s28 + $0xc0] sm:$0xff] }
 0xe8e   :  { %v1552_v29 = vpop.xlane.xlu0 %1551  ;;  %7807 = vmatprep.subr.bf16.mxu1 %v7806_v8 }
 0xe8f   :  { %8183 = vpow2.f32 %v1387_v26  ;;  %v1553_v30 = vsub.f32 %v1549_v14, %v1552_v29  ;;  %7809 = vmatpush3.bf16.msra.mxu1 %v7806_v8  ;;  %v1830_v14 = vld [vmem:[%s8692_s15 + $0x30] sm:$0xff]  ;;  %v1968_v8 = vld [vmem:[%s8740_s23 + $0x48] sm:$0xff] }
 0xe90   :  { %v7810_v15 = vpack.c.bf16 %v1831_v6, %v1830_v14  ;;  %v1967_v14 = vld [vmem:[%s8740_s23 + $0x40] sm:$0xff]  ;;  %v1969_v6 = vld [vmem:[%s8740_s23 + $0x50] sm:$0xff] }
 0xe91   :  { %v1554_v32 = vmul.f32 1.442695, %v1553_v30 }
 0xe92   :  { %v1719_v34 = vpop.xlane.xlu0 %1718  ;;  %7811 = vmatprep.subr.bf16.mxu1 %v7810_v15 }
 0xe93   :  { %8185 = vpow2.f32 %v1554_v32  ;;  %v1720_v35 = vsub.f32 %v1716_v18, %v1719_v34  ;;  %7813 = vmatpush3.bf16.msra.mxu1 %v7810_v15  ;;  %v7824_v15 = vpack.c.bf16 %v1969_v6, %v1967_v14  ;;  %v2128_v6 = vld [vmem:[%s8775_s28 + $0xd0] sm:$0xff] }
 0xe95   :  { %v8182_v36 = vpop.eup %8181  ;;  %v1721_v37 = vmul.f32 1.442695, %v1720_v35 }
 0xe96   :  { %v1220_v38 = vsel %vm525_vm8, %v8182_v36, 0.0 }
 0xe97   :  { %8187 = vpow2.f32 %v1721_v37  ;;  %1221 = vadd.xlane.f32.xlu1 %v1220_v38 }
 0xe99   :  { %v8184_v40 = vpop.eup %8183 }
 0xe9a   :  { %v1389_v42 = vsel %vm525_vm8, %v8184_v40, 0.0 }
 0xe9b   :  { %1390 = vadd.xlane.f32.xlu0 %v1389_v42 }
 0xe9d   :  { %v8186_v43 = vpop.eup %8185 }
 0xe9e   :  { %v1556_v45 = vsel %vm525_vm8, %v8186_v43, 0.0 }
 0xe9f   :  { %1557 = vadd.xlane.f32.xlu1 %v1556_v45 }
 0xea1   :  { %v8188_v47 = vpop.eup %8187 }
 0xea2   :  { %v1723_v48 = vsel %vm525_vm8, %v8188_v47, 0.0 }
 0xea3   :  { %1724 = vadd.xlane.f32.xlu0 %v1723_v48 }
 0xeb0   :  { %1728 = vrot.lane.b32.xlu1 %v8557_v33, %s8353_s10 }
 0xeb9   :  { %1561 = vrot.lane.b32.xlu0 %v8557_v33, %s8352_s9 }
 0xebd   :  { %1116 = vrot.lane.b32.xlu0 %v8594_v12, %s8354_s11 }
 0xec1   :  { %1120 = vrot.lane.b32.xlu0 %v8614_v31, %s8351_s8 }
 0xf24   :  { %v1222_v9 = vpop.xlane.xlu1 %1221 }
 0xf25   :  { %8189 = vrcp.f32 %v1222_v9 }
 0xf28   :  { %v1391_v16 = vpop.xlane.xlu0 %1390 }
 0xf29   :  { %8191 = vrcp.f32 %v1391_v16 }
 0xf2c   :  { %v1558_v28 = vpop.xlane.xlu1 %1557 }
 0xf2d   :  { %8193 = vrcp.f32 %v1558_v28 }
 0xf2f   :  { %v8190_v50 = vpop.eup %8189 }
 0xf30   :  { %v1725_v51 = vpop.xlane.xlu0 %1724  ;;  %v1224_v53 = vmul.f32 %v8190_v50, %v8182_v36  ;;  %v1729_v55 = vpop.permute.xlu1 %1728 }
 0xf31   :  { %8195 = vrcp.f32 %v1725_v51 }
 0xf32   :  { %7435 = vmatmul.mubr.msk.f32.vlgmr.msra.gmra.mrb[2].mxu0 %vm537_vm9, %v1224_v53 }
 0xf33   :  { %v8192_v33 = vpop.eup %8191  ;;  %7443 = vmatpush3.msk.msra.mxu0 %vm251_vm2, %v1395_v49  ;;  %7444 = vmatprep.mubr.msk.f32.mxu0 %vm8347_vm5, %v8344_v44 }
 0xf34   :  { %v1562_v12 = vpop.permute.xlu0 %1561  ;;  %7452 = vmatprep.subr.mxu0 %v8344_v44  ;;  %v1393_v31 = vmul.f32 %v8192_v33, %v8184_v40 }
 0xf36   :  { %7445 = vmatmul.mubr.msk.f32.vlgmr.msra.gmra.mrb[4].mxu0 %vm537_vm9, %v1393_v31 }
 0xf37   :  { %v8194_v54 = vpop.eup %8193  ;;  %7453 = vmatpush3.msk.msra.mxu0 %vm251_vm2, %v1562_v12  ;;  %7454 = vmatprep.mubr.msk.f32.mxu0 %vm8347_vm5, %v8344_v44 }
 0xf38   :  { %7462 = vmatprep.subr.mxu0 %v8344_v44  ;;  %v1560_v27 = vmul.f32 %v8194_v54, %v8186_v43  ;;  %v1117_v24 = vpop.permute.xlu0 %1116 }
 0xf39   :  { %v1127_v35 = vsel %vm449_vm6, %v8574_v52, %v1117_v24  ;;  %v6837_v52 = vld [vmem:[%s8720_s19] ss:$0 sm:$0xff] }
 0xf3a   :  { %7455 = vmatmul.mubr.msk.f32.vlgmr.msra.gmra.mrb[6].mxu0 %vm537_vm9, %v1560_v27  ;;  %v1960_v27 = vld [vmem:[%s8740_s23 + $0x8] sm:$0xff] }
 0xf3b   :  { %v8196_v56 = vpop.eup %8195  ;;  %7463 = vmatpush3.msk.msra.mxu0 %vm251_vm2, %v1729_v55  ;;  %7464 = vmatprep.mubr.msk.f32.mxu0 %vm8347_vm5, %v8344_v44  ;;  %v1962_v55 = vld [vmem:[%s8740_s23 + $0x18] sm:$0xff] }
 0xf3c   :  { %v1727_v58 = vmul.f32 %v8196_v56, %v8188_v47  ;;  %v1121_v32 = vpop.permute.xlu0 %1120  ;;  %v7814_v56 = vpack.c.bf16 %v1962_v55, %v1960_v27  ;;  %v2106_v55 = vld [vmem:[%s8775_s28 + $0x20] sm:$0xff] }
 0xf3d   :  { %v1129_v36 = vsel %vm1128_vm11, %v1127_v35, %v1121_v32  ;;  %v8759_v32 = vsub.s32 2, %v8437_v41 }
 0xf3e   :  { %7465 = vmatmul.mubr.msk.f32.vlgmr.msra.gmra.mrb[8].mxu0 %vm537_vm9, %v1727_v58  ;;  %v1959_v58 = vld [vmem:[%s8740_s23] sm:$0xff]  ;;  %7815 = vmatprep.subr.bf16.mxu0 %v7814_v56  ;;  %v2107_v56 = vld [vmem:[%s8775_s28 + $0x28] sm:$0xff] }
 0xf3f   :  { %2057 = vmatprep.mubr.f32.mxu0 %v8344_v44  ;;  %v7816_v61 = vpack.c.bf16 %v1961_v59, %v1959_v58  ;;  %v1950_v35 = vrot.slane %v8503_v57, %v8759_v32  ;;  %v7840_v58 = vpack.c.bf16 %v2107_v56, %v2106_v55  ;;  %v2124_v59 = vld [vmem:[%s8775_s28 + $0xb0] sm:$0xff] }
 0xf41   :  { %7817 = vmatpush1.bf16.msra.mxu0 %v7816_v61  ;;  %v2125_v61 = vld [vmem:[%s8775_s28 + $0xb8] sm:$0xff] }
 0xf42   :  { %7819 = vmatprep.subr.bf16.mxu0 %v7818_v1  ;;  %v7842_v62 = vpack.c.bf16 %v2125_v61, %v2124_v59  ;;  %v2109_v1 = vld [vmem:[%s8775_s28 + $0x38] sm:$0xff] }
 0xf43   :  { %v7844_v2 = vpack.c.bf16 %v2109_v1, %v2108_v63 }
 0xf45   :  { %7821 = vmatpush1.bf16.msra.mxu0 %v7820_v7  ;;  %v2127_v7 = vld [vmem:[%s8775_s28 + $0xc8] sm:$0xff] }
0x1005   :  { %v1300_v10 = vpop.f32.mrb[2].mxu0 }
0x1006   :  { %v7436_v13 = vpop.f32.mrb[3].mxu0 }
0x1009   :  { %v1467_v17 = vpop.f32.mrb[4].mxu0 }
0x100a   :  { %1806 = vrot.lane.b32.xlu1 %v1467_v17, %s8354_s11  ;;  %v7446_v18 = vpop.f32.mrb[5].mxu0  ;;  %v1972_v17 = vld [vmem:[%s8740_s23 + $0x68] sm:$0xff] }
0x100b   :  { %v1974_v18 = vld [vmem:[%s8740_s23 + $0x78] sm:$0xff] }
0x100d   :  { %v1634_v19 = vpop.f32.mrb[6].mxu0 }
0x100e   :  { %1810 = vrot.lane.b32.xlu1 %v1634_v19, %s8351_s8  ;;  %v7456_v20 = vpop.f32.mrb[7].mxu0  ;;  %v1971_v19 = vld [vmem:[%s8740_s23 + $0x60] sm:$0xff] }
0x100f   :  { %v7826_v20 = vpack.c.bf16 %v1974_v18, %v1972_v17  ;;  %v2112_v18 = vld [vmem:[%s8775_s28 + $0x50] sm:$0xff] }
0x1011   :  { %v1801_v21 = vpop.f32.mrb[8].mxu0 }
0x1012   :  { %1814 = vrot.lane.b32.xlu1 %v1801_v21, %s8350_s7  ;;  %v7466_v22 = vpop.f32.mrb[9].mxu0  ;;  %v1973_v21 = vld [vmem:[%s8740_s23 + $0x70] sm:$0xff] }
0x1013   :  { %v7828_v22 = vpack.c.bf16 %v1973_v21, %v1971_v19  ;;  %v2113_v19 = vld [vmem:[%s8775_s28 + $0x58] sm:$0xff]  ;;  %v2130_v21 = vld [vmem:[%s8775_s28 + $0xe0] sm:$0xff] }
0x1016   :  { %1124 = vrot.lane.b32.xlu1 %v8653_v60, %s8350_s7 }
0x107c   :  { %v1807_v23 = vpop.permute.xlu1 %1806 }
0x107d   :  { %v1817_v26 = vsel %vm449_vm6, %v1300_v10, %v1807_v23  ;;  %v1970_v10 = vld [vmem:[%s8740_s23 + $0x58] sm:$0xff] }
0x107e   :  { %v7822_v13 = vpack.c.bf16 %v1970_v10, %v1968_v8  ;;  %v7846_v8 = vpack.c.bf16 %v2127_v7, %v2126_v3  ;;  %v2110_v10 = vld [vmem:[%s8775_s28 + $0x40] sm:$0xff] }
0x1080   :  { %v1811_v25 = vpop.permute.xlu1 %1810  ;;  %7823 = vmatprep.subr.bf16.mxu0 %v7822_v13  ;;  %v2111_v13 = vld [vmem:[%s8775_s28 + $0x48] sm:$0xff] }
0x1081   :  { %v1818_v29 = vsel %vm1128_vm11, %v1817_v26, %v1811_v25  ;;  %7825 = vmatpush1.bf16.msra.mxu0 %v7824_v15  ;;  %v7848_v14 = vpack.c.bf16 %v2111_v13, %v2110_v10  ;;  %v2129_v15 = vld [vmem:[%s8775_s28 + $0xd8] sm:$0xff] }
0x1082   :  { %7827 = vmatprep.subr.bf16.mxu0 %v7826_v20  ;;  %v7850_v17 = vpack.c.bf16 %v2129_v15, %v2128_v6  ;;  %v7852_v20 = vpack.c.bf16 %v2113_v19, %v2112_v18  ;;  %v6846_v6 = vld [vmem:[%s8823_s16] ss:$0 sm:$0xff] }
0x1084   :  { %v1815_v30 = vpop.permute.xlu1 %1814 }
0x1085   :  { %v1819_v34 = vsel %vm1130_vm10, %v1818_v29, %v1815_v30  ;;  %7829 = vmatpush1.bf16.msra.mxu0 %v7828_v22  ;;  %v2131_v22 = vld [vmem:[%s8775_s28 + $0xe8] sm:$0xff] }
0x1086   :  { %v1821_v37 = vrot.slane %v1819_v34, 3  ;;  %v8762_v34 = vsub.s32 3, %v8437_v41 }
0x1088   :  { %v1125_v60 = vpop.permute.xlu1 %1124 }
0x1089   :  { %v1131_v38 = vsel %vm1130_vm10, %v1129_v36, %v1125_v60  ;;  %v1956_v60 = vrot.slane %v8503_v57, %v8762_v34  ;;  %v2118_v57 = vld [vmem:[%s8775_s28 + $0x80] sm:$0xff] }
0x108a   :  { %v1823_v40 = vsel %vm251_vm2, %v1131_v38, %v1821_v37 }
0x108b   :  { %7483 = vmatprep.mubr.msk.f32.mxu1 %vm153_vm0, %v1823_v40 }
0x108c   :  { %7484 = vmatmul.mubr.msk.f32.vlgmr.msra.gmra.mrb[28].mxu1 %vm153_vm0, %v1821_v37 }
0x115f   :  { %v7485_v42 = vpop.f32.mrb[28].mxu1 }
0x1160   :  { %v1910_v43 = vpop.f32.mrb[29].mxu1  ;;  %v1916_v45 = vadd.f32 %v7485_v42, %v6837_v52 }
0x1161   :  { %v1911_v47 = vadd.f32 %v6837_v52, %v1910_v43 }
0x1162   :  { %v8727_v49 = vadd.f32 %v1916_v45, %v8514_v4 }
0x1163   :  { %v8724_v48 = vadd.f32 %v1911_v47, %v8462_v11  ;;  %v2119_v47 = vld [vmem:[%s8775_s28 + $0x88] sm:$0xff] }
0x1164   :  { %v1924_v16 = vsel %vm259_vm4, %v8727_v49, 0.0 }
0x1165   :  { %v1921_v9 = vsel %vm153_vm0, %v8724_v48, 0.0 }
0x1166   :  { %1922 = vadd.xlane.f32.xlu0 %v1921_v9  ;;  %v7830_v9 = vpack.c.bf16 %v2119_v47, %v2118_v57 }
0x1168   :  { %7831 = vmatprep.subr.bf16.mxu1 %v7830_v9 }
0x116a   :  { %1925 = vadd.xlane.f32.xlu0 %v1924_v16  ;;  %v2102_v16 = vld [vmem:[%s8775_s28] sm:$0xff] }
0x11f3   :  { %v1923_v28 = vpop.xlane.xlu0 %1922 }
0x11f4   :  { %v1927_v50 = vmul.f32 0.015625, %v1923_v28  ;;  %v2103_v28 = vld [vmem:[%s8775_s28 + $0x8] sm:$0xff] }
0x11f6   :  { %v1929_v51 = vsub.f32 %v8724_v48, %v1927_v50  ;;  %v7832_v50 = vpack.c.bf16 %v2103_v28, %v2102_v16 }
0x11f7   :  { %v1926_v53 = vpop.xlane.xlu0 %1925 }
0x11f8   :  { %v1928_v33 = vmul.f32 0.015625, %v1926_v53  ;;  %v1931_v12 = vmul.f32 %v1929_v51, %v1929_v51  ;;  %7833 = vmatpush3.bf16.msra.mxu1 %v7832_v50  ;;  %v2121_v53 = vld [vmem:[%s8775_s28 + $0x98] sm:$0xff] }
0x11fa   :  { %v1930_v11 = vsub.f32 %v8727_v49, %v1928_v33  ;;  %v1933_v4 = vsel %vm153_vm0, %v1931_v12, 0.0  ;;  %v2104_v12 = vld [vmem:[%s8775_s28 + $0x10] sm:$0xff] }
0x11fb   :  { %1934 = vadd.xlane.f32.xlu1 %v1933_v4 }
0x11fc   :  { %v1932_v31 = vmul.f32 %v1930_v11, %v1930_v11 }
0x11fe   :  { %v1936_v54 = vsel %vm259_vm4, %v1932_v31, 0.0  ;;  %v2122_v31 = vld [vmem:[%s8775_s28 + $0xa0] sm:$0xff] }
0x11ff   :  { %1937 = vadd.xlane.f32.xlu0 %v1936_v54  ;;  %v2123_v54 = vld [vmem:[%s8775_s28 + $0xa8] sm:$0xff] }
0x1200   :  { %v7838_v27 = vpack.c.bf16 %v2123_v54, %v2122_v31 }
0x1288   :  { %v1935_v23 = vpop.xlane.xlu1 %1934 }
0x1289   :  { %v1939_v24 = vmul.f32 0.015625, %v1935_v23  ;;  %v7854_v23 = vpack.c.bf16 %v2131_v22, %v2130_v21 }
0x128b   :  { %v1941_v25 = vadd.f32 1e-05, %v1939_v24  ;;  %v2114_v24 = vld [vmem:[%s8775_s28 + $0x60] sm:$0xff] }
0x128c   :  { %v1938_v26 = vpop.xlane.xlu0 %1937 }
0x128d   :  { %8197 = vrsqrt.f32 %v1941_v25  ;;  %v1940_v29 = vmul.f32 0.015625, %v1938_v26  ;;  %v2115_v25 = vld [vmem:[%s8775_s28 + $0x68] sm:$0xff] }
0x128e   :  { %v7856_v26 = vpack.c.bf16 %v2115_v25, %v2114_v24 }
0x128f   :  { %v1942_v30 = vadd.f32 1e-05, %v1940_v29  ;;  %v2132_v29 = vld [vmem:[%s8775_s28 + $0xf0] sm:$0xff] }
0x1291   :  { %8199 = vrsqrt.f32 %v1942_v30  ;;  %v2133_v30 = vld [vmem:[%s8775_s28 + $0xf8] sm:$0xff] }
0x1297   :  { %v8198_v36 = vpop.eup %8197 }
0x1298   :  { %v1945_v37 = vmul.f32 %v8198_v36, %v1929_v51  ;;  %v2120_v51 = vld [vmem:[%s8775_s28 + $0x90] sm:$0xff] }
0x1299   :  { %v7834_v33 = vpack.c.bf16 %v2121_v53, %v2120_v51  ;;  %v2116_v36 = vld [vmem:[%s8775_s28 + $0x70] sm:$0xff] }
0x129a   :  { %v1951_v38 = vmul.f32 %v1950_v35, %v1945_v37  ;;  %v2117_v37 = vld [vmem:[%s8775_s28 + $0x78] sm:$0xff] }
0x129b   :  { %v8200_v40 = vpop.eup %8199  ;;  %7835 = vmatprep.subr.bf16.mxu1 %v7834_v33 }
0x129c   :  { %v1957_v52 = vadd.f32 %v1956_v60, %v1951_v38  ;;  %v1946_v42 = vmul.f32 %v8200_v40, %v1930_v11  ;;  %v2105_v11 = vld [vmem:[%s8775_s28 + $0x18] sm:$0xff]  ;;  %v1975_v38 = vld [vmem:[%s8813_s3] sm:$0x3] }
0x129d   :  { %v7836_v4 = vpack.c.bf16 %v2105_v11, %v2104_v12  ;;  %v1980_v40 = vrot.slane %v1975_v38, %v8440_v46 }
0x129e   :  { %6840 = vmatmul.mubr.msk.f32.vlgmr.msra.gmra.mrb[10].mxu0 %vm153_vm0, %v1957_v52  ;;  %v1952_v43 = vmul.f32 %v1950_v35, %v1946_v42  ;;  %v7858_v35 = vpack.c.bf16 %v2133_v30, %v2132_v29  ;;  %v1984_v52 = vrot.slane %v1975_v38, %v8452_v5 }
0x129f   :  { %2063 = vmatprep.mubr.f32.mxu0 %v8344_v44  ;;  %7837 = vmatpush3.bf16.msra.mxu1 %v7836_v4 }
0x12a0   :  { %v1958_v45 = vadd.f32 %v1956_v60, %v1952_v43  ;;  %7839 = vmatprep.subr.bf16.mxu1 %v7838_v27  ;;  %v7860_v60 = vpack.c.bf16 %v2117_v37, %v2116_v36 }
0x12a2   :  { %6841 = vmatmul.mubr.msk.f32.gmra.mrb[12].mxu0 %vm153_vm0, %v1958_v45 }
0x12a3   :  { %2358 = vmatprep.mubr.f32.mxu0 %v8344_v44  ;;  %7841 = vmatpush3.bf16.msra.mxu1 %v7840_v58 }
0x12a4   :  { %7843 = vmatprep.subr.bf16.mxu1 %v7842_v62 }
0x12a7   :  { %7845 = vmatpush3.bf16.msra.mxu1 %v7844_v2 }
0x12a8   :  { %7847 = vmatprep.subr.bf16.mxu1 %v7846_v8 }
0x12ab   :  { %7849 = vmatpush3.bf16.msra.mxu1 %v7848_v14 }
0x12ac   :  { %7851 = vmatprep.subr.bf16.mxu1 %v7850_v17 }
0x12af   :  { %7853 = vmatpush3.bf16.msra.mxu1 %v7852_v20 }
0x12b0   :  { %7855 = vmatprep.subr.bf16.mxu1 %v7854_v23 }
0x12b3   :  { %7857 = vmatpush3.bf16.msra.mxu1 %v7856_v26 }
0x12b4   :  { %7859 = vmatprep.subr.bf16.mxu1 %v7858_v35 }
0x12b7   :  { %7861 = vmatpush3.bf16.msra.mxu1 %v7860_v60 }
0x12b8   :  { %7506 = vmatprep.subr.mxu1 %v8344_v44 }
0x1371   :  { %v2059_v42 = vpop.f32.mrb[10].mxu0 }
0x1372   :  { %v2060_v43 = vadd.f32 %v2059_v42, %v1980_v40  ;;  %v2061_v45 = vpop.f32.mrb[11].mxu0  ;;  %v6851_v42 = vld [vmem:[%s8476_s26 + $0x98] sm:$0xff] }
0x1373   :  { %v2062_v57 = vadd.f32 %v2061_v45, %v1984_v52  ;;  %v6848_v45 = vld [vmem:[%s8476_s26 + $0x80] sm:$0xff] }
0x1374   :  { %v6842_v47 = vmul.f32 -1.702, %v2060_v43 }
0x1375   :  { %v6843_v9 = vmul.f32 -1.702, %v2062_v57  ;;  %v2065_v16 = vpop.f32.mrb[12].mxu0 }
0x1376   :  { %v2078_v28 = vmul.f32 1.442695, %v6842_v47  ;;  %v2066_v50 = vadd.f32 %v2065_v16, %v1980_v40  ;;  %v2067_v51 = vpop.f32.mrb[13].mxu0  ;;  %v6855_v16 = vld [vmem:[%s8476_s26 + $0xb8] sm:$0xff] }
0x1377   :  { %v2080_v53 = vmul.f32 1.442695, %v6843_v9  ;;  %v2068_v33 = vadd.f32 %v2067_v51, %v1984_v52  ;;  %v6849_v52 = vld [vmem:[%s8476_s26 + $0x88] sm:$0xff]  ;;  %v6854_v51 = vld [vmem:[%s8476_s26 + $0xb0] sm:$0xff] }
0x1378   :  { %8201 = vpow2.f32 %v2078_v28  ;;  %v6844_v12 = vmul.f32 -1.702, %v2066_v50  ;;  %v6853_v9 = vld [vmem:[%s8476_s26 + $0xa8] sm:$0xff] }
0x1379   :  { %8203 = vpow2.f32 %v2080_v53  ;;  %v6845_v11 = vmul.f32 -1.702, %v2068_v33  ;;  %v7866_v28 = vpack.c.bf16 %v6855_v16, %v6853_v9 }
0x137a   :  { %v2082_v4 = vmul.f32 1.442695, %v6844_v12  ;;  %v6859_v12 = vld [vmem:[%s8476_s26 + $0xd8] sm:$0xff] }
0x137b   :  { %v2084_v31 = vmul.f32 1.442695, %v6845_v11 }
0x137c   :  { %8205 = vpow2.f32 %v2082_v4  ;;  %v6856_v4 = vld [vmem:[%s8476_s26 + $0xc0] sm:$0xff] }
0x137d   :  { %8207 = vpow2.f32 %v2084_v31  ;;  %v6858_v31 = vld [vmem:[%s8476_s26 + $0xd0] sm:$0xff] }
0x1382   :  { %v8202_v54 = vpop.eup %8201 }
0x1383   :  { %v8204_v27 = vpop.eup %8203  ;;  %v2086_v55 = vadd.f32 1.0, %v8202_v54  ;;  %v7872_v54 = vpack.c.bf16 %v6858_v31, %v6856_v4 }
0x1384   :  { %v2087_v56 = vadd.f32 1.0, %v8204_v27  ;;  %v6861_v27 = vld [vmem:[%s8476_s26 + $0xe8] sm:$0xff] }
0x1385   :  { %8209 = vrcp.f32 %v2086_v55  ;;  %v6863_v55 = vld [vmem:[%s8476_s26 + $0xf8] sm:$0xff] }
0x1386   :  { %v8206_v58 = vpop.eup %8205  ;;  %8211 = vrcp.f32 %v2087_v56  ;;  %v7874_v56 = vpack.c.bf16 %v6863_v55, %v6861_v27 }
0x1387   :  { %v8208_v59 = vpop.eup %8207  ;;  %v2088_v61 = vadd.f32 1.0, %v8206_v58  ;;  %v6860_v58 = vld [vmem:[%s8476_s26 + $0xe0] sm:$0xff] }
0x1388   :  { %v2089_v62 = vadd.f32 1.0, %v8208_v59  ;;  %v6862_v59 = vld [vmem:[%s8476_s26 + $0xf0] sm:$0xff] }
0x1389   :  { %8213 = vrcp.f32 %v2088_v61  ;;  %v7876_v61 = vpack.c.bf16 %v6862_v59, %v6860_v58 }
0x138a   :  { %8215 = vrcp.f32 %v2089_v62 }
0x138f   :  { %v8210_v63 = vpop.eup %8209 }
0x1390   :  { %v8212_v1 = vpop.eup %8211  ;;  %v2098_v3 = vmul.f32 %v8210_v63, %v2060_v43  ;;  %v7862_v43 = vpack.c.bf16 %v6851_v42, %v6849_v52 }
0x1391   :  { %v2099_v2 = vmul.f32 %v8212_v1, %v2062_v57  ;;  %v6850_v57 = vld [vmem:[%s8476_s26 + $0x90] sm:$0xff] }
0x1392   :  { %v7864_v47 = vpack.c.bf16 %v6850_v57, %v6848_v45  ;;  %7863 = vmatprep.subr.bf16.mxu0 %v7862_v43 }
0x1393   :  { %v8214_v7 = vpop.eup %8213  ;;  %2205 = vmatprep.mubr.f32.mxu1 %v2099_v2 }
0x1394   :  { %v8216_v8 = vpop.eup %8215  ;;  %2206 = vmatmul.mubr.f32.vlgmr.msra.gmra.mrb[30].mxu1 %v2098_v3  ;;  %v2100_v13 = vmul.f32 %v8214_v7, %v2066_v50  ;;  %7865 = vmatpush1.bf16.msra.mxu0 %v7864_v47  ;;  %v6852_v50 = vld [vmem:[%s8476_s26 + $0xa0] sm:$0xff] }
0x1395   :  { %v2101_v10 = vmul.f32 %v8216_v8, %v2068_v33  ;;  %v7868_v53 = vpack.c.bf16 %v6854_v51, %v6852_v50  ;;  %7867 = vmatprep.subr.bf16.mxu0 %v7866_v28  ;;  %v6857_v33 = vld [vmem:[%s8476_s26 + $0xc8] sm:$0xff]  ;;  %v8858_v8 = vld [vmem:[%s8500_s30 + $0x4] sm:$0xf]  ;;  %s8361_s26 = smov 17  }
0x1396   :  { %v7870_v11 = vpack.c.bf16 %v6859_v12, %v6857_v33 }
0x1397   :  { %2210 = vmatprep.mubr.f32.mxu1 %v2101_v10  ;;  %v2249_v10 = vrot.slane %v8858_v8, %v8440_v46 }
0x1398   :  { %2211 = vmatmul.mubr.f32.gmra.mrb[32].mxu1 %v2100_v13  ;;  %7869 = vmatpush1.bf16.msra.mxu0 %v7868_v53 }
0x1399   :  { %7508 = vmatprep.mubr.msk.f32.mxu1 %vm8347_vm5, %v8344_v44  ;;  %7871 = vmatprep.subr.bf16.mxu0 %v7870_v11 }
0x139c   :  { %7873 = vmatpush1.bf16.msra.mxu0 %v7872_v54 }
0x139d   :  { %7875 = vmatprep.subr.bf16.mxu0 %v7874_v56 }
0x13a0   :  { %7877 = vmatpush1.bf16.msra.mxu0 %v7876_v61 }
0x13a1   :  { %7486 = vmatprep.subr.mxu0 %v8344_v44 }
0x1467   :  { %v7161_v14 = vpop.f32.mrb[30].mxu1 }
0x1468   :  { %v7162_v15 = vpop.f32.mrb[31].mxu1 }
0x1469   :  { %v7163_v17 = vadd.f32 %v7162_v15, %v7161_v14 }
0x146b   :  { %v2208_v18 = vadd.f32 %v7163_v17, %v6846_v6  ;;  %v7164_v19 = vpop.f32.mrb[32].mxu1 }
0x146c   :  { %v7165_v20 = vpop.f32.mrb[33].mxu1 }
0x146d   :  { %v8827_v21 = vadd.f32 %v2208_v18, %v8724_v48  ;;  %v7166_v22 = vadd.f32 %v7165_v20, %v7164_v19 }
0x146f   :  { %v2213_v23 = vadd.f32 %v7166_v22, %v6846_v6  ;;  %v2220_v24 = vsel %vm153_vm0, %v8827_v21, 0.0  ;;  %v2255_v6 = vrot.slane %v8858_v8, %v8452_v5 }
0x1470   :  { %2221 = vadd.xlane.f32.xlu0 %v2220_v24 }
0x1471   :  { %v8832_v25 = vadd.f32 %v2213_v23, %v8727_v49  ;;  %v6864_v23 = vld [vmem:[%s8523_s4 + $0x2] sm:$0x3]  ;;  %s9382_s4 = sld [smem:[%s9620_s0 + %s8371_s14]]  }
0x1472   :  { %v2281_v24 = vrot.slane %v6864_v23, %v8440_v46 }
0x1473   :  { %v2223_v26 = vsel %vm259_vm4, %v8832_v25, 0.0 }
0x1474   :  { %2224 = vadd.xlane.f32.xlu0 %v2223_v26 }
0x14fd   :  { %v2222_v29 = vpop.xlane.xlu0 %2221 }
0x14fe   :  { %v2226_v48 = vmul.f32 0.015625, %v2222_v29 }
0x1500   :  { %v2228_v30 = vsub.f32 %v8827_v21, %v2226_v48 }
0x1501   :  { %v2225_v35 = vpop.xlane.xlu0 %2224 }
0x1502   :  { %v2227_v36 = vmul.f32 0.015625, %v2225_v35  ;;  %v2230_v37 = vmul.f32 %v2228_v30, %v2228_v30 }
0x1504   :  { %v2229_v60 = vsub.f32 %v8832_v25, %v2227_v36  ;;  %v2232_v49 = vsel %vm153_vm0, %v2230_v37, 0.0 }
0x1505   :  { %2233 = vadd.xlane.f32.xlu1 %v2232_v49 }
0x1506   :  { %v2231_v38 = vmul.f32 %v2229_v60, %v2229_v60 }
0x1508   :  { %v2235_v40 = vsel %vm259_vm4, %v2231_v38, 0.0 }
0x1509   :  { %2236 = vadd.xlane.f32.xlu1 %v2235_v40 }
0x1592   :  { %v2234_v62 = vpop.xlane.xlu1 %2233 }
0x1593   :  { %v2238_v63 = vmul.f32 0.015625, %v2234_v62 }
0x1595   :  { %v2240_v1 = vadd.f32 1e-05, %v2238_v63 }
0x1596   :  { %v2237_v2 = vpop.xlane.xlu1 %2236 }
0x1597   :  { %8217 = vrsqrt.f32 %v2240_v1  ;;  %v2239_v3 = vmul.f32 0.015625, %v2237_v2 }
0x1599   :  { %v2241_v7 = vadd.f32 1e-05, %v2239_v3 }
0x159b   :  { %8219 = vrsqrt.f32 %v2241_v7 }
0x15a1   :  { %v8218_v13 = vpop.eup %8217 }
0x15a2   :  { %v2244_v14 = vmul.f32 %v8218_v13, %v2228_v30  ;;  %v2285_v30 = vrot.slane %v6864_v23, %v8452_v5 }
0x15a4   :  { %v2250_v15 = vmul.f32 %v2249_v10, %v2244_v14 }
0x15a5   :  { %v8220_v17 = vpop.eup %8219 }
0x15a6   :  { %v2256_v18 = vadd.f32 %v2255_v6, %v2250_v15  ;;  %v2245_v19 = vmul.f32 %v8220_v17, %v2229_v60 }
0x15a8   :  { %6865 = vmatmul.mubr.msk.f32.vlgmr.msra.gmra.mrb[14].mxu0 %vm153_vm0, %v2256_v18  ;;  %v2251_v20 = vmul.f32 %v2249_v10, %v2245_v19 }
0x15a9   :  { %2364 = vmatprep.mubr.f32.mxu0 %v8344_v44 }
0x15aa   :  { %v2257_v22 = vadd.f32 %v2255_v6, %v2251_v20 }
0x15ac   :  { %6866 = vmatmul.mubr.msk.f32.gmra.mrb[16].mxu0 %vm153_vm0, %v2257_v22 }
0x15ad   :  { %7488 = vmatprep.mubr.msk.f32.mxu0 %vm8347_vm5, %v8344_v44 }
0x167b   :  { %v2360_v26 = vpop.f32.mrb[14].mxu0 }
0x167c   :  { %v2361_v29 = vadd.f32 %v2360_v26, %v2281_v24  ;;  %v2362_v48 = vpop.f32.mrb[15].mxu0 }
0x167d   :  { %v8884_v42 = vadd.f32 %v2362_v48, %v2285_v30 }
0x167e   :  { %2372 = vrot.lane.b32.xlu0 %v2361_v29, %s8348_s5  ;;  %v3053_v38 = vrot.slane %v2361_v29, 5 }
0x167f   :  { %v2366_v35 = vpop.f32.mrb[16].mxu0 }
0x1680   :  { %v2368_v36 = vpop.f32.mrb[17].mxu0  ;;  %v2367_v60 = vadd.f32 %v2366_v35, %v2281_v24 }
0x1681   :  { %v8873_v37 = vadd.f32 %v2368_v36, %v2285_v30 }
0x1682   :  { %2536 = vrot.lane.b32.xlu0 %v2361_v29, %s8349_s6  ;;  %v3054_v49 = vrot.slane %v2367_v60, 5 }
0x1684   :  { %v3055_v40 = vsel %vm1133_vm7, %v3053_v38, %v3054_v49 }
0x1686   :  { %2703 = vrot.lane.b32.xlu0 %v2361_v29, %s8352_s9 }
0x168a   :  { %2870 = vrot.lane.b32.xlu0 %v2361_v29, %s8353_s10 }
0x168e   :  { %3225 = vrot.lane.b32.xlu0 %v3055_v40, %s8350_s7 }
0x1692   :  { %3392 = vrot.lane.b32.xlu0 %v3055_v40, %s8351_s8 }
0x1696   :  { %3559 = vrot.lane.b32.xlu0 %v3055_v40, %s8354_s11 }
0x16f0   :  { %v2373_v52 = vpop.permute.xlu0 %2372 }
0x16f1   :  { %7487 = vmatpush3.xpose.msk.msra.mxu0 %vm449_vm6, %v2373_v52 }
0x16f2   :  { %7491 = vmatprep.subr.mxu0 %v8344_v44 }
0x16f4   :  { %7489 = vmatmul.mubr.msk.f32.vlgmr.msra.gmra.mrb[18].mxu0 %vm449_vm6, %v2361_v29  ;;  %v2537_v51 = vpop.permute.xlu0 %2536 }
0x16f5   :  { %7492 = vmatpush3.msk.msra.mxu0 %vm251_vm2, %v8884_v42  ;;  %7493 = vmatprep.mubr.msk.f32.mxu0 %vm8347_vm5, %v8344_v44 }
0x16f6   :  { %7496 = vmatprep.subr.mxu0 %v8344_v44 }
0x16f8   :  { %v2704_v33 = vpop.permute.xlu0 %2703 }
0x16fc   :  { %v2871_v31 = vpop.permute.xlu0 %2870 }
0x1700   :  { %v3226_v27 = vpop.permute.xlu0 %3225 }
0x1704   :  { %v3393_v61 = vpop.permute.xlu0 %3392 }
0x1708   :  { %v3560_v63 = vpop.permute.xlu0 %3559 }
0x17c7   :  { %v2444_v43 = vpop.f32.mrb[18].mxu0 }
0x17c8   :  { %v2448_v45 = vmul.f32 0.25, %v2444_v43  ;;  %v7490_v57 = vpop.f32.mrb[19].mxu0 }
0x17ca   :  { %v2449_v47 = vsel %vm525_vm8, %v2448_v45, -inf }
0x17cb   :  { %2450 = vmax.xlane.f32.xlu1 %v2449_v47 }
0x17dc   :  { %2538 = vrot.lane.b32.xlu1 %v2361_v29, %s8350_s7 }
0x17e0   :  { %2705 = vrot.lane.b32.xlu1 %v2361_v29, %s8351_s8 }
0x1858   :  { %v2451_v9 = vpop.xlane.xlu1 %2450 }
0x1859   :  { %v2452_v16 = vsub.f32 %v2448_v45, %v2451_v9 }
0x185b   :  { %v2453_v28 = vmul.f32 1.442695, %v2452_v16 }
0x185c   :  { %v2539_v50 = vpop.permute.xlu1 %2538 }
0x185d   :  { %8221 = vpow2.f32 %v2453_v28 }
0x1860   :  { %v2706_v53 = vpop.permute.xlu1 %2705 }
0x1861   :  { %7507 = vmatpush3.xpose.msk.msra.mxu1 %vm449_vm6, %v2706_v53 }
0x1862   :  { %7516 = vmatprep.subr.mxu1 %v8344_v44 }
0x1864   :  { %7509 = vmatmul.mubr.msk.f32.vlgmr.msra.gmra.mrb[34].mxu1 %vm449_vm6, %v2704_v33 }
0x1865   :  { %7518 = vmatprep.mubr.msk.f32.mxu1 %vm8347_vm5, %v8344_v44 }
0x1867   :  { %v8222_v12 = vpop.eup %8221 }
0x1868   :  { %v2455_v11 = vsel %vm525_vm8, %v8222_v12, 0.0 }
0x1869   :  { %2456 = vadd.xlane.f32.xlu1 %v2455_v11 }
0x187a   :  { %2872 = vrot.lane.b32.xlu1 %v2361_v29, %s8354_s11 }
0x187e   :  { %3056 = vrot.lane.b32.xlu1 %v3055_v40, %s8348_s5 }
0x1882   :  { %3223 = vrot.lane.b32.xlu1 %v3055_v40, %s8349_s6 }
0x1886   :  { %3390 = vrot.lane.b32.xlu1 %v3055_v40, %s8352_s9 }
0x188a   :  { %3557 = vrot.lane.b32.xlu1 %v3055_v40, %s8353_s10 }
0x18f6   :  { %v2457_v4 = vpop.xlane.xlu1 %2456 }
0x18f7   :  { %8223 = vrcp.f32 %v2457_v4 }
0x18fa   :  { %v2873_v54 = vpop.permute.xlu1 %2872 }
0x18fb   :  { %7517 = vmatpush3.xpose.msk.msra.mxu1 %vm449_vm6, %v2873_v54 }
0x18fc   :  { %7526 = vmatprep.subr.mxu1 %v8344_v44 }
0x18fe   :  { %v3057_v55 = vpop.permute.xlu1 %3056  ;;  %7519 = vmatmul.mubr.msk.f32.vlgmr.msra.gmra.mrb[36].mxu1 %vm449_vm6, %v2871_v31 }
0x18ff   :  { %7527 = vmatpush3.xpose.msk.msra.mxu1 %vm449_vm6, %v3057_v55  ;;  %7528 = vmatprep.mubr.msk.f32.mxu1 %vm8347_vm5, %v8344_v44 }
0x1900   :  { %7536 = vmatprep.subr.mxu1 %v8344_v44 }
0x1901   :  { %v8224_v56 = vpop.eup %8223 }
0x1902   :  { %v2459_v58 = vmul.f32 %v8224_v56, %v8222_v12  ;;  %v3224_v59 = vpop.permute.xlu1 %3223  ;;  %7529 = vmatmul.mubr.msk.f32.vlgmr.msra.gmra.mrb[38].mxu1 %vm449_vm6, %v3055_v40 }
0x1903   :  { %7537 = vmatpush3.xpose.msk.msra.mxu1 %vm449_vm6, %v3226_v27  ;;  %7538 = vmatprep.mubr.msk.f32.mxu1 %vm8347_vm5, %v8344_v44 }
0x1904   :  { %7494 = vmatmul.mubr.msk.f32.vlgmr.msra.gmra.mrb[20].mxu0 %vm537_vm9, %v2459_v58  ;;  %7546 = vmatprep.subr.mxu1 %v8344_v44 }
0x1905   :  { %7497 = vmatpush3.xpose.msk.msra.mxu0 %vm449_vm6, %v2539_v50  ;;  %7498 = vmatprep.mubr.msk.f32.mxu0 %vm8347_vm5, %v8344_v44 }
0x1906   :  { %7539 = vmatmul.mubr.msk.f32.vlgmr.msra.gmra.mrb[40].mxu1 %vm449_vm6, %v3224_v59  ;;  %7501 = vmatprep.subr.mxu0 %v8344_v44  ;;  %v3391_v62 = vpop.permute.xlu1 %3390 }
0x1907   :  { %7547 = vmatpush3.xpose.msk.msra.mxu1 %vm449_vm6, %v3393_v61  ;;  %7548 = vmatprep.mubr.msk.f32.mxu1 %vm8347_vm5, %v8344_v44 }
0x1908   :  { %7499 = vmatmul.mubr.msk.f32.vlgmr.msra.gmra.mrb[22].mxu0 %vm449_vm6, %v2537_v51  ;;  %7556 = vmatprep.subr.mxu1 %v8344_v44 }
0x1909   :  { %7503 = vmatprep.mubr.msk.f32.mxu0 %vm8347_vm5, %v8344_v44 }
0x190a   :  { %7549 = vmatmul.mubr.msk.f32.vlgmr.msra.gmra.mrb[42].mxu1 %vm449_vm6, %v3391_v62  ;;  %v3558_v1 = vpop.permute.xlu1 %3557 }
0x190b   :  { %7557 = vmatpush3.xpose.msk.msra.mxu1 %vm449_vm6, %v3560_v63  ;;  %7558 = vmatprep.mubr.msk.f32.mxu1 %vm8347_vm5, %v8344_v44 }
0x190e   :  { %7559 = vmatmul.mubr.msk.f32.vlgmr.msra.gmra.mrb[44].mxu1 %vm449_vm6, %v3558_v1 }
0x1937   :  { %v2777_v2 = vpop.f32.mrb[34].mxu1 }
0x1938   :  { %v2781_v3 = vmul.f32 0.25, %v2777_v2  ;;  %v7510_v7 = vpop.f32.mrb[35].mxu1 }
0x193a   :  { %v2782_v10 = vsel %vm525_vm8, %v2781_v3, -inf }
0x193b   :  { %2783 = vmax.xlane.f32.xlu1 %v2782_v10 }
0x19c8   :  { %v2784_v20 = vpop.xlane.xlu1 %2783 }
0x19c9   :  { %v2785_v29 = vsub.f32 %v2781_v3, %v2784_v20  ;;  %v3146_v20 = vrot.slane %v8873_v37, 5 }
0x19cb   :  { %v2786_v38 = vmul.f32 1.442695, %v2785_v29 }
0x19cd   :  { %8225 = vpow2.f32 %v2786_v38 }
0x19d1   :  { %v2944_v13 = vpop.f32.mrb[36].mxu1 }
0x19d2   :  { %v7520_v14 = vpop.f32.mrb[37].mxu1  ;;  %v2948_v30 = vmul.f32 0.25, %v2944_v13 }
0x19d4   :  { %v2949_v45 = vsel %vm525_vm8, %v2948_v30, -inf }
0x19d5   :  { %v3128_v6 = vpop.f32.mrb[38].mxu1 }
0x19d6   :  { %v7530_v15 = vpop.f32.mrb[39].mxu1  ;;  %v3132_v52 = vmul.f32 0.25, %v3128_v6 }
0x19d7   :  { %v8937_v17 = vpop.f32.mrb[20].mxu0  ;;  %v8948_v50 = vpop.eup %8225 }
0x19d8   :  { %v7495_v18 = vpop.f32.mrb[21].mxu0  ;;  %v3133_v47 = vsel %vm525_vm8, %v3132_v52, -inf  ;;  %v2788_v51 = vsel %vm525_vm8, %v8948_v50, 0.0 }
0x19d9   :  { %v3297_v19 = vpop.f32.mrb[40].mxu1 }
0x19da   :  { %v7540_v22 = vpop.f32.mrb[41].mxu1  ;;  %v3301_v57 = vmul.f32 0.25, %v3297_v19 }
0x19db   :  { %v2610_v23 = vpop.f32.mrb[22].mxu0  ;;  %v3145_v22 = vrot.slane %v8884_v42, 5 }
0x19dc   :  { %v8939_v24 = vmul.f32 0.25, %v2610_v23  ;;  %v7500_v26 = vpop.f32.mrb[23].mxu0  ;;  %v3302_v16 = vsel %vm525_vm8, %v3301_v57, -inf }
0x19dd   :  { %v3464_v48 = vpop.f32.mrb[42].mxu1  ;;  %v3147_v23 = vsel %vm1133_vm7, %v3145_v22, %v3146_v20  ;;  %v6906_v20 = vld [vmem:[%s8692_s15 + $0x78] sm:$0xff] }
0x19de   :  { %v3468_v35 = vmul.f32 0.25, %v3464_v48  ;;  %v7550_v36 = vpop.f32.mrb[43].mxu1  ;;  %v2615_v60 = vsel %vm525_vm8, %v8939_v24, -inf }
0x19df   :  { %2616 = vmax.xlane.f32.xlu0 %v2615_v60 }
0x19e0   :  { %v3469_v49 = vsel %vm525_vm8, %v3468_v35, -inf }
0x19e1   :  { %3470 = vmax.xlane.f32.xlu1 %v3469_v49  ;;  %v3631_v40 = vpop.f32.mrb[44].mxu1 }
0x19e2   :  { %v7560_v43 = vpop.f32.mrb[45].mxu1  ;;  %v3635_v9 = vmul.f32 0.25, %v3631_v40 }
0x19e3   :  { %2950 = vmax.xlane.f32.xlu0 %v2949_v45 }
0x19e4   :  { %v3636_v28 = vsel %vm525_vm8, %v3635_v9, -inf }
0x19e7   :  { %3134 = vmax.xlane.f32.xlu0 %v3133_v47 }
0x19eb   :  { %3303 = vmax.xlane.f32.xlu0 %v3302_v16 }
0x19ef   :  { %3637 = vmax.xlane.f32.xlu0 %v3636_v28 }
0x19f3   :  { %2789 = vadd.xlane.f32.xlu0 %v2788_v51 }
0x1a6c   :  { %v2617_v53 = vpop.xlane.xlu0 %2616 }
0x1a6d   :  { %v2618_v26 = vsub.f32 %v8939_v24, %v2617_v53 }
0x1a6e   :  { %v3471_v33 = vpop.xlane.xlu1 %3470 }
0x1a6f   :  { %v3472_v4 = vsub.f32 %v3468_v35, %v3471_v33  ;;  %v2619_v29 = vmul.f32 1.442695, %v2618_v26 }
0x1a70   :  { %v2951_v12 = vpop.xlane.xlu0 %2950 }
0x1a71   :  { %v2952_v11 = vsub.f32 %v2948_v30, %v2951_v12  ;;  %v3473_v55 = vmul.f32 1.442695, %v3472_v4 }
0x1a73   :  { %v2953_v31 = vmul.f32 1.442695, %v2952_v11 }
0x1a74   :  { %v3135_v54 = vpop.xlane.xlu0 %3134 }
0x1a75   :  { %8227 = vpow2.f32 %v2953_v31  ;;  %v3136_v27 = vsub.f32 %v3132_v52, %v3135_v54 }
0x1a77   :  { %v3137_v56 = vmul.f32 1.442695, %v3136_v27 }
0x1a78   :  { %v3304_v58 = vpop.xlane.xlu0 %3303 }
0x1a79   :  { %8229 = vpow2.f32 %v3137_v56  ;;  %v3305_v59 = vsub.f32 %v3301_v57, %v3304_v58  ;;  %v6900_v56 = vld [vmem:[%s8692_s15 + $0x48] sm:$0xff] }
0x1a7a   :  { %8231 = vpow2.f32 %v3473_v55  ;;  %v6899_v55 = vld [vmem:[%s8692_s15 + $0x40] sm:$0xff] }
0x1a7b   :  { %v3306_v61 = vmul.f32 1.442695, %v3305_v59  ;;  %v7878_v58 = vpack.c.bf16 %v6900_v56, %v6899_v55 }
0x1a7c   :  { %v3638_v62 = vpop.xlane.xlu0 %3637 }
0x1a7d   :  { %8233 = vpow2.f32 %v3306_v61  ;;  %v3639_v63 = vsub.f32 %v3635_v9, %v3638_v62  ;;  %7879 = vmatprep.subr.bf16.mxu1 %v7878_v58 }
0x1a7e   :  { %7881 = vmatpush3.bf16.msra.mxu1 %v7878_v58 }
0x1a7f   :  { %v8228_v1 = vpop.eup %8227  ;;  %v3640_v2 = vmul.f32 1.442695, %v3639_v63  ;;  %v6901_v63 = vld [vmem:[%s8692_s15 + $0x50] sm:$0xff] }
0x1a80   :  { %v2955_v3 = vsel %vm525_vm8, %v8228_v1, 0.0  ;;  %v2790_v37 = vpop.xlane.xlu0 %2789 }
0x1a81   :  { %8235 = vpow2.f32 %v3640_v2  ;;  %2956 = vadd.xlane.f32.xlu1 %v2955_v3 }
0x1a82   :  { %8237 = vpow2.f32 %v2619_v29 }
0x1a83   :  { %v8953_v7 = vpop.eup %8229 }
0x1a84   :  { %v3139_v10 = vsel %vm525_vm8, %v8953_v7, 0.0  ;;  %v8957_v13 = vpop.eup %8231 }
0x1a85   :  { %3140 = vadd.xlane.f32.xlu0 %v3139_v10  ;;  %v3475_v6 = vsel %vm525_vm8, %v8957_v13, 0.0  ;;  %v6903_v10 = vld [vmem:[%s8692_s15 + $0x60] sm:$0xff] }
0x1a87   :  { %v8959_v14 = vpop.eup %8233 }
0x1a88   :  { %v3308_v15 = vsel %vm525_vm8, %v8959_v14, 0.0 }
0x1a89   :  { %3476 = vadd.xlane.f32.xlu0 %v3475_v6  ;;  %3309 = vadd.xlane.f32.xlu1 %v3308_v15 }
0x1a8b   :  { %v8965_v18 = vpop.eup %8235 }
0x1a8c   :  { %v3642_v19 = vsel %vm525_vm8, %v8965_v18, 0.0  ;;  %v8238_v48 = vpop.eup %8237 }
0x1a8d   :  { %3643 = vadd.xlane.f32.xlu1 %v3642_v19  ;;  %v2621_v30 = vsel %vm525_vm8, %v8238_v48, 0.0  ;;  %v6905_v19 = vld [vmem:[%s8692_s15 + $0x70] sm:$0xff] }
0x1a8e   :  { %v7890_v22 = vpack.c.bf16 %v6906_v20, %v6905_v19  ;;  %v6922_v19 = vld [vmem:[%s8740_s23 + $0xd8] sm:$0xff] }
0x1a9e   :  { %2793 = vrot.lane.b32.xlu1 %v8884_v42, %s8352_s9 }
0x1a9f   :  { %2626 = vrot.lane.b32.xlu0 %v8884_v42, %s8349_s6 }
0x1aa3   :  { %3480 = vrot.lane.b32.xlu0 %v3147_v23, %s8352_s9 }
0x1ac2   :  { %2622 = vadd.xlane.f32.xlu1 %v2621_v30 }
0x1ad3   :  { %2960 = vrot.lane.b32.xlu1 %v8884_v42, %s8353_s10 }
0x1ad7   :  { %3313 = vrot.lane.b32.xlu1 %v3147_v23, %s8349_s6 }
0x1adb   :  { %3647 = vrot.lane.b32.xlu1 %v3147_v23, %s8353_s10 }
0x1b0e   :  { %v2957_v24 = vpop.xlane.xlu1 %2956 }
0x1b12   :  { %v3141_v35 = vpop.xlane.xlu0 %3140 }
0x1b16   :  { %v3477_v36 = vpop.xlane.xlu0 %3476  ;;  %v3310_v49 = vpop.xlane.xlu1 %3309 }
0x1b1a   :  { %v2627_v60 = vpop.permute.xlu0 %2626  ;;  %v3644_v38 = vpop.xlane.xlu1 %3643 }
0x1b1b   :  { %7502 = vmatpush3.msk.msra.mxu0 %vm251_vm2, %v2627_v60 }
0x1b1c   :  { %7511 = vmatprep.subr.mxu0 %v8344_v44 }
0x1b1e   :  { %v2794_v40 = vpop.permute.xlu1 %2793  ;;  %v3481_v11 = vpop.permute.xlu0 %3480 }
0x1b4f   :  { %v2623_v52 = vpop.xlane.xlu1 %2622 }
0x1b50   :  { %8239 = vrcp.f32 %v2623_v52 }
0x1b51   :  { %8241 = vrcp.f32 %v2790_v37 }
0x1b52   :  { %8243 = vrcp.f32 %v2957_v24 }
0x1b53   :  { %8245 = vrcp.f32 %v3141_v35  ;;  %v2961_v9 = vpop.permute.xlu1 %2960 }
0x1b54   :  { %8247 = vrcp.f32 %v3310_v49 }
0x1b55   :  { %8249 = vrcp.f32 %v3477_v36 }
0x1b56   :  { %8251 = vrcp.f32 %v3644_v38 }
0x1b57   :  { %v3314_v53 = vpop.permute.xlu1 %3313 }
0x1b5a   :  { %v8240_v42 = vpop.eup %8239 }
0x1b5b   :  { %v2625_v43 = vmul.f32 %v8240_v42, %v8238_v48  ;;  %v8242_v45 = vpop.eup %8241  ;;  %v3648_v54 = vpop.permute.xlu1 %3647 }
0x1b5c   :  { %v2792_v57 = vmul.f32 %v8242_v45, %v8948_v50  ;;  %v8244_v47 = vpop.eup %8243 }
0x1b5d   :  { %7504 = vmatmul.mubr.msk.f32.vlgmr.msra.gmra.mrb[24].mxu0 %vm537_vm9, %v2625_v43  ;;  %v2959_v16 = vmul.f32 %v8244_v47, %v8228_v1  ;;  %v8246_v28 = vpop.eup %8245  ;;  %v6902_v1 = vld [vmem:[%s8692_s15 + $0x58] sm:$0xff] }
0x1b5e   :  { %7512 = vmatpush3.msk.msra.mxu0 %vm251_vm2, %v2794_v40  ;;  %7513 = vmatprep.mubr.msk.f32.mxu0 %vm8347_vm5, %v8344_v44  ;;  %v3143_v50 = vmul.f32 %v8246_v28, %v8953_v7  ;;  %v8248_v51 = vpop.eup %8247  ;;  %v7882_v3 = vpack.c.bf16 %v6902_v1, %v6901_v63  ;;  %v6911_v1 = vld [vmem:[%s8740_s23 + $0x80] sm:$0xff] }
0x1b5f   :  { %7521 = vmatprep.subr.mxu0 %v8344_v44  ;;  %v3312_v33 = vmul.f32 %v8248_v51, %v8959_v14  ;;  %v8250_v12 = vpop.eup %8249 }
0x1b60   :  { %v3479_v4 = vmul.f32 %v8250_v12, %v8957_v13  ;;  %v8252_v31 = vpop.eup %8251  ;;  %7883 = vmatprep.subr.bf16.mxu1 %v7882_v3  ;;  %v6904_v13 = vld [vmem:[%s8692_s15 + $0x68] sm:$0xff]  ;;  %s6788_s15 = sld [smem:[%s9620_s0 + %s8361_s26]]   ;;  %s8366_s26 = smov 21  }
0x1b61   :  { %7514 = vmatmul.mubr.msk.f32.vlgmr.msra.gmra.mrb[26].mxu0 %vm537_vm9, %v2792_v57  ;;  %v3646_v27 = vmul.f32 %v8252_v31, %v8965_v18  ;;  %7885 = vmatpush3.bf16.msra.mxu1 %v7882_v3  ;;  %v7886_v6 = vpack.c.bf16 %v6904_v13, %v6903_v10  ;;  %v6918_v10 = vld [vmem:[%s8740_s23 + $0xb8] sm:$0xff] }
0x1b62   :  { %7522 = vmatpush3.msk.msra.mxu0 %vm251_vm2, %v2961_v9  ;;  %7523 = vmatprep.mubr.msk.f32.mxu0 %vm8347_vm5, %v8344_v44 }
0x1b63   :  { %7531 = vmatprep.subr.mxu0 %v8344_v44  ;;  %7887 = vmatprep.subr.bf16.mxu1 %v7886_v6 }
0x1b65   :  { %7524 = vmatmul.mubr.msk.f32.vlgmr.msra.gmra.mrb[28].mxu0 %vm537_vm9, %v2959_v16  ;;  %7889 = vmatpush3.bf16.msra.mxu1 %v7886_v6  ;;  %v6908_v16 = vld [vmem:[%s8720_s19 + $0x1] ss:$0 sm:$0xff]  ;;  %v6917_v6 = vld [vmem:[%s8740_s23 + $0xb0] sm:$0xff] }
0x1b66   :  { %7532 = vmatpush3.msk.msra.mxu0 %vm251_vm2, %v3147_v23  ;;  %7533 = vmatprep.mubr.msk.f32.mxu0 %vm8347_vm5, %v8344_v44 }
0x1b67   :  { %7541 = vmatprep.subr.mxu0 %v8344_v44  ;;  %7891 = vmatprep.subr.bf16.mxu1 %v7890_v22 }
0x1b69   :  { %7534 = vmatmul.mubr.msk.f32.vlgmr.msra.gmra.mrb[30].mxu0 %vm537_vm9, %v3143_v50  ;;  %7893 = vmatpush3.bf16.msra.mxu1 %v7890_v22  ;;  %v6919_v22 = vld [vmem:[%s8740_s23 + $0xc0] sm:$0xff] }
0x1b6a   :  { %7542 = vmatpush3.msk.msra.mxu0 %vm251_vm2, %v3314_v53  ;;  %7543 = vmatprep.mubr.msk.f32.mxu0 %vm8347_vm5, %v8344_v44 }
0x1b6b   :  { %7551 = vmatprep.subr.mxu0 %v8344_v44 }
0x1b6d   :  { %7544 = vmatmul.mubr.msk.f32.vlgmr.msra.gmra.mrb[32].mxu0 %vm537_vm9, %v3312_v33 }
0x1b6e   :  { %7552 = vmatpush3.msk.msra.mxu0 %vm251_vm2, %v3481_v11  ;;  %7553 = vmatprep.mubr.msk.f32.mxu0 %vm8347_vm5, %v8344_v44 }
0x1b6f   :  { %7561 = vmatprep.subr.mxu0 %v8344_v44 }
0x1b71   :  { %7554 = vmatmul.mubr.msk.f32.vlgmr.msra.gmra.mrb[34].mxu0 %vm537_vm9, %v3479_v4 }
0x1b72   :  { %7562 = vmatpush3.msk.msra.mxu0 %vm251_vm2, %v3648_v54  ;;  %7563 = vmatprep.mubr.msk.f32.mxu0 %vm8347_vm5, %v8344_v44 }
0x1b75   :  { %7564 = vmatmul.mubr.msk.f32.vlgmr.msra.gmra.mrb[36].mxu0 %vm537_vm9, %v3646_v27 }
0x1b76   :  { %3980 = vmatprep.mubr.f32.mxu0 %v8344_v44 }
0x1c30   :  { %v2699_v59 = vpop.f32.mrb[24].mxu0 }
0x1c31   :  { %3038 = vrot.lane.b32.xlu0 %v2699_v59, %s8354_s11  ;;  %v7505_v61 = vpop.f32.mrb[25].mxu0 }
0x1c32   :  { %v6912_v61 = vld [vmem:[%s8740_s23 + $0x88] sm:$0xff] }
0x1c34   :  { %v2866_v62 = vpop.f32.mrb[26].mxu0 }
0x1c35   :  { %v7515_v2 = vpop.f32.mrb[27].mxu0 }
0x1c36   :  { %v6913_v2 = vld [vmem:[%s8740_s23 + $0x90] sm:$0xff] }
0x1c37   :  { %v7896_v3 = vpack.c.bf16 %v6913_v2, %v6911_v1  ;;  %v6956_v1 = vld [vmem:[%s8775_s28 + $0x1b0] sm:$0xff]  ;;  %v6957_v2 = vld [vmem:[%s8775_s28 + $0x1b8] sm:$0xff] }
0x1c38   :  { %v3033_v7 = vpop.f32.mrb[28].mxu0 }
0x1c39   :  { %v7525_v14 = vpop.f32.mrb[29].mxu0 }
0x1c3a   :  { %v6915_v14 = vld [vmem:[%s8740_s23 + $0xa0] sm:$0xff] }
0x1c3c   :  { %v3219_v15 = vpop.f32.mrb[30].mxu0 }
0x1c3d   :  { %v7535_v18 = vpop.f32.mrb[31].mxu0 }
0x1c3e   :  { %v6920_v18 = vld [vmem:[%s8740_s23 + $0xc8] sm:$0xff] }
0x1c3f   :  { %v7902_v20 = vpack.c.bf16 %v6922_v19, %v6920_v18  ;;  %v6942_v18 = vld [vmem:[%s8775_s28 + $0x140] sm:$0xff]  ;;  %v6943_v19 = vld [vmem:[%s8775_s28 + $0x148] sm:$0xff] }
0x1c40   :  { %v3386_v23 = vpop.f32.mrb[32].mxu0 }
0x1c41   :  { %3725 = vrot.lane.b32.xlu0 %v3386_v23, %s8354_s11  ;;  %v7545_v26 = vpop.f32.mrb[33].mxu0  ;;  %v6921_v23 = vld [vmem:[%s8740_s23 + $0xd0] sm:$0xff] }
0x1c42   :  { %v7904_v26 = vpack.c.bf16 %v6921_v23, %v6919_v22  ;;  %v6960_v22 = vld [vmem:[%s8775_s28 + $0x1d0] sm:$0xff]  ;;  %v6961_v23 = vld [vmem:[%s8775_s28 + $0x1d8] sm:$0xff] }
0x1c44   :  { %v3553_v29 = vpop.f32.mrb[34].mxu0 }
0x1c45   :  { %3042 = vrot.lane.b32.xlu0 %v2866_v62, %s8351_s8  ;;  %3729 = vrot.lane.b32.xlu1 %v3553_v29, %s8351_s8  ;;  %v7555_v48 = vpop.f32.mrb[35].mxu0  ;;  %v6914_v62 = vld [vmem:[%s8740_s23 + $0x98] sm:$0xff]  ;;  %v6924_v29 = vld [vmem:[%s8740_s23 + $0xe8] sm:$0xff] }
0x1c46   :  { %v7894_v63 = vpack.c.bf16 %v6914_v62, %v6912_v61  ;;  %v6926_v48 = vld [vmem:[%s8740_s23 + $0xf8] sm:$0xff]  ;;  %v6938_v61 = vld [vmem:[%s8775_s28 + $0x120] sm:$0xff]  ;;  %v6939_v62 = vld [vmem:[%s8775_s28 + $0x128] sm:$0xff] }
0x1c48   :  { %v3720_v30 = vpop.f32.mrb[36].mxu0  ;;  %7895 = vmatprep.subr.bf16.mxu0 %v7894_v63  ;;  %v7920_v63 = vpack.c.bf16 %v6939_v62, %v6938_v61 }
0x1c49   :  { %3733 = vrot.lane.b32.xlu1 %v3720_v30, %s8350_s7  ;;  %v7565_v37 = vpop.f32.mrb[37].mxu0  ;;  %7897 = vmatpush1.bf16.msra.mxu0 %v7896_v3  ;;  %v6923_v30 = vld [vmem:[%s8740_s23 + $0xe0] sm:$0xff]  ;;  %v7922_v3 = vpack.c.bf16 %v6957_v2, %v6956_v1 }
0x1c4a   :  { %v7906_v37 = vpack.c.bf16 %v6926_v48, %v6924_v29  ;;  %v6944_v29 = vld [vmem:[%s8775_s28 + $0x150] sm:$0xff]  ;;  %v6945_v48 = vld [vmem:[%s8775_s28 + $0x158] sm:$0xff] }
0x1c4d   :  { %3046 = vrot.lane.b32.xlu1 %v3033_v7, %s8350_s7  ;;  %v6916_v7 = vld [vmem:[%s8740_s23 + $0xa8] sm:$0xff] }
0x1c4e   :  { %v7898_v13 = vpack.c.bf16 %v6918_v10, %v6916_v7  ;;  %v6940_v7 = vld [vmem:[%s8775_s28 + $0x130] sm:$0xff]  ;;  %v6941_v10 = vld [vmem:[%s8775_s28 + $0x138] sm:$0xff] }
0x1c50   :  { %7899 = vmatprep.subr.bf16.mxu0 %v7898_v13  ;;  %v7924_v13 = vpack.c.bf16 %v6941_v10, %v6940_v7 }
0x1ca3   :  { %v3039_v35 = vpop.permute.xlu0 %3038 }
0x1ca4   :  { %v3049_v42 = vsel %vm449_vm6, %v8937_v17, %v3039_v35  ;;  %v6925_v35 = vld [vmem:[%s8740_s23 + $0xf0] sm:$0xff]  ;;  %s6787_s23 = sld [smem:[%s9620_s0 + %s8354_s11]]  }
0x1cb3   :  { %v3726_v36 = vpop.permute.xlu0 %3725 }
0x1cb4   :  { %v3736_v24 = vsel %vm449_vm6, %v3219_v15, %v3726_v36  ;;  %v7900_v15 = vpack.c.bf16 %v6917_v6, %v6915_v14  ;;  %v7908_v36 = vpack.c.bf16 %v6925_v35, %v6923_v30  ;;  %v6958_v14 = vld [vmem:[%s8775_s28 + $0x1c0] sm:$0xff]  ;;  %v6959_v6 = vld [vmem:[%s8775_s28 + $0x1c8] sm:$0xff]  ;;  %v7932_v30 = vpack.c.bf16 %v6945_v48, %v6944_v29 }
0x1cb5   :  { %v6963_v35 = vld [vmem:[%s8775_s28 + $0x1e8] sm:$0xff] }
0x1cb6   :  { %7901 = vmatpush1.bf16.msra.mxu0 %v7900_v15  ;;  %v7926_v15 = vpack.c.bf16 %v6959_v6, %v6958_v14 }
0x1cb7   :  { %v3730_v60 = vpop.permute.xlu1 %3729  ;;  %v3043_v40 = vpop.permute.xlu0 %3042  ;;  %7903 = vmatprep.subr.bf16.mxu0 %v7902_v20  ;;  %v7928_v20 = vpack.c.bf16 %v6943_v19, %v6942_v18 }
0x1cb8   :  { %v3737_v49 = vsel %vm1128_vm11, %v3736_v24, %v3730_v60  ;;  %v3050_v43 = vsel %vm1128_vm11, %v3049_v42, %v3043_v40  ;;  %v3871_v42 = vrot.slane %v8858_v8, %v8759_v32 }
0x1cba   :  { %7905 = vmatpush1.bf16.msra.mxu0 %v7904_v26  ;;  %v7930_v26 = vpack.c.bf16 %v6961_v23, %v6960_v22 }
0x1cbb   :  { %v3734_v38 = vpop.permute.xlu1 %3733  ;;  %7907 = vmatprep.subr.bf16.mxu0 %v7906_v37  ;;  %v6962_v37 = vld [vmem:[%s8775_s28 + $0x1e0] sm:$0xff] }
0x1cbc   :  { %v3738_v52 = vsel %vm1130_vm10, %v3737_v49, %v3734_v38 }
0x1cbd   :  { %v3740_v45 = vrot.slane %v3738_v52, 3 }
0x1cbe   :  { %7909 = vmatpush1.bf16.msra.mxu0 %v7908_v36  ;;  %v7934_v36 = vpack.c.bf16 %v6963_v35, %v6962_v37  ;;  %v4250_v37 = vld [vmem:[%s6788_s15] sm:$0xff]  ;;  %s9198_s15 = sld [smem:[%s9620_s0 + %s8366_s26]]  }
0x1cbf   :  { %v3047_v57 = vpop.permute.xlu1 %3046  ;;  %7942 = vmatprep.subr.bf16.mxu0 %v8337_v0  ;;  %v4251_v35 = vld [vmem:[%s6789_s20] sm:$0xff]  ;;  %s9281_s20 = sld [smem:[%s9620_s0 + %s8367_s17]]   ;;  %s8372_s17 = smov 27  }
0x1cc0   :  { %v3051_v47 = vsel %vm1130_vm10, %v3050_v43, %v3047_v57  ;;  %v3877_v57 = vrot.slane %v8858_v8, %v8762_v34  ;;  %v6950_v8 = vld [vmem:[%s8775_s28 + $0x180] sm:$0xff] }
0x1cc1   :  { %v3742_v9 = vsel %vm251_vm2, %v3051_v47, %v3740_v45 }
0x1cc2   :  { %7582 = vmatprep.mubr.msk.f32.mxu1 %vm153_vm0, %v3742_v9 }
0x1cc3   :  { %7583 = vmatmul.mubr.msk.f32.vlgmr.msra.gmra.mrb[46].mxu1 %vm153_vm0, %v3740_v45 }
0x1d96   :  { %v7584_v28 = vpop.f32.mrb[46].mxu1 }
0x1d97   :  { %v3831_v50 = vpop.f32.mrb[47].mxu1  ;;  %v3837_v51 = vadd.f32 %v7584_v28, %v6908_v16 }
0x1d98   :  { %v3832_v53 = vadd.f32 %v6908_v16, %v3831_v50 }
0x1d99   :  { %v3841_v17 = vadd.f32 %v3837_v51, %v8832_v25 }
0x1d9a   :  { %v9047_v33 = vadd.f32 %v3832_v53, %v8827_v21  ;;  %v6951_v53 = vld [vmem:[%s8775_s28 + $0x188] sm:$0xff] }
0x1d9b   :  { %v3845_v11 = vsel %vm259_vm4, %v3841_v17, 0.0 }
0x1d9c   :  { %v3842_v12 = vsel %vm153_vm0, %v9047_v33, 0.0 }
0x1d9d   :  { %3843 = vadd.xlane.f32.xlu0 %v3842_v12  ;;  %v6934_v12 = vld [vmem:[%s8775_s28 + $0x100] sm:$0xff] }
0x1da1   :  { %3846 = vadd.xlane.f32.xlu0 %v3845_v11  ;;  %v6935_v11 = vld [vmem:[%s8775_s28 + $0x108] sm:$0xff] }
0x1e2a   :  { %v3844_v4 = vpop.xlane.xlu0 %3843 }
0x1e2b   :  { %v3848_v31 = vmul.f32 0.015625, %v3844_v4  ;;  %v7912_v4 = vpack.c.bf16 %v6935_v11, %v6934_v12 }
0x1e2d   :  { %v3850_v54 = vsub.f32 %v9047_v33, %v3848_v31  ;;  %v6952_v31 = vld [vmem:[%s8775_s28 + $0x190] sm:$0xff] }
0x1e2e   :  { %v3847_v27 = vpop.xlane.xlu0 %3846 }
0x1e2f   :  { %v3849_v21 = vmul.f32 0.015625, %v3847_v27  ;;  %v3852_v55 = vmul.f32 %v3850_v54, %v3850_v54 }
0x1e31   :  { %v3851_v25 = vsub.f32 %v3841_v17, %v3849_v21  ;;  %v3854_v56 = vsel %vm153_vm0, %v3852_v55, 0.0  ;;  %v7910_v17 = vpack.c.bf16 %v6951_v53, %v6950_v8  ;;  %v6936_v21 = vld [vmem:[%s8775_s28 + $0x110] sm:$0xff]  ;;  %v6937_v55 = vld [vmem:[%s8775_s28 + $0x118] sm:$0xff] }
0x1e32   :  { %3855 = vadd.xlane.f32.xlu1 %v3854_v56  ;;  %v6954_v56 = vld [vmem:[%s8775_s28 + $0x1a0] sm:$0xff] }
0x1e33   :  { %v3853_v58 = vmul.f32 %v3851_v25, %v3851_v25  ;;  %7911 = vmatprep.subr.bf16.mxu1 %v7910_v17 }
0x1e34   :  { %7913 = vmatpush3.bf16.msra.mxu1 %v7912_v4 }
0x1e35   :  { %v3857_v59 = vsel %vm259_vm4, %v3853_v58, 0.0  ;;  %v6955_v58 = vld [vmem:[%s8775_s28 + $0x1a8] sm:$0xff] }
0x1e36   :  { %3858 = vadd.xlane.f32.xlu1 %v3857_v59  ;;  %v7918_v59 = vpack.c.bf16 %v6955_v58, %v6954_v56 }
0x1ebf   :  { %v3856_v60 = vpop.xlane.xlu1 %3855 }
0x1ec0   :  { %v3860_v24 = vmul.f32 0.015625, %v3856_v60  ;;  %v6946_v60 = vld [vmem:[%s8775_s28 + $0x160] sm:$0xff] }
0x1ec2   :  { %v3862_v49 = vadd.f32 1e-05, %v3860_v24  ;;  %v6947_v24 = vld [vmem:[%s8775_s28 + $0x168] sm:$0xff] }
0x1ec3   :  { %v3859_v38 = vpop.xlane.xlu1 %3858 }
0x1ec4   :  { %8253 = vrsqrt.f32 %v3862_v49  ;;  %v3861_v40 = vmul.f32 0.015625, %v3859_v38  ;;  %v7936_v49 = vpack.c.bf16 %v6947_v24, %v6946_v60  ;;  %v6964_v38 = vld [vmem:[%s8775_s28 + $0x1f0] sm:$0xff]  ;;  %v9128_v60 = vadd.f32 %v4251_v35, %v4250_v37 }
0x1ec6   :  { %v3863_v52 = vadd.f32 1e-05, %v3861_v40  ;;  %v6965_v40 = vld [vmem:[%s8775_s28 + $0x1f8] sm:$0xff] }
0x1ec8   :  { %8255 = vrsqrt.f32 %v3863_v52  ;;  %v7938_v52 = vpack.c.bf16 %v6965_v40, %v6964_v38  ;;  %v4254_v38 = vsel %vm153_vm0, %v9128_v60, 0.0 }
0x1ece   :  { %v8254_v43 = vpop.eup %8253 }
0x1ecf   :  { %v3866_v45 = vmul.f32 %v8254_v43, %v3850_v54  ;;  %v6953_v54 = vld [vmem:[%s8775_s28 + $0x198] sm:$0xff] }
0x1ed0   :  { %v7914_v27 = vpack.c.bf16 %v6953_v54, %v6952_v31  ;;  %v6949_v43 = vld [vmem:[%s8775_s28 + $0x178] sm:$0xff] }
0x1ed1   :  { %v3872_v47 = vmul.f32 %v3871_v42, %v3866_v45 }
0x1ed2   :  { %v8256_v9 = vpop.eup %8255  ;;  %7915 = vmatprep.subr.bf16.mxu1 %v7914_v27 }
0x1ed3   :  { %v3878_v16 = vadd.f32 %v3877_v57, %v3872_v47  ;;  %v3867_v28 = vmul.f32 %v8256_v9, %v3851_v25  ;;  %v7916_v25 = vpack.c.bf16 %v6937_v55, %v6936_v21 }
0x1ed5   :  { %6928 = vmatmul.mubr.msk.f32.vlgmr.msra.gmra.mrb[38].mxu0 %vm153_vm0, %v3878_v16  ;;  %v3873_v50 = vmul.f32 %v3871_v42, %v3867_v28  ;;  %7917 = vmatpush3.bf16.msra.mxu1 %v7916_v25  ;;  %v6948_v42 = vld [vmem:[%s8775_s28 + $0x170] sm:$0xff]  ;;  %s9150_s28 = sld [smem:[%s9620_s0 + %s8363_s24]]  }
0x1ed6   :  { %3986 = vmatprep.mubr.f32.mxu0 %v8344_v44  ;;  %7919 = vmatprep.subr.bf16.mxu1 %v7918_v59  ;;  %v7940_v45 = vpack.c.bf16 %v6949_v43, %v6948_v42  ;;  %s9304_s24 = sld [smem:[%s9620_s0 + %s8368_s21]]  }
0x1ed7   :  { %v3879_v51 = vadd.f32 %v3877_v57, %v3873_v50  ;;  %v6927_v57 = vld [vmem:[%s8813_s3 + $0x2] sm:$0x3]  ;;  %s6786_s3 = sld [smem:[%s9620_s0 + %s8364_s29]]  }
0x1ed8   :  { %v3903_v47 = vrot.slane %v6927_v57, %v8440_v46  ;;  %v3907_v9 = vrot.slane %v6927_v57, %v8452_v5  ;;  %s9392_s21 = sld [smem:[%s9620_s0 + %s8372_s17]]  }
0x1ed9   :  { %6929 = vmatmul.mubr.msk.f32.gmra.mrb[40].mxu0 %vm153_vm0, %v3879_v51  ;;  %7921 = vmatpush3.bf16.msra.mxu1 %v7920_v63 }
0x1eda   :  { %7601 = vmatprep.mubr.msk.f32.mxu0 %vm8347_vm5, %v8344_v44  ;;  %7923 = vmatprep.subr.bf16.mxu1 %v7922_v3 }
0x1edb   :  { %v4285_v35 = vld [vmem:[%s9150_s28 + $0x40] sm:$0xff] }
0x1edd   :  { %7925 = vmatpush3.bf16.msra.mxu1 %v7924_v13 }
0x1ede   :  { %7927 = vmatprep.subr.bf16.mxu1 %v7926_v15 }
0x1ee1   :  { %7929 = vmatpush3.bf16.msra.mxu1 %v7928_v20  ;;  %v6967_v20 = vld [vmem:[%s8823_s16 + $0x1] ss:$0 sm:$0xff]  ;;  %s9167_s16 = sld [smem:[%s9620_s0 + %s8365_s12]]  }
0x1ee2   :  { %7931 = vmatprep.subr.bf16.mxu1 %v7930_v26 }
0x1ee5   :  { %7933 = vmatpush3.bf16.msra.mxu1 %v7932_v30 }
0x1ee6   :  { %7935 = vmatprep.subr.bf16.mxu1 %v7934_v36 }
0x1ee9   :  { %7937 = vmatpush3.bf16.msra.mxu1 %v7936_v49 }
0x1eea   :  { %7939 = vmatprep.subr.bf16.mxu1 %v7938_v52 }
0x1eed   :  { %7941 = vmatpush3.bf16.msra.mxu1 %v7940_v45 }
0x1eee   :  { %7609 = vmatprep.subr.mxu1 %v8344_v44 }
0x1fa8   :  { %v3982_v16 = vpop.f32.mrb[38].mxu0 }
0x1fa9   :  { %v3983_v28 = vadd.f32 %v3982_v16, %v3903_v47  ;;  %v3984_v50 = vpop.f32.mrb[39].mxu0 }
0x1faa   :  { %v3985_v51 = vadd.f32 %v3984_v50, %v3907_v9  ;;  %v4170_v50 = vld [vmem:[%s6787_s23 + $0x8] sm:$0xff] }
0x1fab   :  { %v6930_v8 = vmul.f32 -1.702, %v3983_v28 }
0x1fac   :  { %v6931_v53 = vmul.f32 -1.702, %v3985_v51  ;;  %v3988_v17 = vpop.f32.mrb[40].mxu0 }
0x1fad   :  { %v4001_v12 = vmul.f32 1.442695, %v6930_v8  ;;  %v3989_v11 = vadd.f32 %v3988_v17, %v3903_v47  ;;  %v3990_v4 = vpop.f32.mrb[41].mxu0  ;;  %v4171_v8 = vld [vmem:[%s6787_s23 + $0x10] sm:$0xff] }
0x1fae   :  { %v4003_v31 = vmul.f32 1.442695, %v6931_v53  ;;  %v3991_v54 = vadd.f32 %v3990_v4, %v3907_v9  ;;  %v4172_v53 = vld [vmem:[%s6787_s23 + $0x18] sm:$0xff] }
0x1faf   :  { %8257 = vpow2.f32 %v4001_v12  ;;  %v6932_v27 = vmul.f32 -1.702, %v3989_v11  ;;  %v7946_v17 = vpack.c.bf16 %v4172_v53, %v4171_v8  ;;  %v4173_v12 = vld [vmem:[%s6787_s23 + $0x20] sm:$0xff] }
0x1fb0   :  { %8259 = vpow2.f32 %v4003_v31  ;;  %v6933_v21 = vmul.f32 -1.702, %v3991_v54  ;;  %v4175_v31 = vld [vmem:[%s6787_s23 + $0x30] sm:$0xff]  ;;  %v4293_v8 = vld [vmem:[%s9198_s15] sm:$0x3] }
0x1fb1   :  { %v4005_v55 = vmul.f32 1.442695, %v6932_v27  ;;  %v4298_v53 = vrot.slane %v4293_v8, %v8440_v46 }
0x1fb2   :  { %v4007_v25 = vmul.f32 1.442695, %v6933_v21  ;;  %v4278_v21 = vld [vmem:[%s9150_s28 + $0x8] sm:$0xff] }
0x1fb3   :  { %8261 = vpow2.f32 %v4005_v55  ;;  %v4280_v55 = vld [vmem:[%s9150_s28 + $0x18] sm:$0xff] }
0x1fb4   :  { %8263 = vpow2.f32 %v4007_v25  ;;  %v7954_v25 = vpack.c.bf16 %v4280_v55, %v4278_v21 }
0x1fb9   :  { %v8258_v56 = vpop.eup %8257 }
0x1fba   :  { %v8260_v58 = vpop.eup %8259  ;;  %v4009_v59 = vadd.f32 1.0, %v8258_v56 }
0x1fbb   :  { %v4010_v61 = vadd.f32 1.0, %v8260_v58 }
0x1fbc   :  { %8265 = vrcp.f32 %v4009_v59 }
0x1fbd   :  { %v8262_v62 = vpop.eup %8261  ;;  %8267 = vrcp.f32 %v4010_v61 }
0x1fbe   :  { %v8264_v63 = vpop.eup %8263  ;;  %v4011_v1 = vadd.f32 1.0, %v8262_v62 }
0x1fbf   :  { %v4012_v2 = vadd.f32 1.0, %v8264_v63  ;;  %v4145_v63 = vld [vmem:[%s6786_s3] sm:$0x3] }
0x1fc0   :  { %8269 = vrcp.f32 %v4011_v1 }
0x1fc1   :  { %8271 = vrcp.f32 %v4012_v2  ;;  %v4162_v2 = vrot.slane %v4145_v63, %v8440_v46 }
0x1fc6   :  { %v8266_v3 = vpop.eup %8265 }
0x1fc7   :  { %v8268_v7 = vpop.eup %8267  ;;  %v4021_v13 = vmul.f32 %v8266_v3, %v3983_v28  ;;  %v4169_v28 = vld [vmem:[%s6787_s23] sm:$0xff] }
0x1fc8   :  { %v4022_v10 = vmul.f32 %v8268_v7, %v3985_v51  ;;  %v7943_v51 = vpack.c.bf16 %v4170_v50, %v4169_v28  ;;  %v4167_v7 = vrot.slane %v4145_v63, %v8452_v5 }
0x1fca   :  { %v8270_v14 = vpop.eup %8269  ;;  %4130 = vmatprep.mubr.f32.mxu1 %v4022_v10  ;;  %7944 = vmatpush3.bf16.msra.mxu0 %v7943_v51 }
0x1fcb   :  { %v8272_v6 = vpop.eup %8271  ;;  %4131 = vmatmul.mubr.f32.vlgmr.msra.gmra.mrb[48].mxu1 %v4021_v13  ;;  %v4023_v18 = vmul.f32 %v8270_v14, %v3989_v11  ;;  %7945 = vmatprep.subr.bf16.mxu0 %v8337_v0  ;;  %v4174_v11 = vld [vmem:[%s6787_s23 + $0x28] sm:$0xff]  ;;  %v4277_v13 = vld [vmem:[%s9150_s28] sm:$0xff]  ;;  %v4279_v14 = vld [vmem:[%s9150_s28 + $0x10] sm:$0xff] }
0x1fcc   :  { %v4024_v15 = vmul.f32 %v8272_v6, %v3991_v54  ;;  %v7949_v4 = vpack.c.bf16 %v4174_v11, %v4173_v12  ;;  %v4176_v54 = vld [vmem:[%s6787_s23 + $0x38] sm:$0xff]  ;;  %v4282_v6 = vld [vmem:[%s9150_s28 + $0x28] sm:$0xff] }
0x1fcd   :  { %v7952_v27 = vpack.c.bf16 %v4176_v54, %v4175_v31 }
0x1fce   :  { %4135 = vmatprep.mubr.f32.mxu1 %v4024_v15  ;;  %7947 = vmatpush3.bf16.msra.mxu0 %v7946_v17  ;;  %v4284_v15 = vld [vmem:[%s9150_s28 + $0x38] sm:$0xff]  ;;  %v4302_v17 = vrot.slane %v4293_v8, %v8452_v5 }
0x1fcf   :  { %4136 = vmatmul.mubr.f32.gmra.mrb[50].mxu1 %v4023_v18  ;;  %7948 = vmatprep.subr.bf16.mxu0 %v8337_v0 }
0x1fd0   :  { %7611 = vmatprep.mubr.msk.f32.mxu1 %vm8347_vm5, %v8344_v44 }
0x1fd2   :  { %7950 = vmatpush3.bf16.msra.mxu0 %v7949_v4 }
0x1fd3   :  { %7951 = vmatprep.subr.bf16.mxu0 %v8337_v0 }
0x1fd6   :  { %7953 = vmatpush3.bf16.msra.mxu0 %v7952_v27 }
0x1fd7   :  { %7955 = vmatprep.subr.bf16.mxu0 %v7954_v25 }
0x209e   :  { %v7241_v19 = vpop.f32.mrb[48].mxu1 }
0x209f   :  { %v7242_v22 = vpop.f32.mrb[49].mxu1 }
0x20a0   :  { %v7243_v23 = vadd.f32 %v7242_v22, %v7241_v19  ;;  %v7956_v19 = vpack.c.bf16 %v4279_v14, %v4277_v13  ;;  %v7958_v22 = vpack.c.bf16 %v4284_v15, %v4282_v6 }
0x20a2   :  { %v4133_v26 = vadd.f32 %v7243_v23, %v6967_v20  ;;  %v7244_v29 = vpop.f32.mrb[50].mxu1  ;;  %v4281_v23 = vld [vmem:[%s9150_s28 + $0x20] sm:$0xff] }
0x20a3   :  { %v7245_v48 = vpop.f32.mrb[51].mxu1  ;;  %v4286_v29 = vld [vmem:[%s9150_s28 + $0x48] sm:$0xff] }
0x20a4   :  { %v4140_v30 = vadd.f32 %v4133_v26, %v9047_v33  ;;  %v4283_v26 = vld [vmem:[%s9150_s28 + $0x30] sm:$0xff]  ;;  %v4288_v48 = vld [vmem:[%s9150_s28 + $0x58] sm:$0xff] }
0x20a5   :  { %v7962_v37 = vpack.c.bf16 %v4288_v48, %v4286_v29 }
0x20a6   :  { %v4142_v36 = vrot.slane %v4140_v30, 4 }
0x20a8   :  { %v4144_v24 = vsel %vm249_vm1, %v4140_v30, %v4142_v36  ;;  %v7960_v30 = vpack.c.bf16 %v4283_v26, %v4281_v23  ;;  %v4287_v36 = vld [vmem:[%s9150_s28 + $0x50] sm:$0xff]  ;;  %vm6751_vm1 = vcmask 253952  }
0x20a9   :  { %v4146_v49 = vsel %vm259_vm4, %v4144_v24, 0.0 }
0x20aa   :  { %4147 = vadd.xlane.f32.xlu0 %v4146_v49  ;;  %v4290_v49 = vld [vmem:[%s9150_s28 + $0x68] sm:$0xff] }
0x20ae   :  { %4255 = vadd.xlane.f32.xlu0 %v4254_v38  ;;  %v4292_v38 = vld [vmem:[%s9150_s28 + $0x78] sm:$0xff] }
0x2137   :  { %v4148_v40 = vpop.xlane.xlu0 %4147 }
0x2138   :  { %v4149_v52 = vmul.f32 0.015625, %v4148_v40  ;;  %v9180_v40 = vld [vmem:[%s9167_s16] sm:$0xf] }
0x2139   :  { %v4275_v28 = vrot.slane %v9180_v40, %v8452_v5 }
0x213a   :  { %v4150_v42 = vsub.f32 %v4144_v24, %v4149_v52  ;;  %v7964_v52 = vpack.c.bf16 %v4287_v36, %v4285_v35 }
0x213b   :  { %v4256_v43 = vpop.xlane.xlu0 %4255 }
0x213c   :  { %v4257_v45 = vmul.f32 0.015625, %v4256_v43  ;;  %v4151_v33 = vmul.f32 %v4150_v42, %v4150_v42  ;;  %v7966_v43 = vpack.c.bf16 %v4292_v38, %v4290_v49 }
0x213e   :  { %v9135_v57 = vsub.f32 %v9128_v60, %v4257_v45  ;;  %v4152_v47 = vsel %vm259_vm4, %v4151_v33, 0.0  ;;  %v4289_v45 = vld [vmem:[%s9150_s28 + $0x60] sm:$0xff]  ;;  %v4291_v33 = vld [vmem:[%s9150_s28 + $0x70] sm:$0xff] }
0x213f   :  { %4153 = vadd.xlane.f32.xlu0 %v4152_v47  ;;  %v4270_v47 = vrot.slane %v9180_v40, %v8440_v46 }
0x2140   :  { %v4259_v9 = vmul.f32 %v9135_v57, %v9135_v57 }
0x2142   :  { %v4260_v16 = vsel %vm153_vm0, %v4259_v9, 0.0  ;;  %v7968_v9 = vpack.c.bf16 %v4291_v33, %v4289_v45 }
0x2143   :  { %4261 = vadd.xlane.f32.xlu1 %v4260_v16 }
0x21cc   :  { %v4154_v56 = vpop.xlane.xlu0 %4153 }
0x21cd   :  { %v4155_v58 = vmul.f32 0.015625, %v4154_v56 }
0x21cf   :  { %v4156_v59 = vadd.f32 1e-05, %v4155_v58 }
0x21d0   :  { %v4262_v61 = vpop.xlane.xlu1 %4261 }
0x21d1   :  { %8273 = vrsqrt.f32 %v4156_v59  ;;  %v4263_v62 = vmul.f32 0.015625, %v4262_v61  ;;  %v9235_v59 = vand.u32 127, %v241_v39 }
0x21d3   :  { %v4264_v1 = vadd.f32 1e-05, %v4263_v62  ;;  %vm9239_vm12 = vcmp.ge.s32.totalorder %v8437_v41, %v9235_v59 }
0x21d5   :  { %8275 = vrsqrt.f32 %v4264_v1 }
0x21db   :  { %v8274_v3 = vpop.eup %8273 }
0x21dc   :  { %v4158_v10 = vmul.f32 %v8274_v3, %v4150_v42 }
0x21de   :  { %v4163_v18 = vmul.f32 %v4162_v2, %v4158_v10 }
0x21df   :  { %v8276_v24 = vpop.eup %8275 }
0x21e0   :  { %v4168_v20 = vadd.f32 %v4167_v7, %v4163_v18  ;;  %v4266_v42 = vmul.f32 %v8276_v24, %v9135_v57 }
0x21e2   :  { %7602 = vmatmul.mubr.msk.f32.vlgmr.msra.gmra.mrb[42].mxu0 %vm153_vm0, %v4168_v20  ;;  %v4271_v16 = vmul.f32 %v4270_v47, %v4266_v42 }
0x21e3   :  { %7957 = vmatpush1.bf16.msra.mxu0 %v7956_v19  ;;  %4372 = vmatprep.mubr.f32.mxu0 %v8344_v44 }
0x21e4   :  { %7959 = vmatprep.subr.bf16.mxu0 %v7958_v22  ;;  %v4276_v50 = vadd.f32 %v4275_v28, %v4271_v16 }
0x21e7   :  { %7961 = vmatpush1.bf16.msra.mxu0 %v7960_v30 }
0x21e8   :  { %7963 = vmatprep.subr.bf16.mxu0 %v7962_v37 }
0x21eb   :  { %7965 = vmatpush1.bf16.msra.mxu0 %v7964_v52 }
0x21ec   :  { %7967 = vmatprep.subr.bf16.mxu0 %v7966_v43 }
0x21ef   :  { %7969 = vmatpush1.bf16.msra.mxu0 %v7968_v9 }
0x21f0   :  { %7604 = vmatprep.subr.mxu0 %v8344_v44 }
0x21f2   :  { %6969 = vmatmul.mubr.msk.f32.vlgmr.msra.gmra.mrb[44].mxu0 %vm153_vm0, %v4276_v50 }
0x21f3   :  { %7606 = vmatprep.mubr.msk.f32.mxu0 %vm8347_vm5, %v8344_v44 }
0x22b5   :  { %v9193_v57 = vpop.f32.mrb[42].mxu0 }
0x22b6   :  { %v7603_v51 = vpop.f32.mrb[43].mxu0 }
0x22c5   :  { %v4374_v12 = vpop.f32.mrb[44].mxu0 }
0x22c6   :  { %v4375_v11 = vadd.f32 %v4374_v12, %v4298_v53  ;;  %v4376_v4 = vpop.f32.mrb[45].mxu0 }
0x22c7   :  { %v9203_v31 = vadd.f32 %v4376_v4, %v4302_v17 }
0x22c8   :  { %4550 = vrot.lane.b32.xlu1 %v4375_v11, %s8350_s7  ;;  %4380 = vrot.lane.b32.xlu0 %v4375_v11, %s8348_s5 }
0x22c9   :  { %7610 = vmatpush3.msra.mxu1 %v9203_v31 }
0x22ca   :  { %7619 = vmatprep.subr.mxu1 %v8344_v44 }
0x22cc   :  { %4548 = vrot.lane.b32.xlu1 %v4375_v11, %s8349_s6  ;;  %4716 = vrot.lane.b32.xlu0 %v4375_v11, %s8352_s9 }
0x22d0   :  { %4718 = vrot.lane.b32.xlu1 %v4375_v11, %s8351_s8  ;;  %4883 = vrot.lane.b32.xlu0 %v4375_v11, %s8353_s10 }
0x22d4   :  { %4885 = vrot.lane.b32.xlu1 %v4375_v11, %s8354_s11 }
0x233a   :  { %v4551_v54 = vpop.permute.xlu1 %4550  ;;  %v4381_v27 = vpop.permute.xlu0 %4380 }
0x233b   :  { %7605 = vmatpush3.xpose.msk.msra.mxu0 %vm449_vm6, %v4381_v27 }
0x233c   :  { %7614 = vmatprep.subr.mxu0 %v8344_v44 }
0x233e   :  { %v4549_v21 = vpop.permute.xlu1 %4548  ;;  %7607 = vmatmul.mubr.msk.f32.vlgmr.msra.gmra.mrb[46].mxu0 %vm449_vm6, %v4375_v11  ;;  %v4717_v25 = vpop.permute.xlu0 %4716 }
0x233f   :  { %7615 = vmatpush3.xpose.msk.msra.mxu0 %vm449_vm6, %v4551_v54  ;;  %7616 = vmatprep.mubr.msk.f32.mxu0 %vm8347_vm5, %v8344_v44 }
0x2340   :  { %7624 = vmatprep.subr.mxu0 %v8344_v44 }
0x2342   :  { %v4719_v55 = vpop.permute.xlu1 %4718  ;;  %7617 = vmatmul.mubr.msk.f32.vlgmr.msra.gmra.mrb[48].mxu0 %vm449_vm6, %v4549_v21  ;;  %v4884_v58 = vpop.permute.xlu0 %4883 }
0x2343   :  { %7625 = vmatpush3.xpose.msk.msra.mxu0 %vm449_vm6, %v4719_v55  ;;  %7626 = vmatprep.mubr.msk.f32.mxu0 %vm8347_vm5, %v8344_v44 }
0x2344   :  { %7634 = vmatprep.subr.mxu0 %v8344_v44 }
0x2346   :  { %v4886_v56 = vpop.permute.xlu1 %4885  ;;  %7627 = vmatmul.mubr.msk.f32.vlgmr.msra.gmra.mrb[50].mxu0 %vm449_vm6, %v4717_v25 }
0x2347   :  { %7635 = vmatpush3.xpose.msk.msra.mxu0 %vm449_vm6, %v4886_v56  ;;  %7636 = vmatprep.mubr.msk.f32.mxu0 %vm8347_vm5, %v8344_v44 }
0x2348   :  { %7970 = vmatprep.subr.bf16.mxu0 %v8337_v0 }
0x234a   :  { %7637 = vmatmul.mubr.msk.f32.vlgmr.msra.gmra.mrb[52].mxu0 %vm449_vm6, %v4884_v58 }
0x234b   :  { %7660 = vmatprep.mubr.msk.f32.mxu0 %vm8347_vm5, %v8344_v44 }
0x2411   :  { %v4452_v61 = vpop.f32.mrb[46].mxu0 }
0x2412   :  { %v4456_v63 = vmul.f32 0.25, %v4452_v61  ;;  %v7608_v1 = vpop.f32.mrb[47].mxu0 }
0x2413   :  { %v5065_v1 = vld [vmem:[%s9281_s20] sm:$0xff] }
0x2414   :  { %v4462_v2 = vsel %vm9239_vm12, %v4456_v63, -1e+30 }
0x2415   :  { %v4622_v3 = vpop.f32.mrb[48].mxu0  ;;  %v4464_v7 = vsel %vm4463_vm13, %v4462_v2, -inf }
0x2416   :  { %v4626_v10 = vmul.f32 0.25, %v4622_v3  ;;  %4465 = vmax.xlane.f32.xlu1 %v4464_v7  ;;  %v7618_v39 = vpop.f32.mrb[49].mxu0  ;;  %v5067_v3 = vld [vmem:[%s9281_s20 + $0x10] sm:$0xff] }
0x2418   :  { %v4627_v13 = vsel %vm9239_vm12, %v4626_v10, -1e+30  ;;  %v5068_v10 = vld [vmem:[%s9281_s20 + $0x18] sm:$0xff] }
0x2419   :  { %v4790_v14 = vpop.f32.mrb[50].mxu0  ;;  %v4628_v41 = vsel %vm4463_vm13, %v4627_v13, -inf  ;;  %v7974_v39 = vpack.c.bf16 %v5068_v10, %v5067_v3  ;;  %v5192_v3 = vld [vmem:[%s9317_s1 + $0x78] sm:$0xff] }
0x241a   :  { %v4794_v6 = vmul.f32 0.25, %v4790_v14  ;;  %4629 = vmax.xlane.f32.xlu0 %v4628_v41  ;;  %v7628_v15 = vpop.f32.mrb[51].mxu0  ;;  %v5070_v14 = vld [vmem:[%s9281_s20 + $0x28] sm:$0xff] }
0x241b   :  { %v5072_v15 = vld [vmem:[%s9281_s20 + $0x38] sm:$0xff] }
0x241c   :  { %v4795_v18 = vsel %vm9239_vm12, %v4794_v6, -1e+30  ;;  %v5071_v6 = vld [vmem:[%s9281_s20 + $0x30] sm:$0xff] }
0x241d   :  { %v4957_v19 = vpop.f32.mrb[52].mxu0  ;;  %v4796_v20 = vsel %vm4463_vm13, %v4795_v18, -inf }
0x241e   :  { %v4961_v22 = vmul.f32 0.25, %v4957_v19  ;;  %4797 = vmax.xlane.f32.xlu0 %v4796_v20  ;;  %v7638_v23 = vpop.f32.mrb[53].mxu0 }
0x2420   :  { %v4962_v26 = vsel %vm9239_vm12, %v4961_v22, -1e+30 }
0x2421   :  { %v4963_v29 = vsel %vm4463_vm13, %v4962_v26, -inf }
0x2422   :  { %4964 = vmax.xlane.f32.xlu0 %v4963_v29 }
0x2427   :  { %4640 = vrot.lane.b32.xlu1 %v9203_v31, %s8349_s6 }
0x24a3   :  { %v4466_v48 = vpop.xlane.xlu1 %4465 }
0x24a4   :  { %v4467_v30 = vsub.f32 %v4462_v2, %v4466_v48  ;;  %v5066_v2 = vld [vmem:[%s9281_s20 + $0x8] sm:$0xff] }
0x24a5   :  { %v7971_v7 = vpack.c.bf16 %v5066_v2, %v5065_v1  ;;  %v5190_v2 = vld [vmem:[%s9317_s1 + $0x68] sm:$0xff] }
0x24a6   :  { %v4468_v37 = vmul.f32 1.442695, %v4467_v30  ;;  %v7994_v10 = vpack.c.bf16 %v5192_v3, %v5190_v2  ;;  %v5307_v2 = vld [vmem:[%s9344_s13 + $0x60] sm:$0xff]  ;;  %v5308_v3 = vld [vmem:[%s9344_s13 + $0x68] sm:$0xff] }
0x24a7   :  { %v4630_v35 = vpop.xlane.xlu0 %4629  ;;  %v4641_v53 = vpop.permute.xlu1 %4640  ;;  %7972 = vmatpush3.bf16.msra.mxu0 %v7971_v7  ;;  %v5189_v7 = vld [vmem:[%s9317_s1 + $0x60] sm:$0xff] }
0x24a8   :  { %8277 = vpow2.f32 %v4468_v37  ;;  %v4631_v36 = vsub.f32 %v4627_v13, %v4630_v35  ;;  %7973 = vmatprep.subr.bf16.mxu0 %v8337_v0  ;;  %v5069_v13 = vld [vmem:[%s9281_s20 + $0x20] sm:$0xff] }
0x24a9   :  { %v7977_v41 = vpack.c.bf16 %v5070_v14, %v5069_v13 }
0x24aa   :  { %v4632_v24 = vmul.f32 1.442695, %v4631_v36 }
0x24ab   :  { %v4798_v49 = vpop.xlane.xlu0 %4797  ;;  %7975 = vmatpush3.bf16.msra.mxu0 %v7974_v39  ;;  %v5191_v39 = vld [vmem:[%s9317_s1 + $0x70] sm:$0xff] }
0x24ac   :  { %8279 = vpow2.f32 %v4632_v24  ;;  %v4799_v38 = vsub.f32 %v4795_v18, %v4798_v49  ;;  %7976 = vmatprep.subr.bf16.mxu0 %v8337_v0  ;;  %v7980_v18 = vpack.c.bf16 %v5072_v15, %v5071_v6  ;;  %v7996_v13 = vpack.c.bf16 %v5191_v39, %v5189_v7  ;;  %v5326_v39 = vld [vmem:[%s9344_s13 + $0xf8] sm:$0xff] }
0x24ad   :  { %v5170_v15 = vrot.slane %v9180_v40, %v8759_v32  ;;  %v8024_v7 = vpack.c.bf16 %v5308_v3, %v5307_v2  ;;  %v6997_v2 = vld [vmem:[%s9150_s28 + $0xc0] sm:$0xff]  ;;  %v6999_v3 = vld [vmem:[%s9150_s28 + $0xd0] sm:$0xff] }
0x24ae   :  { %v4800_v52 = vmul.f32 1.442695, %v4799_v38 }
0x24af   :  { %v4965_v42 = vpop.xlane.xlu0 %4964  ;;  %7978 = vmatpush3.bf16.msra.mxu0 %v7977_v41 }
0x24b0   :  { %8281 = vpow2.f32 %v4800_v52  ;;  %v4966_v43 = vsub.f32 %v4962_v26, %v4965_v42  ;;  %7979 = vmatprep.subr.bf16.mxu0 %v8337_v0  ;;  %v6982_v52 = vld [vmem:[%s9304_s24] ss:$0 sm:$0xff] }
0x24b2   :  { %v8278_v45 = vpop.eup %8277  ;;  %v4967_v33 = vmul.f32 1.442695, %v4966_v43 }
0x24b3   :  { %v4470_v47 = vsel %vm4463_vm13, %v8278_v45, 0.0  ;;  %7981 = vmatpush3.bf16.msra.mxu0 %v7980_v18 }
0x24b4   :  { %8283 = vpow2.f32 %v4967_v33  ;;  %4471 = vadd.xlane.f32.xlu1 %v4470_v47 }
0x24b6   :  { %v8280_v9 = vpop.eup %8279 }
0x24b7   :  { %v4634_v16 = vsel %vm4463_vm13, %v8280_v9, 0.0 }
0x24b8   :  { %4635 = vadd.xlane.f32.xlu0 %v4634_v16 }
0x24ba   :  { %v8282_v28 = vpop.eup %8281 }
0x24bb   :  { %v4802_v50 = vsel %vm4463_vm13, %v8282_v28, 0.0 }
0x24bc   :  { %4803 = vadd.xlane.f32.xlu1 %v4802_v50 }
0x24be   :  { %v8284_v51 = vpop.eup %8283 }
0x24bf   :  { %v4969_v8 = vsel %vm4463_vm13, %v8284_v51, 0.0 }
0x24c0   :  { %4970 = vadd.xlane.f32.xlu0 %v4969_v8  ;;  %v5180_v8 = vld [vmem:[%s9317_s1 + $0x18] sm:$0xff] }
0x24cd   :  { %4974 = vrot.lane.b32.xlu1 %v9203_v31, %s8353_s10 }
0x24d6   :  { %4807 = vrot.lane.b32.xlu0 %v9203_v31, %s8352_s9 }
0x2541   :  { %v4472_v17 = vpop.xlane.xlu1 %4471 }
0x2542   :  { %8285 = vrcp.f32 %v4472_v17  ;;  %v5177_v17 = vld [vmem:[%s9317_s1] sm:$0xff] }
0x2545   :  { %v4636_v12 = vpop.xlane.xlu0 %4635 }
0x2546   :  { %8287 = vrcp.f32 %v4636_v12  ;;  %v5179_v12 = vld [vmem:[%s9317_s1 + $0x10] sm:$0xff] }
0x2549   :  { %v4804_v11 = vpop.xlane.xlu1 %4803 }
0x254a   :  { %8289 = vrcp.f32 %v4804_v11  ;;  %v7984_v11 = vpack.c.bf16 %v5179_v12, %v5177_v17  ;;  %v5319_v17 = vld [vmem:[%s9344_s13 + $0xc0] sm:$0xff]  ;;  %v5320_v12 = vld [vmem:[%s9344_s13 + $0xc8] sm:$0xff] }
0x254c   :  { %v8286_v4 = vpop.eup %8285 }
0x254d   :  { %v4474_v54 = vmul.f32 %v8286_v4, %v8278_v45  ;;  %v4971_v27 = vpop.xlane.xlu0 %4970  ;;  %v4975_v58 = vpop.permute.xlu1 %4974  ;;  %v5182_v4 = vld [vmem:[%s9317_s1 + $0x28] sm:$0xff] }
0x254e   :  { %8291 = vrcp.f32 %v4971_v27 }
0x254f   :  { %7612 = vmatmul.mubr.msk.f32.vlgmr.msra.gmra.mrb[52].mxu1 %vm4463_vm13, %v4474_v54  ;;  %v5184_v54 = vld [vmem:[%s9317_s1 + $0x38] sm:$0xff] }
0x2550   :  { %v8288_v21 = vpop.eup %8287  ;;  %7620 = vmatpush3.msra.mxu1 %v4641_v53  ;;  %7621 = vmatprep.mubr.msk.f32.mxu1 %vm8347_vm5, %v8344_v44  ;;  %v7986_v27 = vpack.c.bf16 %v5184_v54, %v5182_v4  ;;  %v5303_v4 = vld [vmem:[%s9344_s13 + $0x40] sm:$0xff]  ;;  %v5304_v54 = vld [vmem:[%s9344_s13 + $0x48] sm:$0xff] }
0x2551   :  { %v4638_v55 = vmul.f32 %v8288_v21, %v8280_v9  ;;  %v4808_v31 = vpop.permute.xlu0 %4807  ;;  %7629 = vmatprep.subr.mxu1 %v8344_v44  ;;  %v5181_v21 = vld [vmem:[%s9317_s1 + $0x20] sm:$0xff] }
0x2553   :  { %7622 = vmatmul.mubr.msk.f32.vlgmr.msra.gmra.mrb[54].mxu1 %vm4463_vm13, %v4638_v55  ;;  %v5183_v55 = vld [vmem:[%s9317_s1 + $0x30] sm:$0xff] }
0x2554   :  { %v8290_v25 = vpop.eup %8289  ;;  %7630 = vmatpush3.msra.mxu1 %v4808_v31  ;;  %7631 = vmatprep.mubr.msk.f32.mxu1 %vm8347_vm5, %v8344_v44  ;;  %v7988_v31 = vpack.c.bf16 %v5183_v55, %v5181_v21  ;;  %v5321_v21 = vld [vmem:[%s9344_s13 + $0xd0] sm:$0xff]  ;;  %v5322_v55 = vld [vmem:[%s9344_s13 + $0xd8] sm:$0xff] }
0x2555   :  { %v4806_v56 = vmul.f32 %v8290_v25, %v8282_v28  ;;  %7639 = vmatprep.subr.mxu1 %v8344_v44  ;;  %v5186_v25 = vld [vmem:[%s9317_s1 + $0x48] sm:$0xff] }
0x2557   :  { %7632 = vmatmul.mubr.msk.f32.vlgmr.msra.gmra.mrb[56].mxu1 %vm4463_vm13, %v4806_v56  ;;  %v5188_v56 = vld [vmem:[%s9317_s1 + $0x58] sm:$0xff] }
0x2558   :  { %v8292_v61 = vpop.eup %8291  ;;  %7640 = vmatpush3.msra.mxu1 %v4975_v58  ;;  %7641 = vmatprep.mubr.msk.f32.mxu1 %vm8347_vm5, %v8344_v44  ;;  %v7990_v58 = vpack.c.bf16 %v5188_v56, %v5186_v25  ;;  %v5305_v25 = vld [vmem:[%s9344_s13 + $0x50] sm:$0xff]  ;;  %v5306_v56 = vld [vmem:[%s9344_s13 + $0x58] sm:$0xff] }
0x2559   :  { %v4973_v63 = vmul.f32 %v8292_v61, %v8284_v51  ;;  %v5185_v61 = vld [vmem:[%s9317_s1 + $0x40] sm:$0xff] }
0x255b   :  { %7642 = vmatmul.mubr.msk.f32.vlgmr.msra.gmra.mrb[58].mxu1 %vm4463_vm13, %v4973_v63  ;;  %v5187_v63 = vld [vmem:[%s9317_s1 + $0x50] sm:$0xff] }
0x255c   :  { %5272 = vmatprep.mubr.f32.mxu1 %v8344_v44  ;;  %v7992_v1 = vpack.c.bf16 %v5187_v63, %v5185_v61  ;;  %v5323_v61 = vld [vmem:[%s9344_s13 + $0xe0] sm:$0xff]  ;;  %v5324_v63 = vld [vmem:[%s9344_s13 + $0xe8] sm:$0xff] }
0x2622   :  { %v4544_v19 = vpop.f32.mrb[52].mxu1 }
0x2623   :  { %v7613_v20 = vpop.f32.mrb[53].mxu1 }
0x2624   :  { %v5175_v20 = vrot.slane %v9180_v40, %v8762_v34  ;;  %v5311_v40 = vld [vmem:[%s9344_s13 + $0x80] sm:$0xff] }
0x2626   :  { %v4712_v22 = vpop.f32.mrb[54].mxu1 }
0x2627   :  { %5051 = vrot.lane.b32.xlu1 %v4712_v22, %s8354_s11  ;;  %v7623_v23 = vpop.f32.mrb[55].mxu1 }
0x262a   :  { %v4879_v26 = vpop.f32.mrb[56].mxu1 }
0x262b   :  { %5055 = vrot.lane.b32.xlu1 %v4879_v26, %s8351_s8  ;;  %v7633_v29 = vpop.f32.mrb[57].mxu1  ;;  %v5312_v26 = vld [vmem:[%s9344_s13 + $0x88] sm:$0xff] }
0x262c   :  { %v7998_v29 = vpack.c.bf16 %v5312_v26, %v5311_v40 }
0x262e   :  { %v5046_v48 = vpop.f32.mrb[58].mxu1  ;;  %7999 = vmatprep.subr.bf16.mxu0 %v7998_v29 }
0x262f   :  { %5059 = vrot.lane.b32.xlu0 %v5046_v48, %s8350_s7  ;;  %v7643_v30 = vpop.f32.mrb[59].mxu1  ;;  %v5295_v48 = vld [vmem:[%s9344_s13] sm:$0xff] }
0x2630   :  { %v5296_v30 = vld [vmem:[%s9344_s13 + $0x8] sm:$0xff] }
0x2699   :  { %v5052_v37 = vpop.permute.xlu1 %5051 }
0x269a   :  { %v5062_v36 = vsel %vm449_vm6, %v4544_v19, %v5052_v37  ;;  %v8000_v37 = vpack.c.bf16 %v5296_v30, %v5295_v48 }
0x269d   :  { %v5056_v35 = vpop.permute.xlu1 %5055 }
0x269e   :  { %v5063_v24 = vsel %vm1128_vm11, %v5062_v36, %v5056_v35  ;;  %v5313_v35 = vld [vmem:[%s9344_s13 + $0x90] sm:$0xff]  ;;  %v5314_v36 = vld [vmem:[%s9344_s13 + $0x98] sm:$0xff] }
0x26a1   :  { %v5060_v49 = vpop.permute.xlu0 %5059 }
0x26a2   :  { %v5064_v38 = vsel %vm1130_vm10, %v5063_v24, %v5060_v49  ;;  %v8002_v24 = vpack.c.bf16 %v5314_v36, %v5313_v35  ;;  %v5297_v49 = vld [vmem:[%s9344_s13 + $0x10] sm:$0xff] }
0x26a3   :  { %7661 = vmatmul.mubr.msk.f32.vlgmr.msra.gmra.mrb[54].mxu0 %vm153_vm0, %v5064_v38  ;;  %v5298_v38 = vld [vmem:[%s9344_s13 + $0x18] sm:$0xff] }
0x26a4   :  { %8001 = vmatpush3.bf16.msra.mxu0 %v8000_v37 }
0x26a5   :  { %8003 = vmatprep.subr.bf16.mxu0 %v8002_v24 }
0x2776   :  { %v5149_v42 = vpop.f32.mrb[54].mxu0 }
0x2777   :  { %v5150_v43 = vadd.f32 %v6982_v52, %v5149_v42  ;;  %v7662_v45 = vpop.f32.mrb[55].mxu0  ;;  %v8004_v52 = vpack.c.bf16 %v5298_v38, %v5297_v49  ;;  %v5315_v42 = vld [vmem:[%s9344_s13 + $0xa0] sm:$0xff] }
0x2779   :  { %v9308_v33 = vadd.f32 %v5150_v43, %v9128_v60  ;;  %v5178_v60 = vld [vmem:[%s9317_s1 + $0x8] sm:$0xff]  ;;  %8005 = vmatpush3.bf16.msra.mxu0 %v8004_v52 }
0x277a   :  { %v7982_v53 = vpack.c.bf16 %v5180_v8, %v5178_v60  ;;  %v5316_v43 = vld [vmem:[%s9344_s13 + $0xa8] sm:$0xff]  ;;  %v5301_v60 = vld [vmem:[%s9344_s13 + $0x30] sm:$0xff]  ;;  %v5302_v8 = vld [vmem:[%s9344_s13 + $0x38] sm:$0xff] }
0x277b   :  { %v5154_v47 = vsel %vm153_vm0, %v9308_v33, 0.0  ;;  %v8006_v45 = vpack.c.bf16 %v5316_v43, %v5315_v42 }
0x277c   :  { %5155 = vadd.xlane.f32.xlu1 %v5154_v47  ;;  %7983 = vmatprep.subr.bf16.mxu1 %v7982_v53  ;;  %v5299_v47 = vld [vmem:[%s9344_s13 + $0x20] sm:$0xff]  ;;  %v8012_v53 = vpack.c.bf16 %v5302_v8, %v5301_v60 }
0x277d   :  { %7985 = vmatpush1.bf16.msra.mxu1 %v7984_v11  ;;  %8007 = vmatprep.subr.bf16.mxu0 %v8006_v45  ;;  %v8014_v11 = vpack.c.bf16 %v5320_v12, %v5319_v17  ;;  %v6987_v45 = vld [vmem:[%s9392_s21] ss:$0 sm:$0xff]  ;;  %v6990_v12 = vld [vmem:[%s9150_s28 + $0x88] sm:$0xff] }
0x277e   :  { %7987 = vmatprep.subr.bf16.mxu1 %v7986_v27  ;;  %v8016_v27 = vpack.c.bf16 %v5304_v54, %v5303_v4  ;;  %v6989_v4 = vld [vmem:[%s9150_s28 + $0x80] sm:$0xff]  ;;  %v6991_v54 = vld [vmem:[%s9150_s28 + $0x90] sm:$0xff] }
0x2781   :  { %7989 = vmatpush1.bf16.msra.mxu1 %v7988_v31  ;;  %v8018_v31 = vpack.c.bf16 %v5322_v55, %v5321_v21  ;;  %v6994_v21 = vld [vmem:[%s9150_s28 + $0xa8] sm:$0xff]  ;;  %v6996_v55 = vld [vmem:[%s9150_s28 + $0xb8] sm:$0xff] }
0x2782   :  { %7991 = vmatprep.subr.bf16.mxu1 %v7990_v58  ;;  %v8020_v58 = vpack.c.bf16 %v5306_v56, %v5305_v25  ;;  %v6993_v25 = vld [vmem:[%s9150_s28 + $0xa0] sm:$0xff]  ;;  %v6995_v56 = vld [vmem:[%s9150_s28 + $0xb0] sm:$0xff] }
0x2785   :  { %7993 = vmatpush1.bf16.msra.mxu1 %v7992_v1  ;;  %v8022_v1 = vpack.c.bf16 %v5324_v63, %v5323_v61  ;;  %v6998_v61 = vld [vmem:[%s9150_s28 + $0xc8] sm:$0xff]  ;;  %v7000_v63 = vld [vmem:[%s9150_s28 + $0xd8] sm:$0xff] }
0x2786   :  { %7995 = vmatprep.subr.bf16.mxu1 %v7994_v10  ;;  %v5325_v10 = vld [vmem:[%s9344_s13 + $0xf0] sm:$0xff] }
0x2789   :  { %7997 = vmatpush1.bf16.msra.mxu1 %v7996_v13  ;;  %v8026_v13 = vpack.c.bf16 %v5326_v39, %v5325_v10  ;;  %v7002_v10 = vld [vmem:[%s9150_s28 + $0xe8] sm:$0xff]  ;;  %v7004_v39 = vld [vmem:[%s9150_s28 + $0xf8] sm:$0xff] }
0x2809   :  { %v5156_v9 = vpop.xlane.xlu1 %5155 }
0x280a   :  { %v5157_v16 = vmul.f32 0.015625, %v5156_v9  ;;  %v5300_v9 = vld [vmem:[%s9344_s13 + $0x28] sm:$0xff] }
0x280c   :  { %v5158_v28 = vsub.f32 %v9308_v33, %v5157_v16  ;;  %v8008_v16 = vpack.c.bf16 %v5300_v9, %v5299_v47 }
0x280e   :  { %v5159_v50 = vmul.f32 %v5158_v28, %v5158_v28  ;;  %8009 = vmatpush3.bf16.msra.mxu0 %v8008_v16 }
0x2810   :  { %v5160_v51 = vsel %vm153_vm0, %v5159_v50, 0.0  ;;  %v5318_v50 = vld [vmem:[%s9344_s13 + $0xb8] sm:$0xff] }
0x2811   :  { %5161 = vadd.xlane.f32.xlu0 %v5160_v51 }
0x289e   :  { %v5162_v14 = vpop.xlane.xlu0 %5161 }
0x289f   :  { %v5163_v41 = vmul.f32 0.015625, %v5162_v14  ;;  %v5309_v14 = vld [vmem:[%s9344_s13 + $0x70] sm:$0xff] }
0x28a1   :  { %v5164_v6 = vadd.f32 1e-05, %v5163_v41  ;;  %v5310_v41 = vld [vmem:[%s9344_s13 + $0x78] sm:$0xff] }
0x28a3   :  { %8293 = vrsqrt.f32 %v5164_v6  ;;  %v8028_v6 = vpack.c.bf16 %v5310_v41, %v5309_v14  ;;  %v8042_v14 = vpack.c.bf16 %v7004_v39, %v7002_v10  ;;  %v7003_v41 = vld [vmem:[%s9150_s28 + $0xf0] sm:$0xff] }
0x28ad   :  { %v8294_v18 = vpop.eup %8293 }
0x28ae   :  { %v5166_v19 = vmul.f32 %v8294_v18, %v5158_v28  ;;  %v5317_v28 = vld [vmem:[%s9344_s13 + $0xb0] sm:$0xff] }
0x28af   :  { %v8010_v51 = vpack.c.bf16 %v5318_v50, %v5317_v28 }
0x28b0   :  { %v5171_v22 = vmul.f32 %v5170_v15, %v5166_v19  ;;  %v5193_v15 = vld [vmem:[%s9382_s4] sm:$0x3] }
0x28b1   :  { %8011 = vmatprep.subr.bf16.mxu0 %v8010_v51  ;;  %v5198_v18 = vrot.slane %v5193_v15, %v8440_v46  ;;  %v5202_v19 = vrot.slane %v5193_v15, %v8452_v5 }
0x28b2   :  { %v5176_v23 = vadd.f32 %v5175_v20, %v5171_v22  ;;  %8013 = vmatpush3.bf16.msra.mxu0 %v8012_v53 }
0x28b3   :  { %8015 = vmatprep.subr.bf16.mxu0 %v8014_v11 }
0x28b4   :  { %6984 = vmatmul.mubr.msk.f32.vlgmr.msra.gmra.mrb[60].mxu1 %vm153_vm0, %v5176_v23 }
0x28b5   :  { %5527 = vmatprep.mubr.f32.mxu1 %v8344_v44 }
0x28b6   :  { %8017 = vmatpush3.bf16.msra.mxu0 %v8016_v27  ;;  %v8032_v27 = vpack.c.bf16 %v6991_v54, %v6989_v4 }
0x28b7   :  { %8019 = vmatprep.subr.bf16.mxu0 %v8018_v31  ;;  %v8034_v31 = vpack.c.bf16 %v6996_v55, %v6994_v21 }
0x28ba   :  { %8021 = vmatpush3.bf16.msra.mxu0 %v8020_v58  ;;  %v8036_v58 = vpack.c.bf16 %v6995_v56, %v6993_v25 }
0x28bb   :  { %8023 = vmatprep.subr.bf16.mxu0 %v8022_v1  ;;  %v8038_v1 = vpack.c.bf16 %v7000_v63, %v6998_v61 }
0x28be   :  { %8025 = vmatpush3.bf16.msra.mxu0 %v8024_v7  ;;  %v8040_v7 = vpack.c.bf16 %v6999_v3, %v6997_v2 }
0x28bf   :  { %8027 = vmatprep.subr.bf16.mxu0 %v8026_v13  ;;  %v7001_v13 = vld [vmem:[%s9150_s28 + $0xe0] sm:$0xff] }
0x28c2   :  { %8029 = vmatpush3.bf16.msra.mxu0 %v8028_v6  ;;  %v8044_v6 = vpack.c.bf16 %v7003_v41, %v7001_v13 }
0x28c3   :  { %7683 = vmatprep.subr.mxu0 %v8344_v44 }
0x2987   :  { %v5274_v20 = vpop.f32.mrb[60].mxu1 }
0x2988   :  { %v5275_v22 = vadd.f32 %v5274_v20, %v5198_v18  ;;  %v5276_v23 = vpop.f32.mrb[61].mxu1  ;;  %v9420_v20 = vld [vmem:[%s9167_s16 + $0x4] sm:$0xf] }
0x2989   :  { %v5277_v40 = vadd.f32 %v5276_v23, %v5202_v19 }
0x298a   :  { %v6985_v26 = vmul.f32 -1.702, %v5275_v22 }
0x298b   :  { %v6986_v29 = vmul.f32 -1.702, %v5277_v40 }
0x298c   :  { %v5283_v48 = vmul.f32 1.442695, %v6985_v26  ;;  %v5428_v26 = vrot.slane %v9420_v20, %v8452_v5 }
0x298d   :  { %v5285_v30 = vmul.f32 1.442695, %v6986_v29 }
0x298e   :  { %8295 = vpow2.f32 %v5283_v48 }
0x298f   :  { %8297 = vpow2.f32 %v5285_v30  ;;  %v7005_v30 = vld [vmem:[%s9198_s15 + $0x2] sm:$0x3] }
0x2998   :  { %v8296_v37 = vpop.eup %8295 }
0x2999   :  { %v8298_v35 = vpop.eup %8297  ;;  %v5287_v36 = vadd.f32 1.0, %v8296_v37  ;;  %v5453_v37 = vrot.slane %v7005_v30, %v8440_v46 }
0x299a   :  { %v5288_v24 = vadd.f32 1.0, %v8298_v35 }
0x299b   :  { %8299 = vrcp.f32 %v5287_v36 }
0x299c   :  { %8301 = vrcp.f32 %v5288_v24 }
0x29a5   :  { %v8300_v49 = vpop.eup %8299 }
0x29a6   :  { %v8302_v38 = vpop.eup %8301  ;;  %v5293_v42 = vmul.f32 %v8300_v49, %v5275_v22  ;;  %v5423_v22 = vrot.slane %v9420_v20, %v8440_v46  ;;  %v5457_v49 = vrot.slane %v7005_v30, %v8452_v5 }
0x29a7   :  { %v5294_v52 = vmul.f32 %v8302_v38, %v5277_v40 }
0x29a9   :  { %5398 = vmatprep.mubr.f32.mxu0 %v5294_v52 }
0x29aa   :  { %5399 = vmatmul.mubr.f32.vlgmr.msra.gmra.mrb[56].mxu0 %v5293_v42 }
0x29ab   :  { %7685 = vmatprep.mubr.msk.f32.mxu0 %vm8347_vm5, %v8344_v44 }
0x2a7d   :  { %v7313_v43 = vpop.f32.mrb[56].mxu0 }
0x2a7e   :  { %v7314_v47 = vpop.f32.mrb[57].mxu0 }
0x2a7f   :  { %v7315_v9 = vadd.f32 %v7314_v47, %v7313_v43 }
0x2a81   :  { %v5401_v16 = vadd.f32 %v7315_v9, %v6987_v45 }
0x2a83   :  { %v9396_v28 = vadd.f32 %v5401_v16, %v9308_v33  ;;  %v6992_v33 = vld [vmem:[%s9150_s28 + $0x98] sm:$0xff]  ;;  %s8374_s28 = smov 29  }
0x2a84   :  { %v8030_v11 = vpack.c.bf16 %v6992_v33, %v6990_v12 }
0x2a85   :  { %v5407_v50 = vsel %vm153_vm0, %v9396_v28, 0.0 }
0x2a86   :  { %5408 = vadd.xlane.f32.xlu0 %v5407_v50  ;;  %8031 = vmatprep.subr.bf16.mxu1 %v8030_v11 }
0x2a87   :  { %8033 = vmatpush1.bf16.msra.mxu1 %v8032_v27 }
0x2a88   :  { %8035 = vmatprep.subr.bf16.mxu1 %v8034_v31 }
0x2a8b   :  { %8037 = vmatpush1.bf16.msra.mxu1 %v8036_v58 }
0x2a8c   :  { %8039 = vmatprep.subr.bf16.mxu1 %v8038_v1 }
0x2a8f   :  { %8041 = vmatpush1.bf16.msra.mxu1 %v8040_v7 }
0x2a90   :  { %8043 = vmatprep.subr.bf16.mxu1 %v8042_v14 }
0x2a93   :  { %8045 = vmatpush1.bf16.msra.mxu1 %v8044_v6 }
0x2a94   :  { %7663 = vmatprep.subr.mxu1 %v8344_v44 }
0x2b13   :  { %v5409_v51 = vpop.xlane.xlu0 %5408 }
0x2b14   :  { %v5410_v60 = vmul.f32 0.015625, %v5409_v51 }
0x2b16   :  { %v5411_v8 = vsub.f32 %v9396_v28, %v5410_v60 }
0x2b18   :  { %v5412_v53 = vmul.f32 %v5411_v8, %v5411_v8 }
0x2b1a   :  { %v5413_v17 = vsel %vm153_vm0, %v5412_v53, 0.0 }
0x2b1b   :  { %5414 = vadd.xlane.f32.xlu0 %v5413_v17 }
0x2ba8   :  { %v5415_v15 = vpop.xlane.xlu0 %5414 }
0x2ba9   :  { %v5416_v18 = vmul.f32 0.015625, %v5415_v15 }
0x2bab   :  { %v5417_v19 = vadd.f32 1e-05, %v5416_v18 }
0x2bad   :  { %8303 = vrsqrt.f32 %v5417_v19 }
0x2bb7   :  { %v8304_v23 = vpop.eup %8303 }
0x2bb8   :  { %v5419_v40 = vmul.f32 %v8304_v23, %v5411_v8 }
0x2bba   :  { %v5424_v29 = vmul.f32 %v5423_v22, %v5419_v40 }
0x2bbc   :  { %v5429_v48 = vadd.f32 %v5428_v26, %v5424_v29 }
0x2bbe   :  { %7006 = vmatmul.mubr.msk.f32.vlgmr.msra.gmra.mrb[62].mxu1 %vm153_vm0, %v5429_v48 }
0x2bbf   :  { %7665 = vmatprep.mubr.msk.f32.mxu1 %vm8347_vm5, %v8344_v44 }
0x2c91   :  { %v5529_v35 = vpop.f32.mrb[62].mxu1 }
0x2c92   :  { %v5530_v36 = vadd.f32 %v5529_v35, %v5453_v37  ;;  %v5531_v24 = vpop.f32.mrb[63].mxu1 }
0x2c93   :  { %v9440_v52 = vadd.f32 %v5531_v24, %v5457_v49 }
0x2c94   :  { %5535 = vrot.lane.b32.xlu1 %v5530_v36, %s8348_s5  ;;  %s8373_s5 = smov 28  }
0x2c98   :  { %5697 = vrot.lane.b32.xlu1 %v5530_v36, %s8349_s6 }
0x2c9c   :  { %5867 = vrot.lane.b32.xlu1 %v5530_v36, %s8351_s8 }
0x2ca0   :  { %5865 = vrot.lane.b32.xlu1 %v5530_v36, %s8352_s9 }
0x2ca4   :  { %6034 = vrot.lane.b32.xlu1 %v5530_v36, %s8354_s11 }
0x2ca8   :  { %6032 = vrot.lane.b32.xlu1 %v5530_v36, %s8353_s10 }
0x2d06   :  { %v5536_v38 = vpop.permute.xlu1 %5535 }
0x2d07   :  { %7664 = vmatpush3.xpose.msk.msra.mxu1 %vm449_vm6, %v5536_v38 }
0x2d08   :  { %7668 = vmatprep.subr.mxu1 %v8344_v44 }
0x2d0a   :  { %7666 = vmatmul.mubr.msk.f32.vlgmr.msra.gmra.mrb[64].mxu1 %vm449_vm6, %v5530_v36  ;;  %v5698_v42 = vpop.permute.xlu1 %5697 }
0x2d0b   :  { %7669 = vmatpush3.msra.mxu1 %v9440_v52  ;;  %7670 = vmatprep.mubr.msk.f32.mxu1 %vm8347_vm5, %v8344_v44 }
0x2d0c   :  { %7673 = vmatprep.subr.mxu1 %v8344_v44 }
0x2d0e   :  { %v5868_v43 = vpop.permute.xlu1 %5867 }
0x2d0f   :  { %7684 = vmatpush3.xpose.msk.msra.mxu0 %vm449_vm6, %v5868_v43 }
0x2d10   :  { %7693 = vmatprep.subr.mxu0 %v8344_v44 }
0x2d12   :  { %v5866_v45 = vpop.permute.xlu1 %5865 }
0x2d13   :  { %7686 = vmatmul.mubr.msk.f32.vlgmr.msra.gmra.mrb[58].mxu0 %vm449_vm6, %v5866_v45 }
0x2d14   :  { %7695 = vmatprep.mubr.msk.f32.mxu0 %vm8347_vm5, %v8344_v44 }
0x2d16   :  { %v6035_v47 = vpop.permute.xlu1 %6034 }
0x2d17   :  { %7694 = vmatpush3.xpose.msk.msra.mxu0 %vm449_vm6, %v6035_v47 }
0x2d18   :  { %8046 = vmatprep.subr.bf16.mxu0 %v8337_v0 }
0x2d1a   :  { %v6033_v9 = vpop.permute.xlu1 %6032 }
0x2d1b   :  { %7696 = vmatmul.mubr.msk.f32.vlgmr.msra.gmra.mrb[60].mxu0 %vm449_vm6, %v6033_v9 }
0x2d1c   :  { %7719 = vmatprep.mubr.msk.f32.mxu0 %vm8347_vm5, %v8344_v44 }
0x2ddd   :  { %v5607_v16 = vpop.f32.mrb[64].mxu1 }
0x2dde   :  { %v5611_v50 = vmul.f32 0.25, %v5607_v16  ;;  %v7667_v51 = vpop.f32.mrb[65].mxu1 }
0x2de0   :  { %v5612_v60 = vsel %vm9239_vm12, %v5611_v50, -1e+30 }
0x2de1   :  { %v5613_v8 = vsel %vm4463_vm13, %v5612_v60, -inf }
0x2de2   :  { %5614 = vmax.xlane.f32.xlu0 %v5613_v8  ;;  %v7019_v8 = vld [vmem:[%s9281_s20 + $0x40] sm:$0xff] }
0x2de6   :  { %v5939_v53 = vpop.f32.mrb[58].mxu0 }
0x2de7   :  { %v5943_v17 = vmul.f32 0.25, %v5939_v53  ;;  %v7687_v12 = vpop.f32.mrb[59].mxu0  ;;  %v7020_v53 = vld [vmem:[%s9281_s20 + $0x48] sm:$0xff] }
0x2de8   :  { %v8047_v12 = vpack.c.bf16 %v7020_v53, %v7019_v8  ;;  %v7042_v8 = vld [vmem:[%s9317_s1 + $0xe0] sm:$0xff] }
0x2de9   :  { %v5944_v33 = vsel %vm9239_vm12, %v5943_v17, -1e+30  ;;  %v7021_v17 = vld [vmem:[%s9281_s20 + $0x50] sm:$0xff] }
0x2dea   :  { %v5945_v11 = vsel %vm4463_vm13, %v5944_v33, -inf  ;;  %8048 = vmatpush3.bf16.msra.mxu0 %v8047_v12 }
0x2deb   :  { %5946 = vmax.xlane.f32.xlu1 %v5945_v11  ;;  %8049 = vmatprep.subr.bf16.mxu0 %v8337_v0 }
0x2dee   :  { %v6106_v4 = vpop.f32.mrb[60].mxu0 }
0x2def   :  { %v7697_v54 = vpop.f32.mrb[61].mxu0  ;;  %v6110_v13 = vmul.f32 0.25, %v6106_v4  ;;  %v7023_v4 = vld [vmem:[%s9281_s20 + $0x60] sm:$0xff] }
0x2df0   :  { %v7024_v54 = vld [vmem:[%s9281_s20 + $0x68] sm:$0xff] }
0x2df1   :  { %v6111_v18 = vsel %vm9239_vm12, %v6110_v13, -1e+30 }
0x2df2   :  { %v6112_v19 = vsel %vm4463_vm13, %v6111_v18, -inf }
0x2e6f   :  { %v5615_v27 = vpop.xlane.xlu0 %5614 }
0x2e70   :  { %v5616_v21 = vsub.f32 %v5612_v60, %v5615_v27  ;;  %v8053_v27 = vpack.c.bf16 %v7024_v54, %v7023_v4  ;;  %v6321_v54 = vrot.slane %v9420_v20, %v8759_v32 }
0x2e72   :  { %v5617_v55 = vmul.f32 1.442695, %v5616_v21  ;;  %v7025_v21 = vld [vmem:[%s9281_s20 + $0x70] sm:$0xff] }
0x2e74   :  { %8305 = vpow2.f32 %v5617_v55  ;;  %v7026_v55 = vld [vmem:[%s9281_s20 + $0x78] sm:$0xff] }
0x2e78   :  { %v5947_v1 = vpop.xlane.xlu1 %5946 }
0x2e79   :  { %v5948_v2 = vsub.f32 %v5944_v33, %v5947_v1  ;;  %v7022_v33 = vld [vmem:[%s9281_s20 + $0x58] sm:$0xff]  ;;  %s6800_s20 = sld [smem:[%s9620_s0 + %s8374_s28]]  }
0x2e7a   :  { %v8050_v11 = vpack.c.bf16 %v7022_v33, %v7021_v17  ;;  %v7044_v17 = vld [vmem:[%s9317_s1 + $0xf0] sm:$0xff] }
0x2e7b   :  { %v5949_v3 = vmul.f32 1.442695, %v5948_v2  ;;  %v8072_v12 = vpack.c.bf16 %v7044_v17, %v7042_v8  ;;  %v7065_v17 = vld [vmem:[%s9344_s13 + $0x178] sm:$0xff] }
0x2e7c   :  { %8051 = vmatpush3.bf16.msra.mxu0 %v8050_v11 }
0x2e7d   :  { %8052 = vmatprep.subr.bf16.mxu0 %v8337_v0 }
0x2e7e   :  { %v8306_v31 = vpop.eup %8305 }
0x2e7f   :  { %v5619_v25 = vsel %vm4463_vm13, %v8306_v31, 0.0 }
0x2e80   :  { %5620 = vadd.xlane.f32.xlu0 %v5619_v25  ;;  %8054 = vmatpush3.bf16.msra.mxu0 %v8053_v27 }
0x2e81   :  { %8055 = vmatprep.subr.bf16.mxu0 %v8337_v0 }
0x2e96   :  { %5699 = vrot.lane.b32.xlu0 %v5530_v36, %s8350_s7 }
0x2f0d   :  { %v5621_v56 = vpop.xlane.xlu0 %5620 }
0x2f0e   :  { %8307 = vrcp.f32 %v5621_v56 }
0x2f0f   :  { %8309 = vpow2.f32 %v5949_v3 }
0x2f11   :  { %v5700_v63 = vpop.permute.xlu0 %5699 }
0x2f18   :  { %v8308_v58 = vpop.eup %8307 }
0x2f19   :  { %v5623_v61 = vmul.f32 %v8308_v58, %v8306_v31  ;;  %v8310_v22 = vpop.eup %8309  ;;  %v8056_v31 = vpack.c.bf16 %v7026_v55, %v7025_v21  ;;  %v6326_v55 = vrot.slane %v9420_v20, %v8762_v34  ;;  %v7068_v34 = vld [vmem:[%s9344_s13 + $0x190] sm:$0xff]  ;;  %v7069_v20 = vld [vmem:[%s9344_s13 + $0x198] sm:$0xff] }
0x2f1a   :  { %v5951_v23 = vsel %vm4463_vm13, %v8310_v22, 0.0 }
0x2f1b   :  { %7671 = vmatmul.mubr.msk.f32.vlgmr.msra.gmra.mrb[66].mxu1 %vm4463_vm13, %v5623_v61  ;;  %8057 = vmatpush3.bf16.msra.mxu0 %v8056_v31 }
0x2f1c   :  { %7674 = vmatpush3.xpose.msk.msra.mxu1 %vm449_vm6, %v5700_v63  ;;  %7675 = vmatprep.mubr.msk.f32.mxu1 %vm8347_vm5, %v8344_v44 }
0x2f1d   :  { %7678 = vmatprep.subr.mxu1 %v8344_v44 }
0x2f1f   :  { %7676 = vmatmul.mubr.msk.f32.vlgmr.msra.gmra.mrb[68].mxu1 %vm449_vm6, %v5698_v42 }
0x2f20   :  { %7680 = vmatprep.mubr.msk.f32.mxu1 %vm8347_vm5, %v8344_v44 }
0x2fee   :  { %v9473_v7 = vpop.f32.mrb[66].mxu1 }
0x2fef   :  { %v7672_v10 = vpop.f32.mrb[67].mxu1 }
0x2ff2   :  { %v5771_v39 = vpop.f32.mrb[68].mxu1 }
0x2ff3   :  { %v5775_v14 = vmul.f32 0.25, %v5771_v39  ;;  %v7677_v41 = vpop.f32.mrb[69].mxu1 }
0x2ff4   :  { %v7028_v41 = vld [vmem:[%s9304_s24 + $0x1] ss:$0 sm:$0xff] }
0x2ff5   :  { %v5776_v6 = vsel %vm9239_vm12, %v5775_v14, -1e+30 }
0x2ff6   :  { %v5777_v15 = vsel %vm4463_vm13, %v5776_v6, -inf }
0x2ff7   :  { %5778 = vmax.xlane.f32.xlu0 %v5777_v15 }
0x2ffb   :  { %6113 = vmax.xlane.f32.xlu0 %v6112_v19 }
0x2fff   :  { %5952 = vadd.xlane.f32.xlu0 %v5951_v23 }
0x3084   :  { %v5779_v40 = vpop.xlane.xlu0 %5778 }
0x3085   :  { %v5780_v26 = vsub.f32 %v5776_v6, %v5779_v40 }
0x3087   :  { %v5781_v29 = vmul.f32 1.442695, %v5780_v26 }
0x3088   :  { %v6114_v48 = vpop.xlane.xlu0 %6113 }
0x3089   :  { %8311 = vpow2.f32 %v5781_v29  ;;  %v6115_v30 = vsub.f32 %v6111_v18, %v6114_v48  ;;  %v7031_v48 = vld [vmem:[%s9317_s1 + $0x88] sm:$0xff] }
0x308b   :  { %v6116_v37 = vmul.f32 1.442695, %v6115_v30 }
0x308c   :  { %v5953_v49 = vpop.xlane.xlu0 %5952 }
0x308d   :  { %8313 = vpow2.f32 %v6116_v37  ;;  %v7030_v37 = vld [vmem:[%s9317_s1 + $0x80] sm:$0xff] }
0x3093   :  { %v8312_v35 = vpop.eup %8311 }
0x3094   :  { %v5783_v62 = vsel %vm4463_vm13, %v8312_v35, 0.0 }
0x3095   :  { %5784 = vadd.xlane.f32.xlu0 %v5783_v62 }
0x3097   :  { %v8314_v36 = vpop.eup %8313 }
0x3098   :  { %v6118_v24 = vsel %vm4463_vm13, %v8314_v36, 0.0 }
0x3099   :  { %6119 = vadd.xlane.f32.xlu1 %v6118_v24  ;;  %v7037_v24 = vld [vmem:[%s9317_s1 + $0xb8] sm:$0xff] }
0x30aa   :  { %5956 = vrot.lane.b32.xlu1 %v9440_v52, %s8352_s9 }
0x30ab   :  { %5789 = vrot.lane.b32.xlu0 %v9440_v52, %s8349_s6 }
0x30ae   :  { %6123 = vrot.lane.b32.xlu1 %v9440_v52, %s8353_s10 }
0x3122   :  { %v5785_v38 = vpop.xlane.xlu0 %5784 }
0x3123   :  { %8315 = vrcp.f32 %v5785_v38  ;;  %v7034_v38 = vld [vmem:[%s9317_s1 + $0xa0] sm:$0xff] }
0x3124   :  { %8317 = vrcp.f32 %v5953_v49 }
0x3126   :  { %v5790_v42 = vpop.permute.xlu0 %5789  ;;  %v6120_v43 = vpop.xlane.xlu1 %6119 }
0x3127   :  { %7679 = vmatpush3.msra.mxu1 %v5790_v42  ;;  %8319 = vrcp.f32 %v6120_v43  ;;  %v7036_v42 = vld [vmem:[%s9317_s1 + $0xb0] sm:$0xff] }
0x3128   :  { %7688 = vmatprep.subr.mxu1 %v8344_v44  ;;  %v8064_v43 = vpack.c.bf16 %v7036_v42, %v7034_v38  ;;  %v7060_v38 = vld [vmem:[%s9344_s13 + $0x150] sm:$0xff]  ;;  %v7061_v42 = vld [vmem:[%s9344_s13 + $0x158] sm:$0xff] }
0x312a   :  { %v5957_v9 = vpop.permute.xlu1 %5956 }
0x312d   :  { %v8316_v45 = vpop.eup %8315 }
0x312e   :  { %v5787_v47 = vmul.f32 %v8316_v45, %v8312_v35  ;;  %v8318_v16 = vpop.eup %8317  ;;  %v6124_v51 = vpop.permute.xlu1 %6123  ;;  %v7032_v35 = vld [vmem:[%s9317_s1 + $0x90] sm:$0xff]  ;;  %v7039_v45 = vld [vmem:[%s9317_s1 + $0xc8] sm:$0xff] }
0x312f   :  { %v5955_v52 = vmul.f32 %v8318_v16, %v8310_v22  ;;  %v8060_v62 = vpack.c.bf16 %v7032_v35, %v7030_v37  ;;  %v7038_v16 = vld [vmem:[%s9317_s1 + $0xc0] sm:$0xff]  ;;  %v7059_v35 = vld [vmem:[%s9344_s13 + $0x148] sm:$0xff] }
0x3130   :  { %7681 = vmatmul.mubr.msk.f32.vlgmr.msra.gmra.mrb[70].mxu1 %vm4463_vm13, %v5787_v47  ;;  %v7041_v47 = vld [vmem:[%s9317_s1 + $0xd8] sm:$0xff]  ;;  %v7058_v37 = vld [vmem:[%s9344_s13 + $0x140] sm:$0xff] }
0x3131   :  { %7689 = vmatpush3.msra.mxu1 %v5957_v9  ;;  %7690 = vmatprep.mubr.msk.f32.mxu1 %vm8347_vm5, %v8344_v44  ;;  %v8320_v50 = vpop.eup %8319  ;;  %v8066_v9 = vpack.c.bf16 %v7041_v47, %v7039_v45  ;;  %v7078_v45 = vld [vmem:[%s9344_s13 + $0x1e0] sm:$0xff]  ;;  %v7079_v47 = vld [vmem:[%s9344_s13 + $0x1e8] sm:$0xff] }
0x3132   :  { %7698 = vmatprep.subr.mxu1 %v8344_v44  ;;  %v6122_v60 = vmul.f32 %v8320_v50, %v8314_v36  ;;  %v7035_v36 = vld [vmem:[%s9317_s1 + $0xa8] sm:$0xff] }
0x3133   :  { %v8062_v49 = vpack.c.bf16 %v7037_v24, %v7035_v36  ;;  %v7076_v36 = vld [vmem:[%s9344_s13 + $0x1d0] sm:$0xff]  ;;  %v7077_v24 = vld [vmem:[%s9344_s13 + $0x1d8] sm:$0xff] }
0x3134   :  { %7691 = vmatmul.mubr.msk.f32.vlgmr.msra.gmra.mrb[72].mxu1 %vm4463_vm13, %v5955_v52  ;;  %v7040_v52 = vld [vmem:[%s9317_s1 + $0xd0] sm:$0xff] }
0x3135   :  { %7699 = vmatpush3.msra.mxu1 %v6124_v51  ;;  %7700 = vmatprep.mubr.msk.f32.mxu1 %vm8347_vm5, %v8344_v44  ;;  %v8068_v50 = vpack.c.bf16 %v7040_v52, %v7038_v16  ;;  %v7043_v51 = vld [vmem:[%s9317_s1 + $0xe8] sm:$0xff]  ;;  %v7062_v16 = vld [vmem:[%s9344_s13 + $0x160] sm:$0xff] }
0x3136   :  { %v7063_v52 = vld [vmem:[%s9344_s13 + $0x168] sm:$0xff] }
0x3138   :  { %7701 = vmatmul.mubr.msk.f32.vlgmr.msra.gmra.mrb[74].mxu1 %vm4463_vm13, %v6122_v60  ;;  %v7045_v60 = vld [vmem:[%s9317_s1 + $0xf8] sm:$0xff] }
0x3139   :  { %6425 = vmatprep.mubr.f32.mxu1 %v8344_v44  ;;  %v8070_v53 = vpack.c.bf16 %v7045_v60, %v7043_v51  ;;  %v7080_v51 = vld [vmem:[%s9344_s13 + $0x1f0] sm:$0xff]  ;;  %v7081_v60 = vld [vmem:[%s9344_s13 + $0x1f8] sm:$0xff] }
0x313a   :  { %v8102_v8 = vpack.c.bf16 %v7081_v60, %v7080_v51  ;;  %v6668_v51 = vld [vmem:[%s6800_s20 + $0x30] sm:$0xff]  ;;  %v6669_v60 = vld [vmem:[%s6800_s20 + $0x38] sm:$0xff] }
0x3203   :  { %v5861_v25 = vpop.f32.mrb[70].mxu1 }
0x3204   :  { %6200 = vrot.lane.b32.xlu1 %v5861_v25, %s8354_s11  ;;  %v7682_v56 = vpop.f32.mrb[71].mxu1  ;;  %s1_s11 = sld [smem:[%s9620_s0]]  }
0x3205   :  { %v7066_v56 = vld [vmem:[%s9344_s13 + $0x180] sm:$0xff] }
0x3207   :  { %v6028_v58 = vpop.f32.mrb[72].mxu1 }
0x3208   :  { %6204 = vrot.lane.b32.xlu0 %v6028_v58, %s8351_s8  ;;  %v7692_v61 = vpop.f32.mrb[73].mxu1  ;;  %v7067_v58 = vld [vmem:[%s9344_s13 + $0x188] sm:$0xff]  ;;  %s6799_s8 = sld [smem:[%s9620_s0 + %s8373_s5]]  }
0x3209   :  { %v8074_v32 = vpack.c.bf16 %v7067_v58, %v7066_v56  ;;  %v7050_v61 = vld [vmem:[%s9344_s13 + $0x100] sm:$0xff] }
0x320b   :  { %v6195_v63 = vpop.f32.mrb[74].mxu1  ;;  %8075 = vmatprep.subr.bf16.mxu0 %v8074_v32 }
0x320c   :  { %6208 = vrot.lane.b32.xlu1 %v6195_v63, %s8350_s7  ;;  %v7702_v1 = vpop.f32.mrb[75].mxu1  ;;  %v7051_v63 = vld [vmem:[%s9344_s13 + $0x108] sm:$0xff] }
0x320d   :  { %v8076_v1 = vpack.c.bf16 %v7051_v63, %v7050_v61 }
0x3276   :  { %v6201_v2 = vpop.permute.xlu1 %6200 }
0x3277   :  { %v6211_v10 = vsel %vm449_vm6, %v9473_v7, %v6201_v2  ;;  %v8078_v2 = vpack.c.bf16 %v7069_v20, %v7068_v34 }
0x327a   :  { %v6205_v3 = vpop.permute.xlu0 %6204 }
0x327b   :  { %v6212_v39 = vsel %vm1128_vm11, %v6211_v10, %v6205_v3  ;;  %v7052_v3 = vld [vmem:[%s9344_s13 + $0x110] sm:$0xff]  ;;  %v7053_v10 = vld [vmem:[%s9344_s13 + $0x118] sm:$0xff] }
0x327e   :  { %v6209_v13 = vpop.permute.xlu1 %6208 }
0x327f   :  { %v6213_v14 = vsel %vm1130_vm10, %v6212_v39, %v6209_v13  ;;  %v8080_v39 = vpack.c.bf16 %v7053_v10, %v7052_v3  ;;  %v7070_v13 = vld [vmem:[%s9344_s13 + $0x1a0] sm:$0xff] }
0x3280   :  { %7720 = vmatmul.mubr.msk.f32.vlgmr.msra.gmra.mrb[62].mxu0 %vm153_vm0, %v6213_v14  ;;  %v7071_v14 = vld [vmem:[%s9344_s13 + $0x1a8] sm:$0xff] }
0x3281   :  { %8077 = vmatpush3.bf16.msra.mxu0 %v8076_v1 }
0x3282   :  { %8079 = vmatprep.subr.bf16.mxu0 %v8078_v2 }
0x3285   :  { %8081 = vmatpush3.bf16.msra.mxu0 %v8080_v39  ;;  %v7083_v39 = vld [vmem:[%s9392_s21 + $0x1] ss:$0 sm:$0xff] }
0x3353   :  { %v6300_v6 = vpop.f32.mrb[62].mxu0 }
0x3354   :  { %v6301_v15 = vadd.f32 %v7028_v41, %v6300_v6  ;;  %v7721_v18 = vpop.f32.mrb[63].mxu0  ;;  %v8082_v41 = vpack.c.bf16 %v7071_v14, %v7070_v13  ;;  %v7054_v6 = vld [vmem:[%s9344_s13 + $0x120] sm:$0xff] }
0x3356   :  { %v9521_v19 = vadd.f32 %v6301_v15, %v9396_v28  ;;  %v7033_v28 = vld [vmem:[%s9317_s1 + $0x98] sm:$0xff]  ;;  %v7055_v15 = vld [vmem:[%s9344_s13 + $0x128] sm:$0xff]  ;;  %8083 = vmatprep.subr.bf16.mxu0 %v8082_v41 }
0x3357   :  { %v8058_v30 = vpack.c.bf16 %v7033_v28, %v7031_v48  ;;  %v8084_v18 = vpack.c.bf16 %v7055_v15, %v7054_v6  ;;  %v7074_v48 = vld [vmem:[%s9344_s13 + $0x1c0] sm:$0xff]  ;;  %v7075_v28 = vld [vmem:[%s9344_s13 + $0x1c8] sm:$0xff] }
0x3358   :  { %v6305_v7 = vsel %vm153_vm0, %v9521_v19, 0.0 }
0x3359   :  { %6306 = vadd.xlane.f32.xlu0 %v6305_v7  ;;  %8059 = vmatprep.subr.bf16.mxu1 %v8058_v30  ;;  %v7072_v7 = vld [vmem:[%s9344_s13 + $0x1b0] sm:$0xff]  ;;  %v8090_v30 = vpack.c.bf16 %v7075_v28, %v7074_v48 }
0x335a   :  { %8061 = vmatpush1.bf16.msra.mxu1 %v8060_v62  ;;  %8085 = vmatpush3.bf16.msra.mxu0 %v8084_v18  ;;  %v8092_v62 = vpack.c.bf16 %v7059_v35, %v7058_v37  ;;  %v6585_v35 = vstv %s1_s11 }
0x335b   :  { %8063 = vmatprep.subr.bf16.mxu1 %v8062_v49  ;;  %v8094_v49 = vpack.c.bf16 %v7077_v24, %v7076_v36  ;;  %vm6586_vm15 = vcmp.eq.s32.totalorder %v9235_v59, %v6585_v35  ;;  %v6667_v59 = vld [vmem:[%s6800_s20 + $0x28] sm:$0xff] }
0x335e   :  { %8065 = vmatpush1.bf16.msra.mxu1 %v8064_v43  ;;  %v8096_v43 = vpack.c.bf16 %v7061_v42, %v7060_v38  ;;  %v6663_v38 = vld [vmem:[%s6800_s20 + $0x8] sm:$0xff] }
0x335f   :  { %8067 = vmatprep.subr.bf16.mxu1 %v8066_v9  ;;  %v8098_v9 = vpack.c.bf16 %v7079_v47, %v7078_v45  ;;  %v7084_v45 = vsel %vm6586_vm15, 1.0, %v8344_v44 }
0x3362   :  { %8069 = vmatpush1.bf16.msra.mxu1 %v8068_v50  ;;  %v8100_v50 = vpack.c.bf16 %v7063_v52, %v7062_v16  ;;  %v6665_v16 = vld [vmem:[%s6800_s20 + $0x18] sm:$0xff] }
0x3363   :  { %8071 = vmatprep.subr.bf16.mxu1 %v8070_v53  ;;  %v7064_v53 = vld [vmem:[%s9344_s13 + $0x170] sm:$0xff] }
0x3366   :  { %8073 = vmatpush1.bf16.msra.mxu1 %v8072_v12  ;;  %v8104_v12 = vpack.c.bf16 %v7065_v17, %v7064_v53 }
0x3367   :  { %7722 = vmatprep.subr.mxu1 %v8344_v44 }
0x33e6   :  { %v6307_v22 = vpop.xlane.xlu0 %6306 }
0x33e7   :  { %v6308_v23 = vmul.f32 0.015625, %v6307_v22  ;;  %v7073_v22 = vld [vmem:[%s9344_s13 + $0x1b8] sm:$0xff] }
0x33e9   :  { %v6309_v40 = vsub.f32 %v9521_v19, %v6308_v23  ;;  %v8086_v23 = vpack.c.bf16 %v7073_v22, %v7072_v7 }
0x33eb   :  { %v6310_v26 = vmul.f32 %v6309_v40, %v6309_v40  ;;  %8087 = vmatprep.subr.bf16.mxu0 %v8086_v23 }
0x33ed   :  { %v6311_v29 = vsel %vm153_vm0, %v6310_v26, 0.0  ;;  %v7057_v26 = vld [vmem:[%s9344_s13 + $0x138] sm:$0xff] }
0x33ee   :  { %6312 = vadd.xlane.f32.xlu1 %v6311_v29 }
0x347b   :  { %v6313_v33 = vpop.xlane.xlu1 %6312 }
0x347c   :  { %v6314_v11 = vmul.f32 0.015625, %v6313_v33  ;;  %v7046_v33 = vld [vmem:[%s9382_s4 + $0x2] sm:$0x3] }
0x347e   :  { %v6315_v4 = vadd.f32 1e-05, %v6314_v11  ;;  %v6351_v11 = vrot.slane %v7046_v33, %v8440_v46 }
0x3480   :  { %8321 = vrsqrt.f32 %v6315_v4  ;;  %v6355_v4 = vrot.slane %v7046_v33, %v8452_v5 }
0x348a   :  { %v8322_v27 = vpop.eup %8321 }
0x348b   :  { %v6317_v21 = vmul.f32 %v8322_v27, %v6309_v40  ;;  %v7056_v40 = vld [vmem:[%s9344_s13 + $0x130] sm:$0xff] }
0x348c   :  { %v8088_v29 = vpack.c.bf16 %v7057_v26, %v7056_v40  ;;  %v6743_v40 = vmul.f32 %v9193_v57, %v9193_v57 }
0x348d   :  { %v6322_v31 = vmul.f32 %v6321_v54, %v6317_v21 }
0x348e   :  { %8089 = vmatpush3.bf16.msra.mxu0 %v8088_v29  ;;  %v6745_v29 = vsel %vm6744_vm14, %v6743_v40, 0.0 }
0x348f   :  { %v6327_v25 = vadd.f32 %v6326_v55, %v6322_v31  ;;  %8091 = vmatprep.subr.bf16.mxu0 %v8090_v30  ;;  %v6560_v30 = vld [vmem:[%s6799_s8] sm:$0x3] }
0x3490   :  { %v6577_v37 = vrot.slane %v6560_v30, %v8440_v46  ;;  %v6582_v24 = vrot.slane %v6560_v30, %v8452_v5  ;;  %v6666_v5 = vld [vmem:[%s6800_s20 + $0x20] sm:$0xff] }
0x3491   :  { %7047 = vmatmul.mubr.msk.f32.vlgmr.msra.gmra.mrb[76].mxu1 %vm153_vm0, %v6327_v25 }
0x3492   :  { %7724 = vmatprep.mubr.msk.f32.mxu1 %vm8347_vm5, %v8344_v44  ;;  %8093 = vmatpush3.bf16.msra.mxu0 %v8092_v62 }
0x3493   :  { %8095 = vmatprep.subr.bf16.mxu0 %v8094_v49  ;;  %v6662_v49 = vld [vmem:[%s6800_s20] sm:$0xff] }
0x3494   :  { %v8107_v47 = vpack.c.bf16 %v6663_v38, %v6662_v49 }
0x3496   :  { %8097 = vmatpush3.bf16.msra.mxu0 %v8096_v43 }
0x3497   :  { %8099 = vmatprep.subr.bf16.mxu0 %v8098_v9  ;;  %v6664_v9 = vld [vmem:[%s6800_s20 + $0x10] sm:$0xff] }
0x3498   :  { %v8110_v52 = vpack.c.bf16 %v6665_v16, %v6664_v9 }
0x349a   :  { %8101 = vmatpush3.bf16.msra.mxu0 %v8100_v50  ;;  %v8113_v50 = vpack.c.bf16 %v6667_v59, %v6666_v5 }
0x349b   :  { %8103 = vmatprep.subr.bf16.mxu0 %v8102_v8  ;;  %v8116_v8 = vpack.c.bf16 %v6669_v60, %v6668_v51 }
0x349e   :  { %8105 = vmatpush3.bf16.msra.mxu0 %v8104_v12 }
0x3564   :  { %v6427_v54 = vpop.f32.mrb[76].mxu1 }
0x3565   :  { %v6428_v27 = vadd.f32 %v6427_v54, %v6351_v11  ;;  %v6429_v21 = vpop.f32.mrb[77].mxu1 }
0x3566   :  { %v6430_v55 = vadd.f32 %v6429_v21, %v6355_v4 }
0x3567   :  { %v7048_v31 = vmul.f32 -1.702, %v6428_v27 }
0x3568   :  { %v7049_v25 = vmul.f32 -1.702, %v6430_v55 }
0x3569   :  { %v6436_v56 = vmul.f32 1.442695, %v7048_v31 }
0x356a   :  { %v6438_v58 = vmul.f32 1.442695, %v7049_v25 }
0x356b   :  { %8323 = vpow2.f32 %v6436_v56 }
0x356c   :  { %8325 = vpow2.f32 %v6438_v58 }
0x3575   :  { %v8324_v32 = vpop.eup %8323 }
0x3576   :  { %v8326_v61 = vpop.eup %8325  ;;  %v6440_v63 = vadd.f32 1.0, %v8324_v32 }
0x3577   :  { %v6441_v1 = vadd.f32 1.0, %v8326_v61 }
0x3578   :  { %8327 = vrcp.f32 %v6440_v63 }
0x3579   :  { %8329 = vrcp.f32 %v6441_v1 }
0x3582   :  { %v8328_v34 = vpop.eup %8327 }
0x3583   :  { %v8330_v20 = vpop.eup %8329  ;;  %v6446_v3 = vmul.f32 %v8328_v34, %v6428_v27 }
0x3584   :  { %v6447_v2 = vmul.f32 %v8330_v20, %v6430_v55 }
0x3586   :  { %6553 = vmatprep.mubr.f32.mxu0 %v6447_v2 }
0x3587   :  { %6554 = vmatmul.mubr.f32.vlgmr.msra.gmra.mrb[64].mxu0 %v6446_v3 }
0x365a   :  { %v7373_v10 = vpop.f32.mrb[64].mxu0 }
0x365b   :  { %v7374_v13 = vpop.f32.mrb[65].mxu0 }
0x365c   :  { %v7375_v14 = vadd.f32 %v7374_v13, %v7373_v10 }
0x365e   :  { %v6556_v41 = vadd.f32 %v7375_v14, %v7083_v39 }
0x3660   :  { %v6559_v6 = vadd.f32 %v6556_v41, %v9521_v19 }
0x3662   :  { %v6561_v15 = vsel %vm153_vm0, %v6559_v6, 0.0 }
0x3663   :  { %6562 = vadd.xlane.f32.xlu0 %v6561_v15 }
0x36f0   :  { %v6563_v18 = vpop.xlane.xlu0 %6562 }
0x36f1   :  { %v6564_v7 = vmul.f32 0.015625, %v6563_v18 }
0x36f3   :  { %v6565_v22 = vsub.f32 %v6559_v6, %v6564_v7 }
0x36f5   :  { %v6566_v23 = vmul.f32 %v6565_v22, %v6565_v22 }
0x36f7   :  { %v6567_v26 = vsel %vm153_vm0, %v6566_v23, 0.0 }
0x36f8   :  { %6568 = vadd.xlane.f32.xlu0 %v6567_v26 }
0x36fc   :  { %6746 = vadd.xlane.f32.xlu0 %v6745_v29 }
0x3785   :  { %v6569_v48 = vpop.xlane.xlu0 %6568 }
0x3786   :  { %v6570_v28 = vmul.f32 0.015625, %v6569_v48 }
0x3788   :  { %v6571_v19 = vadd.f32 1e-05, %v6570_v28 }
0x3789   :  { %v6747_v4 = vpop.xlane.xlu0 %6746 }
0x378a   :  { %8331 = vrsqrt.f32 %v6571_v19 }
0x378b   :  { %8333 = vrsqrt.f32 %v6747_v4 }
0x3794   :  { %v8332_v62 = vpop.eup %8331 }
0x3795   :  { %v6573_v36 = vmul.f32 %v8332_v62, %v6565_v22  ;;  %v8334_v27 = vpop.eup %8333 }
0x3797   :  { %v6578_v42 = vmul.f32 %v6577_v37, %v6573_v36 }
0x3799   :  { %v6583_v43 = vadd.f32 %v6582_v24, %v6578_v42 }
0x379b   :  { %7723 = vmatpush3.msra.mxu1 %v6583_v43 }
0x379c   :  { %7725 = vmatmul.mubr.msk.f32.vlgmr.msra.gmra.mrb[78].mxu1 %vm4463_vm13, %v7084_v45  ;;  %8106 = vmatprep.subr.bf16.mxu1 %v8337_v0 }
0x379d   :  { %8108 = vmatpush3.bf16.msra.mxu1 %v8107_v47  ;;  %7743 = vmatprep.mubr.msk.f32.mxu1 %vm8347_vm5, %v8344_v44 }
0x379e   :  { %8109 = vmatprep.subr.bf16.mxu1 %v8337_v0 }
0x37a1   :  { %8111 = vmatpush3.bf16.msra.mxu1 %v8110_v52 }
0x37a2   :  { %8112 = vmatprep.subr.bf16.mxu1 %v8337_v0 }
0x37a5   :  { %8114 = vmatpush3.bf16.msra.mxu1 %v8113_v50 }
0x37a6   :  { %8115 = vmatprep.subr.bf16.mxu1 %v8337_v0  ;;  %v6749_v0 = vmul.f32 %v8334_v27, %v9193_v57 }
0x37a9   :  { %8117 = vmatpush3.bf16.msra.mxu1 %v8116_v8 }
0x386f   :  { %v6658_v53 = vpop.f32.mrb[78].mxu1 }
0x3870   :  { %7744 = vmatmul.mubr.msk.f32.vlgmr.msra.gmra.mrb[80].mxu1 %vm153_vm0, %v6658_v53  ;;  %v7726_v17 = vpop.f32.mrb[79].mxu1  ;;  %vm6766_vm0 = vcmask 1024  }
0x3943   :  { %v6739_v44 = vpop.f32.mrb[80].mxu1 }
0x3944   :  { %v6750_v12 = vmul.f32 %v6739_v44, %v6739_v44  ;;  %v7745_v33 = vpop.f32.mrb[81].mxu1 }
0x3946   :  { %v6752_v11 = vsel %vm6751_vm1, %v6750_v12, 0.0 }
0x3947   :  { %6753 = vadd.xlane.f32.xlu1 %v6752_v11 }
0x39d4   :  { %v6754_v54 = vpop.xlane.xlu1 %6753 }
0x39d5   :  { %8335 = vrsqrt.f32 %v6754_v54 }
0x39df   :  { %v8336_v21 = vpop.eup %8335 }
0x39e0   :  { %v6756_v55 = vmul.f32 %v8336_v21, %v6739_v44 }
0x39e2   :  { %v6760_v31 = vrot.slane %v6756_v55, %v8440_v46 }
0x39e4   :  { %v6761_v25 = vmul.f32 %v6760_v31, %v6749_v0 }
0x39e6   :  { %v6762_v56 = vsel %vm6744_vm14, %v6761_v25, 0.0 }
0x39e7   :  { %6763 = vadd.xlane.f32.xlu0 %v6762_v56 }
0x3a74   :  { %v6764_v58 = vpop.xlane.xlu0 %6763 }
0x3a75   :  { %v6765_v32 = vadd.f32 4.5, %v6764_v58 }
0x3a77   :  { %6767 = vst.msk [vmem:[%s6801_s25] sm:$0x3] %vm6766_vm0, %v6765_v32 }

</bundles_post_ra>
